<compile_context>
chip_gen: v5e
topology: v5e:2x2
jax: 0.10.0
libtpu: 0.0.40
codegen_flags: <defaults>
</compile_context>

<pallas_src>
import numpy as np
import jax
import jax.numpy as jnp
from jax.experimental import pallas as pl
from jax.experimental.pallas import tpu as pltpu

_BN_EPS = 1e-5
_VMEM_LIMIT = 32 * 1024 * 1024


# ---------------------------------------------------------------------------
# Fused per-encoder kernel (one grid step per encoder).
# ---------------------------------------------------------------------------
def _make_encoder_kernel(n_sp, batch):
    """n_sp: # of pooled conv2 spatial positions; batch: N of the input."""

    def kernel(p1_ref, w1_ref, cb1_ref, g1_ref, bt1_ref,
               sel_ref, w2_ref, cb2_ref, g2_ref, bt2_ref,
               wf1_ref, bf1_ref, wf2_ref, bf2_ref, out_ref):
        f32 = jnp.float32

        # ---- conv1 as (O1,K1)@(K1,M1): M1 lane-dense, columns (quadrant,b,i,j)
        y1 = jnp.dot(w1_ref[0], p1_ref[0], preferred_element_type=f32)
        y1 = jnp.maximum(y1 + cb1_ref[0], 0.0)                     # bias + ReLU
        mu1 = jnp.mean(y1, axis=1, keepdims=True)                  # BN batch stats
        var1 = jnp.mean(jnp.square(y1 - mu1), axis=1, keepdims=True)
        y1 = g1_ref[0] * (y1 - mu1) * jax.lax.rsqrt(var1 + _BN_EPS) + bt1_ref[0]

        # ---- maxpool1 2x2: reduce over the 4 lane-aligned quadrant groups
        gw = y1.shape[1] // 4
        pool1 = jnp.maximum(jnp.maximum(y1[:, :gw], y1[:, gw:2 * gw]),
                            jnp.maximum(y1[:, 2 * gw:3 * gw], y1[:, 3 * gw:]))
        pool1 = pool1.astype(jnp.bfloat16)                         # (O1, P1)

        # ---- conv2 im2col via constant 0/1 selection matmuls (stays on-chip)
        taps = [jnp.dot(pool1, sel_ref[t], preferred_element_type=f32)
                for t in range(9)]                                  # 9 x (O1, M2)
        patches2 = jnp.concatenate(taps, axis=0).astype(jnp.bfloat16)  # (9*O1, M2)

        # ---- conv2 + bias + ReLU + train-mode BN
        y2 = jnp.dot(w2_ref[0], patches2, preferred_element_type=f32)  # (O2, M2)
        y2 = jnp.maximum(y2 + cb2_ref[0], 0.0)
        mu2 = jnp.mean(y2, axis=1, keepdims=True)
        var2 = jnp.mean(jnp.square(y2 - mu2), axis=1, keepdims=True)
        y2 = g2_ref[0] * (y2 - mu2) * jax.lax.rsqrt(var2 + _BN_EPS) + bt2_ref[0]

        # ---- maxpool2 2x2 (same quadrant-group trick)
        gw2 = y2.shape[1] // 4
        pool2 = jnp.maximum(jnp.maximum(y2[:, :gw2], y2[:, gw2:2 * gw2]),
                            jnp.maximum(y2[:, 2 * gw2:3 * gw2], y2[:, 3 * gw2:]))

        # ---- flatten -> (F, B): fc1 weight rows were pre-permuted to match
        feats = jnp.concatenate(
            [pool2[:, s * batch:(s + 1) * batch] for s in range(n_sp)],
            axis=0).astype(jnp.bfloat16)                            # (F, B)

        # ---- FC1 + ReLU + FC2 ((B,800) intermediate never leaves the chip)
        # transposed-lhs dot_general folds the (F,B)->(B,F) flip into the MXU.
        h = jax.lax.dot_general(feats, wf1_ref[0], (((0,), (0,)), ((), ())),
                                preferred_element_type=f32)         # (B, N1)
        h = jnp.maximum(h + bf1_ref[0], 0.0).astype(jnp.bfloat16)
        out = jnp.dot(h, wf2_ref[0], preferred_element_type=f32) + bf2_ref[0]
        out_ref[0] = out.astype(out_ref.dtype)                      # (B, N2)

    return kernel


def _encoder_chain(patches, params, batch):
    """patches: (E, 9*Cin, M1) bf16 with M1 columns ordered (quadrant,b,i,j)."""
    E, K1, M1 = patches.shape
    sel = params["conv2_sel"]
    _, P1, M2 = sel.shape
    O1 = params["conv1_wm"].shape[1]
    O2 = params["conv2_wm"].shape[1]
    F, N1 = params["fc1_wm"].shape[1:]
    N2 = params["fc2_wm"].shape[2]
    n_sp = F // O2

    return pl.pallas_call(
        _make_encoder_kernel(n_sp, batch),
        out_shape=jax.ShapeDtypeStruct((E, batch, N2), jnp.float32),
        grid=(E,),
        in_specs=[
            pl.BlockSpec((1, K1, M1), lambda e: (e, 0, 0)),       # conv1 patches
            pl.BlockSpec((1, O1, K1), lambda e: (e, 0, 0)),       # conv1 weight mat
            pl.BlockSpec((1, O1, 1), lambda e: (e, 0, 0)),        # conv1 bias
            pl.BlockSpec((1, O1, 1), lambda e: (e, 0, 0)),        # bn1 gamma
            pl.BlockSpec((1, O1, 1), lambda e: (e, 0, 0)),        # bn1 beta
            pl.BlockSpec((9, P1, M2), lambda e: (0, 0, 0)),       # conv2 selection (shared)
            pl.BlockSpec((1, O2, 9 * O1), lambda e: (e, 0, 0)),   # conv2 weight mat
            pl.BlockSpec((1, O2, 1), lambda e: (e, 0, 0)),        # conv2 bias
            pl.BlockSpec((1, O2, 1), lambda e: (e, 0, 0)),        # bn2 gamma
            pl.BlockSpec((1, O2, 1), lambda e: (e, 0, 0)),        # bn2 beta
            pl.BlockSpec((1, F, N1), lambda e: (e, 0, 0)),        # fc1 weight (F, 800)
            pl.BlockSpec((1, 1, N1), lambda e: (e, 0, 0)),        # fc1 bias
            pl.BlockSpec((1, N1, N2), lambda e: (e, 0, 0)),       # fc2 weight (800, 400)
            pl.BlockSpec((1, 1, N2), lambda e: (e, 0, 0)),        # fc2 bias
        ],
        out_specs=pl.BlockSpec((1, batch, N2), lambda e: (e, 0, 0)),
        compiler_params=pltpu.CompilerParams(
            dimension_semantics=("parallel",),
            vmem_limit_bytes=_VMEM_LIMIT),
    )(patches,
      params["conv1_wm"], params["conv1_b"], params["bn1_gamma"], params["bn1_beta"],
      sel,
      params["conv2_wm"], params["conv2_b"], params["bn2_gamma"], params["bn2_beta"],
      params["fc1_wm"], params["fc1_b"], params["fc2_wm"], params["fc2_b"])


# ---------------------------------------------------------------------------
# XLA glue: conv1 im2col of the raw input (only per-call layout transform left).
# TODO(synk): could move this 9-tap gather into the kernel via strided VMEM
#             reads if the input ever becomes large enough to matter.
# ---------------------------------------------------------------------------
def _extract_conv1_patches(x_nhwc):
    """(E,B,H,W,C) -> (E, 9*C, 4*B*(H//4)*(W//4)) bf16.

    K rows ordered (kh, kw, c); M columns ordered (pool-quadrant, b, i, j) so
    the in-kernel 2x2 max-pool is a max over 4 lane-aligned column groups.
    """
    E, B, H, W, C = x_nhwc.shape
    Ho, Wo = H // 2, W // 2                      # conv1 output (k3, s2, p1)
    ph, pw = Ho // 2, Wo // 2                    # pooled spatial
    xp = jnp.pad(x_nhwc, ((0, 0), (0, 0), (1, 1), (1, 1), (0, 0)))
    taps = []
    for dh in range(3):
        for dw in range(3):
            taps.append(xp[:, :, dh:dh + 2 * Ho - 1:2, dw:dw + 2 * Wo - 1:2, :])
    p = jnp.stack(taps, axis=-2)                 # (E, B, Ho, Wo, 9, C)
    p = p.reshape(E, B, ph, 2, pw, 2, 9, C)      # split (i1,qh) / (j1,qw)
    p = jnp.transpose(p, (0, 6, 7, 3, 5, 1, 2, 4))   # (E, 9, C, qh, qw, B, i1, j1)
    return p.reshape(E, 9 * C, 4 * B * ph * pw).astype(jnp.bfloat16)


def _build_conv2_selection(batch, ph, pw, h2, w2):
    """Constant 0/1 matrices: pooled1 columns -> conv2 im2col columns (9 taps).

    pooled1 column p = b*ph*pw + hi*pw + wi
    conv2   column m2 = q2*(n_sp*B) + sp2*B + b   (q2: pool2 quadrant)
    Missing entries encode the conv2 zero padding.
    """
    n_sp = (h2 // 2) * (w2 // 2)
    sel = np.zeros((9, batch * ph * pw, 4 * n_sp * batch), np.float32)
    for dh in range(3):
        for dw in range(3):
            t = dh * 3 + dw
            for b in range(batch):
                for ho2 in range(h2):
                    for wo2 in range(w2):
                        hi = 2 * ho2 + dh - 1
                        wi = 2 * wo2 + dw - 1
                        if 0 <= hi < ph and 0 <= wi < pw:
                            q2 = (ho2 % 2) * 2 + (wo2 % 2)
                            sp2 = (ho2 // 2) * (w2 // 2) + (wo2 // 2)
                            m2 = q2 * (n_sp * batch) + sp2 * batch + b
                            p = b * ph * pw + hi * pw + wi
                            sel[t, p, m2] = 1.0
    return sel


# ---------------------------------------------------------------------------
# One-time parameter re-layout (review item: out of the per-call path).
# ---------------------------------------------------------------------------
def prepare_params(raw, batch, height, width):
    E, O1, C = raw["conv1_w"].shape[:3]
    O2 = raw["conv2_w"].shape[1]
    N1 = raw["fc1_w"].shape[1]
    N2 = raw["fc2_w"].shape[1]
    assert height % 16 == 0 and width % 16 == 0, "fused chain needs H, W % 16 == 0"
    ph, pw = height // 4, width // 4             # pooled conv1 spatial
    h2, w2 = ph // 2, pw // 2                    # conv2 output spatial
    n_sp = (h2 // 2) * (w2 // 2)                 # pooled conv2 spatial
    feat = O2 * n_sp
    assert raw["fc1_w"].shape[2] == feat, "fc1 in_features mismatch"

    conv1_wm = jnp.transpose(raw["conv1_w"], (0, 1, 3, 4, 2)).reshape(E, O1, 9 * C)
    conv2_wm = jnp.transpose(raw["conv2_w"], (0, 1, 3, 4, 2)).reshape(E, O2, 9 * O1)
    # Flatten order (c, sp) is absorbed here: kernel feature rows are (sp, c).
    fc1_wm = jnp.transpose(raw["fc1_w"].reshape(E, N1, O2, n_sp),
                           (0, 3, 2, 1)).reshape(E, feat, N1)
    fc2_wm = jnp.transpose(raw["fc2_w"], (0, 2, 1))

    return {
        "conv1_wm": conv1_wm.astype(jnp.bfloat16),
        "conv1_b": raw["conv1_b"].reshape(E, O1, 1).astype(jnp.float32),
        "bn1_gamma": raw["bn1_gamma"].reshape(E, O1, 1).astype(jnp.float32),
        "bn1_beta": raw["bn1_beta"].reshape(E, O1, 1).astype(jnp.float32),
        "conv2_sel": jnp.asarray(_build_conv2_selection(batch, ph, pw, h2, w2),
                                 jnp.bfloat16),
        "conv2_wm": conv2_wm.astype(jnp.bfloat16),
        "conv2_b": raw["conv2_b"].reshape(E, O2, 1).astype(jnp.float32),
        "bn2_gamma": raw["bn2_gamma"].reshape(E, O2, 1).astype(jnp.float32),
        "bn2_beta": raw["bn2_beta"].reshape(E, O2, 1).astype(jnp.float32),
        "fc1_wm": fc1_wm.astype(jnp.bfloat16),
        "fc1_b": raw["fc1_b"].reshape(E, 1, N1).astype(jnp.float32),
        "fc2_wm": fc2_wm.astype(jnp.bfloat16),
        "fc2_b": raw["fc2_b"].reshape(E, 1, N2).astype(jnp.float32),
    }


# ---------------------------------------------------------------------------
# ImagesEncoder forward: XLA input im2col + ONE fused pallas_call.
# ---------------------------------------------------------------------------
def images_encoder_forward(params, x1, x2, x3):
    x = jnp.stack([x1, x2, x3], axis=0).astype(jnp.float32)   # (3, B, C, H, W)
    batch = x.shape[1]
    x = jnp.transpose(x, (0, 1, 3, 4, 2))                     # NCHW -> NHWC
    patches = _extract_conv1_patches(x)                       # (3, 9C, M1) bf16
    out = _encoder_chain(patches, params, batch)               # (3, B, 400)
    return out[0], out[1], out[2]


# ---------------------------------------------------------------------------
# Deterministic synthetic parameters (torch layouts, stacked over 3 encoders).
# ---------------------------------------------------------------------------
def init_images_encoder_params(key, in_channels, features, num_encoders=3):
    E = num_encoders
    ks = jax.random.split(key, 8)
    return {
        "conv1_w": 0.1 * jax.random.normal(ks[0], (E, 8, in_channels, 3, 3), jnp.float32),
        "conv1_b": 0.1 * jax.random.normal(ks[1], (E, 8), jnp.float32),
        "bn1_gamma": jnp.ones((E, 8), jnp.float32),
        "bn1_beta": jnp.zeros((E, 8), jnp.float32),
        "conv2_w": 0.1 * jax.random.normal(ks[2], (E, 16, 8, 3, 3), jnp.float32),
        "conv2_b": 0.1 * jax.random.normal(ks[3], (E, 16), jnp.float32),
        "bn2_gamma": jnp.ones((E, 16), jnp.float32),
        "bn2_beta": jnp.zeros((E, 16), jnp.float32),
        "fc1_w": 0.05 * jax.random.normal(ks[4], (E, 800, features), jnp.float32),
        "fc1_b": 0.05 * jax.random.normal(ks[5], (E, 800), jnp.float32),
        "fc2_w": 0.05 * jax.random.normal(ks[6], (E, 400, 800), jnp.float32),
        "fc2_b": 0.05 * jax.random.normal(ks[7], (E, 400), jnp.float32),
    }


if __name__ == "__main__":
    # (B=2, C=4, 32, 32) -> conv/pool -> (8, 8, 8) -> conv/pool -> (16, 2, 2)
    #   => features = 16 * 2 * 2 = 64
    B, C, H, W = 2, 4, 32, 32
    features = 16 * (H // 16) * (W // 16)

    key = jax.random.PRNGKey(0)
    kp, kx1, kx2, kx3 = jax.random.split(key, 4)
    raw_params = init_images_encoder_params(kp, C, features)
    params = prepare_params(raw_params, B, H, W)   # one-time weight re-layout

    x1 = jax.random.normal(kx1, (B, C, H, W), jnp.float32)
    x2 = jax.random.normal(kx2, (B, C, H, W), jnp.float32)
    x3 = jax.random.normal(kx3, (B, C, H, W), jnp.float32)

    fwd = jax.jit(images_encoder_forward)
    y1, y2, y3 = fwd(params, x1, x2, x3)
    jax.block_until_ready((y1, y2, y3))

    assert y1.shape == (B, 400) and y2.shape == (B, 400) and y3.shape == (B, 400)
    print("KERNEL_OK")
</pallas_src>

<mosaic_0001>
module attributes {stable_mosaic.version = 11 : i64} {
  func.func @kernel(%arg0: i32, %arg1: memref<1x36x512xbf16, #tpu.memory_space<vmem>>, %arg2: memref<1x8x36xbf16, #tpu.memory_space<vmem>>, %arg3: memref<1x8x1xf32, #tpu.memory_space<vmem>>, %arg4: memref<1x8x1xf32, #tpu.memory_space<vmem>>, %arg5: memref<1x8x1xf32, #tpu.memory_space<vmem>>, %arg6: memref<9x128x32xbf16, #tpu.memory_space<vmem>>, %arg7: memref<1x16x72xbf16, #tpu.memory_space<vmem>>, %arg8: memref<1x16x1xf32, #tpu.memory_space<vmem>>, %arg9: memref<1x16x1xf32, #tpu.memory_space<vmem>>, %arg10: memref<1x16x1xf32, #tpu.memory_space<vmem>>, %arg11: memref<1x64x800xbf16, #tpu.memory_space<vmem>>, %arg12: memref<1x1x800xf32, #tpu.memory_space<vmem>>, %arg13: memref<1x800x400xbf16, #tpu.memory_space<vmem>>, %arg14: memref<1x1x400xf32, #tpu.memory_space<vmem>>, %arg15: memref<1x2x400xf32, #tpu.memory_space<vmem>>) attributes {dimension_semantics = [#tpu.dimension_semantics<parallel>], iteration_bounds = array<i64: 3>, scalar_prefetch = 0 : i64, scratch_operands = 0 : i64, tpu.core_type = #tpu.core_type<tc>, window_params = [{transform_indices = @transform_0, window_bounds = array<i64: 1, 36, 512>}, {transform_indices = @transform_1, window_bounds = array<i64: 1, 8, 36>}, {transform_indices = @transform_2, window_bounds = array<i64: 1, 8, 1>}, {transform_indices = @transform_3, window_bounds = array<i64: 1, 8, 1>}, {transform_indices = @transform_4, window_bounds = array<i64: 1, 8, 1>}, {pipeline_mode = #tpu.pipeline_mode<synchronous>, transform_indices = @transform_5, window_bounds = array<i64: 9, 128, 32>}, {transform_indices = @transform_6, window_bounds = array<i64: 1, 16, 72>}, {transform_indices = @transform_7, window_bounds = array<i64: 1, 16, 1>}, {transform_indices = @transform_8, window_bounds = array<i64: 1, 16, 1>}, {transform_indices = @transform_9, window_bounds = array<i64: 1, 16, 1>}, {transform_indices = @transform_10, window_bounds = array<i64: 1, 64, 800>}, {transform_indices = @transform_11, window_bounds = array<i64: 1, 1, 800>}, {transform_indices = @transform_12, window_bounds = array<i64: 1, 800, 400>}, {transform_indices = @transform_13, window_bounds = array<i64: 1, 1, 400>}, {transform_indices = @transform_14, window_bounds = array<i64: 1, 2, 400>}]} {
    %c0 = arith.constant 0 : index
    %c0_0 = arith.constant 0 : index
    %c0_1 = arith.constant 0 : index
    %0 = vector.load %arg2[%c0, %c0_0, %c0_1] : memref<1x8x36xbf16, #tpu.memory_space<vmem>>, vector<1x8x36xbf16>
    %1 = vector.shape_cast %0 : vector<1x8x36xbf16> to vector<8x36xbf16>
    %c0_2 = arith.constant 0 : index
    %c0_3 = arith.constant 0 : index
    %c0_4 = arith.constant 0 : index
    %2 = vector.load %arg1[%c0_2, %c0_3, %c0_4] : memref<1x36x512xbf16, #tpu.memory_space<vmem>>, vector<1x36x512xbf16>
    %3 = vector.shape_cast %2 : vector<1x36x512xbf16> to vector<36x512xbf16>
    %cst = arith.constant dense<0.000000e+00> : vector<8x512xf32>
    %4 = tpu.matmul %1, %3, %cst {dimension_numbers = #tpu.dot_dimension_numbers<[1], [0], [0], [1], [0, 0, 1, 1], [], []>} : vector<8x36xbf16>, vector<36x512xbf16>, vector<8x512xf32> -> vector<8x512xf32>
    %c0_5 = arith.constant 0 : index
    %c0_6 = arith.constant 0 : index
    %c0_7 = arith.constant 0 : index
    %5 = vector.load %arg3[%c0_5, %c0_6, %c0_7] : memref<1x8x1xf32, #tpu.memory_space<vmem>>, vector<1x8x1xf32>
    %6 = vector.shape_cast %5 : vector<1x8x1xf32> to vector<8x1xf32>
    %7 = vector.broadcast %6 : vector<8x1xf32> to vector<8x512xf32>
    %8 = arith.addf %4, %7 : vector<8x512xf32>
    %cst_8 = arith.constant 0.000000e+00 : f32
    %9 = vector.broadcast %cst_8 : f32 to vector<8x512xf32>
    %10 = arith.maximumf %8, %9 : vector<8x512xf32>
    %cst_9 = arith.constant dense<0.000000e+00> : vector<8xf32>
    %11 = vector.multi_reduction <add>, %10, %cst_9 [1] : vector<8x512xf32> to vector<8xf32>
    %12 = vector.shape_cast %11 : vector<8xf32> to vector<8x1xf32>
    %cst_10 = arith.constant 5.120000e+02 : f32
    %13 = vector.broadcast %cst_10 : f32 to vector<8x1xf32>
    %14 = arith.divf %12, %13 : vector<8x1xf32>
    %15 = vector.broadcast %14 : vector<8x1xf32> to vector<8x512xf32>
    %16 = arith.subf %10, %15 : vector<8x512xf32>
    %17 = arith.mulf %16, %16 : vector<8x512xf32>
    %cst_11 = arith.constant dense<0.000000e+00> : vector<8xf32>
    %18 = vector.multi_reduction <add>, %17, %cst_11 [1] : vector<8x512xf32> to vector<8xf32>
    %19 = vector.shape_cast %18 : vector<8xf32> to vector<8x1xf32>
    %cst_12 = arith.constant 5.120000e+02 : f32
    %20 = vector.broadcast %cst_12 : f32 to vector<8x1xf32>
    %21 = arith.divf %19, %20 : vector<8x1xf32>
    %c0_13 = arith.constant 0 : index
    %c0_14 = arith.constant 0 : index
    %c0_15 = arith.constant 0 : index
    %22 = vector.load %arg4[%c0_13, %c0_14, %c0_15] : memref<1x8x1xf32, #tpu.memory_space<vmem>>, vector<1x8x1xf32>
    %23 = vector.shape_cast %22 : vector<1x8x1xf32> to vector<8x1xf32>
    %24 = vector.broadcast %14 : vector<8x1xf32> to vector<8x512xf32>
    %25 = arith.subf %10, %24 : vector<8x512xf32>
    %26 = vector.broadcast %23 : vector<8x1xf32> to vector<8x512xf32>
    %27 = arith.mulf %26, %25 : vector<8x512xf32>
    %cst_16 = arith.constant 9.99999974E-6 : f32
    %28 = vector.broadcast %cst_16 : f32 to vector<8x1xf32>
    %29 = arith.addf %21, %28 : vector<8x1xf32>
    %30 = math.rsqrt %29 : vector<8x1xf32>
    %31 = vector.broadcast %30 : vector<8x1xf32> to vector<8x512xf32>
    %32 = arith.mulf %27, %31 : vector<8x512xf32>
    %c0_17 = arith.constant 0 : index
    %c0_18 = arith.constant 0 : index
    %c0_19 = arith.constant 0 : index
    %33 = vector.load %arg5[%c0_17, %c0_18, %c0_19] : memref<1x8x1xf32, #tpu.memory_space<vmem>>, vector<1x8x1xf32>
    %34 = vector.shape_cast %33 : vector<1x8x1xf32> to vector<8x1xf32>
    %35 = vector.broadcast %34 : vector<8x1xf32> to vector<8x512xf32>
    %36 = arith.addf %32, %35 : vector<8x512xf32>
    %37 = vector.extract_strided_slice %36 {offsets = [0, 0], sizes = [8, 128], strides = [1, 1]} : vector<8x512xf32> to vector<8x128xf32>
    %38 = vector.extract_strided_slice %36 {offsets = [0, 128], sizes = [8, 128], strides = [1, 1]} : vector<8x512xf32> to vector<8x128xf32>
    %39 = arith.maximumf %37, %38 : vector<8x128xf32>
    %40 = vector.extract_strided_slice %36 {offsets = [0, 256], sizes = [8, 128], strides = [1, 1]} : vector<8x512xf32> to vector<8x128xf32>
    %41 = vector.extract_strided_slice %36 {offsets = [0, 384], sizes = [8, 128], strides = [1, 1]} : vector<8x512xf32> to vector<8x128xf32>
    %42 = arith.maximumf %40, %41 : vector<8x128xf32>
    %43 = arith.maximumf %39, %42 : vector<8x128xf32>
    %44 = arith.truncf %43 : vector<8x128xf32> to vector<8x128xbf16>
    %c0_20 = arith.constant 0 : index
    %c0_21 = arith.constant 0 : index
    %c0_22 = arith.constant 0 : index
    %45 = vector.load %arg6[%c0_20, %c0_21, %c0_22] : memref<9x128x32xbf16, #tpu.memory_space<vmem>>, vector<1x128x32xbf16>
    %46 = vector.shape_cast %45 : vector<1x128x32xbf16> to vector<128x32xbf16>
    %cst_23 = arith.constant dense<0.000000e+00> : vector<8x32xf32>
    %47 = tpu.matmul %44, %46, %cst_23 {dimension_numbers = #tpu.dot_dimension_numbers<[1], [0], [0], [1], [0, 0, 1, 1], [], []>} : vector<8x128xbf16>, vector<128x32xbf16>, vector<8x32xf32> -> vector<8x32xf32>
    %c1 = arith.constant 1 : index
    %c0_24 = arith.constant 0 : index
    %c0_25 = arith.constant 0 : index
    %48 = vector.load %arg6[%c1, %c0_24, %c0_25] : memref<9x128x32xbf16, #tpu.memory_space<vmem>>, vector<1x128x32xbf16>
    %49 = vector.shape_cast %48 : vector<1x128x32xbf16> to vector<128x32xbf16>
    %cst_26 = arith.constant dense<0.000000e+00> : vector<8x32xf32>
    %50 = tpu.matmul %44, %49, %cst_26 {dimension_numbers = #tpu.dot_dimension_numbers<[1], [0], [0], [1], [0, 0, 1, 1], [], []>} : vector<8x128xbf16>, vector<128x32xbf16>, vector<8x32xf32> -> vector<8x32xf32>
    %c2 = arith.constant 2 : index
    %c0_27 = arith.constant 0 : index
    %c0_28 = arith.constant 0 : index
    %51 = vector.load %arg6[%c2, %c0_27, %c0_28] : memref<9x128x32xbf16, #tpu.memory_space<vmem>>, vector<1x128x32xbf16>
    %52 = vector.shape_cast %51 : vector<1x128x32xbf16> to vector<128x32xbf16>
    %cst_29 = arith.constant dense<0.000000e+00> : vector<8x32xf32>
    %53 = tpu.matmul %44, %52, %cst_29 {dimension_numbers = #tpu.dot_dimension_numbers<[1], [0], [0], [1], [0, 0, 1, 1], [], []>} : vector<8x128xbf16>, vector<128x32xbf16>, vector<8x32xf32> -> vector<8x32xf32>
    %c3 = arith.constant 3 : index
    %c0_30 = arith.constant 0 : index
    %c0_31 = arith.constant 0 : index
    %54 = vector.load %arg6[%c3, %c0_30, %c0_31] : memref<9x128x32xbf16, #tpu.memory_space<vmem>>, vector<1x128x32xbf16>
    %55 = vector.shape_cast %54 : vector<1x128x32xbf16> to vector<128x32xbf16>
    %cst_32 = arith.constant dense<0.000000e+00> : vector<8x32xf32>
    %56 = tpu.matmul %44, %55, %cst_32 {dimension_numbers = #tpu.dot_dimension_numbers<[1], [0], [0], [1], [0, 0, 1, 1], [], []>} : vector<8x128xbf16>, vector<128x32xbf16>, vector<8x32xf32> -> vector<8x32xf32>
    %c4 = arith.constant 4 : index
    %c0_33 = arith.constant 0 : index
    %c0_34 = arith.constant 0 : index
    %57 = vector.load %arg6[%c4, %c0_33, %c0_34] : memref<9x128x32xbf16, #tpu.memory_space<vmem>>, vector<1x128x32xbf16>
    %58 = vector.shape_cast %57 : vector<1x128x32xbf16> to vector<128x32xbf16>
    %cst_35 = arith.constant dense<0.000000e+00> : vector<8x32xf32>
    %59 = tpu.matmul %44, %58, %cst_35 {dimension_numbers = #tpu.dot_dimension_numbers<[1], [0], [0], [1], [0, 0, 1, 1], [], []>} : vector<8x128xbf16>, vector<128x32xbf16>, vector<8x32xf32> -> vector<8x32xf32>
    %c5 = arith.constant 5 : index
    %c0_36 = arith.constant 0 : index
    %c0_37 = arith.constant 0 : index
    %60 = vector.load %arg6[%c5, %c0_36, %c0_37] : memref<9x128x32xbf16, #tpu.memory_space<vmem>>, vector<1x128x32xbf16>
    %61 = vector.shape_cast %60 : vector<1x128x32xbf16> to vector<128x32xbf16>
    %cst_38 = arith.constant dense<0.000000e+00> : vector<8x32xf32>
    %62 = tpu.matmul %44, %61, %cst_38 {dimension_numbers = #tpu.dot_dimension_numbers<[1], [0], [0], [1], [0, 0, 1, 1], [], []>} : vector<8x128xbf16>, vector<128x32xbf16>, vector<8x32xf32> -> vector<8x32xf32>
    %c6 = arith.constant 6 : index
    %c0_39 = arith.constant 0 : index
    %c0_40 = arith.constant 0 : index
    %63 = vector.load %arg6[%c6, %c0_39, %c0_40] : memref<9x128x32xbf16, #tpu.memory_space<vmem>>, vector<1x128x32xbf16>
    %64 = vector.shape_cast %63 : vector<1x128x32xbf16> to vector<128x32xbf16>
    %cst_41 = arith.constant dense<0.000000e+00> : vector<8x32xf32>
    %65 = tpu.matmul %44, %64, %cst_41 {dimension_numbers = #tpu.dot_dimension_numbers<[1], [0], [0], [1], [0, 0, 1, 1], [], []>} : vector<8x128xbf16>, vector<128x32xbf16>, vector<8x32xf32> -> vector<8x32xf32>
    %c7 = arith.constant 7 : index
    %c0_42 = arith.constant 0 : index
    %c0_43 = arith.constant 0 : index
    %66 = vector.load %arg6[%c7, %c0_42, %c0_43] : memref<9x128x32xbf16, #tpu.memory_space<vmem>>, vector<1x128x32xbf16>
    %67 = vector.shape_cast %66 : vector<1x128x32xbf16> to vector<128x32xbf16>
    %cst_44 = arith.constant dense<0.000000e+00> : vector<8x32xf32>
    %68 = tpu.matmul %44, %67, %cst_44 {dimension_numbers = #tpu.dot_dimension_numbers<[1], [0], [0], [1], [0, 0, 1, 1], [], []>} : vector<8x128xbf16>, vector<128x32xbf16>, vector<8x32xf32> -> vector<8x32xf32>
    %c8 = arith.constant 8 : index
    %c0_45 = arith.constant 0 : index
    %c0_46 = arith.constant 0 : index
    %69 = vector.load %arg6[%c8, %c0_45, %c0_46] : memref<9x128x32xbf16, #tpu.memory_space<vmem>>, vector<1x128x32xbf16>
    %70 = vector.shape_cast %69 : vector<1x128x32xbf16> to vector<128x32xbf16>
    %cst_47 = arith.constant dense<0.000000e+00> : vector<8x32xf32>
    %71 = tpu.matmul %44, %70, %cst_47 {dimension_numbers = #tpu.dot_dimension_numbers<[1], [0], [0], [1], [0, 0, 1, 1], [], []>} : vector<8x128xbf16>, vector<128x32xbf16>, vector<8x32xf32> -> vector<8x32xf32>
    %72 = tpu.concatenate %47, %50, %53, %56, %59, %62, %65, %68, %71 in 0 : vector<8x32xf32>, vector<8x32xf32>, vector<8x32xf32>, vector<8x32xf32>, vector<8x32xf32>, vector<8x32xf32>, vector<8x32xf32>, vector<8x32xf32>, vector<8x32xf32> -> vector<72x32xf32>
    %73 = arith.truncf %72 : vector<72x32xf32> to vector<72x32xbf16>
    %c0_48 = arith.constant 0 : index
    %c0_49 = arith.constant 0 : index
    %c0_50 = arith.constant 0 : index
    %74 = vector.load %arg7[%c0_48, %c0_49, %c0_50] : memref<1x16x72xbf16, #tpu.memory_space<vmem>>, vector<1x16x72xbf16>
    %75 = vector.shape_cast %74 : vector<1x16x72xbf16> to vector<16x72xbf16>
    %cst_51 = arith.constant dense<0.000000e+00> : vector<16x32xf32>
    %76 = tpu.matmul %75, %73, %cst_51 {dimension_numbers = #tpu.dot_dimension_numbers<[1], [0], [0], [1], [0, 0, 1, 1], [], []>} : vector<16x72xbf16>, vector<72x32xbf16>, vector<16x32xf32> -> vector<16x32xf32>
    %c0_52 = arith.constant 0 : index
    %c0_53 = arith.constant 0 : index
    %c0_54 = arith.constant 0 : index
    %77 = vector.load %arg8[%c0_52, %c0_53, %c0_54] : memref<1x16x1xf32, #tpu.memory_space<vmem>>, vector<1x16x1xf32>
    %78 = vector.shape_cast %77 : vector<1x16x1xf32> to vector<16x1xf32>
    %79 = vector.broadcast %78 : vector<16x1xf32> to vector<16x32xf32>
    %80 = arith.addf %76, %79 : vector<16x32xf32>
    %cst_55 = arith.constant 0.000000e+00 : f32
    %81 = vector.broadcast %cst_55 : f32 to vector<16x32xf32>
    %82 = arith.maximumf %80, %81 : vector<16x32xf32>
    %cst_56 = arith.constant dense<0.000000e+00> : vector<16xf32>
    %83 = vector.multi_reduction <add>, %82, %cst_56 [1] : vector<16x32xf32> to vector<16xf32>
    %84 = vector.shape_cast %83 : vector<16xf32> to vector<16x1xf32>
    %cst_57 = arith.constant 3.200000e+01 : f32
    %85 = vector.broadcast %cst_57 : f32 to vector<16x1xf32>
    %86 = arith.divf %84, %85 : vector<16x1xf32>
    %87 = vector.broadcast %86 : vector<16x1xf32> to vector<16x32xf32>
    %88 = arith.subf %82, %87 : vector<16x32xf32>
    %89 = arith.mulf %88, %88 : vector<16x32xf32>
    %cst_58 = arith.constant dense<0.000000e+00> : vector<16xf32>
    %90 = vector.multi_reduction <add>, %89, %cst_58 [1] : vector<16x32xf32> to vector<16xf32>
    %91 = vector.shape_cast %90 : vector<16xf32> to vector<16x1xf32>
    %cst_59 = arith.constant 3.200000e+01 : f32
    %92 = vector.broadcast %cst_59 : f32 to vector<16x1xf32>
    %93 = arith.divf %91, %92 : vector<16x1xf32>
    %c0_60 = arith.constant 0 : index
    %c0_61 = arith.constant 0 : index
    %c0_62 = arith.constant 0 : index
    %94 = vector.load %arg9[%c0_60, %c0_61, %c0_62] : memref<1x16x1xf32, #tpu.memory_space<vmem>>, vector<1x16x1xf32>
    %95 = vector.shape_cast %94 : vector<1x16x1xf32> to vector<16x1xf32>
    %96 = vector.broadcast %86 : vector<16x1xf32> to vector<16x32xf32>
    %97 = arith.subf %82, %96 : vector<16x32xf32>
    %98 = vector.broadcast %95 : vector<16x1xf32> to vector<16x32xf32>
    %99 = arith.mulf %98, %97 : vector<16x32xf32>
    %cst_63 = arith.constant 9.99999974E-6 : f32
    %100 = vector.broadcast %cst_63 : f32 to vector<16x1xf32>
    %101 = arith.addf %93, %100 : vector<16x1xf32>
    %102 = math.rsqrt %101 : vector<16x1xf32>
    %103 = vector.broadcast %102 : vector<16x1xf32> to vector<16x32xf32>
    %104 = arith.mulf %99, %103 : vector<16x32xf32>
    %c0_64 = arith.constant 0 : index
    %c0_65 = arith.constant 0 : index
    %c0_66 = arith.constant 0 : index
    %105 = vector.load %arg10[%c0_64, %c0_65, %c0_66] : memref<1x16x1xf32, #tpu.memory_space<vmem>>, vector<1x16x1xf32>
    %106 = vector.shape_cast %105 : vector<1x16x1xf32> to vector<16x1xf32>
    %107 = vector.broadcast %106 : vector<16x1xf32> to vector<16x32xf32>
    %108 = arith.addf %104, %107 : vector<16x32xf32>
    %109 = vector.extract_strided_slice %108 {offsets = [0, 0], sizes = [16, 8], strides = [1, 1]} : vector<16x32xf32> to vector<16x8xf32>
    %110 = vector.extract_strided_slice %108 {offsets = [0, 8], sizes = [16, 8], strides = [1, 1]} : vector<16x32xf32> to vector<16x8xf32>
    %111 = arith.maximumf %109, %110 : vector<16x8xf32>
    %112 = vector.extract_strided_slice %108 {offsets = [0, 16], sizes = [16, 8], strides = [1, 1]} : vector<16x32xf32> to vector<16x8xf32>
    %113 = vector.extract_strided_slice %108 {offsets = [0, 24], sizes = [16, 8], strides = [1, 1]} : vector<16x32xf32> to vector<16x8xf32>
    %114 = arith.maximumf %112, %113 : vector<16x8xf32>
    %115 = arith.maximumf %111, %114 : vector<16x8xf32>
    %116 = vector.extract_strided_slice %115 {offsets = [0, 0], sizes = [16, 2], strides = [1, 1]} : vector<16x8xf32> to vector<16x2xf32>
    %117 = vector.extract_strided_slice %115 {offsets = [0, 2], sizes = [16, 2], strides = [1, 1]} : vector<16x8xf32> to vector<16x2xf32>
    %118 = vector.extract_strided_slice %115 {offsets = [0, 4], sizes = [16, 2], strides = [1, 1]} : vector<16x8xf32> to vector<16x2xf32>
    %119 = vector.extract_strided_slice %115 {offsets = [0, 6], sizes = [16, 2], strides = [1, 1]} : vector<16x8xf32> to vector<16x2xf32>
    %120 = tpu.concatenate %116, %117, %118, %119 in 0 : vector<16x2xf32>, vector<16x2xf32>, vector<16x2xf32>, vector<16x2xf32> -> vector<64x2xf32>
    %121 = arith.truncf %120 : vector<64x2xf32> to vector<64x2xbf16>
    %c0_67 = arith.constant 0 : index
    %c0_68 = arith.constant 0 : index
    %c0_69 = arith.constant 0 : index
    %122 = vector.load %arg11[%c0_67, %c0_68, %c0_69] : memref<1x64x800xbf16, #tpu.memory_space<vmem>>, vector<1x64x800xbf16>
    %123 = vector.shape_cast %122 : vector<1x64x800xbf16> to vector<64x800xbf16>
    %cst_70 = arith.constant dense<0.000000e+00> : vector<2x800xf32>
    %124 = tpu.matmul %121, %123, %cst_70 {dimension_numbers = #tpu.dot_dimension_numbers<[0], [0], [1], [1], [0, 1, 1, 1], [], []>} : vector<64x2xbf16>, vector<64x800xbf16>, vector<2x800xf32> -> vector<2x800xf32>
    %c0_71 = arith.constant 0 : index
    %c0_72 = arith.constant 0 : index
    %c0_73 = arith.constant 0 : index
    %125 = vector.load %arg12[%c0_71, %c0_72, %c0_73] : memref<1x1x800xf32, #tpu.memory_space<vmem>>, vector<1x1x800xf32>
    %126 = vector.shape_cast %125 : vector<1x1x800xf32> to vector<1x800xf32>
    %127 = vector.broadcast %126 : vector<1x800xf32> to vector<2x800xf32>
    %128 = arith.addf %124, %127 : vector<2x800xf32>
    %cst_74 = arith.constant 0.000000e+00 : f32
    %129 = vector.broadcast %cst_74 : f32 to vector<2x800xf32>
    %130 = arith.maximumf %128, %129 : vector<2x800xf32>
    %131 = arith.truncf %130 : vector<2x800xf32> to vector<2x800xbf16>
    %c0_75 = arith.constant 0 : index
    %c0_76 = arith.constant 0 : index
    %c0_77 = arith.constant 0 : index
    %132 = vector.load %arg13[%c0_75, %c0_76, %c0_77] : memref<1x800x400xbf16, #tpu.memory_space<vmem>>, vector<1x800x400xbf16>
    %133 = vector.shape_cast %132 : vector<1x800x400xbf16> to vector<800x400xbf16>
    %cst_78 = arith.constant dense<0.000000e+00> : vector<2x400xf32>
    %134 = tpu.matmul %131, %133, %cst_78 {dimension_numbers = #tpu.dot_dimension_numbers<[1], [0], [0], [1], [0, 0, 1, 1], [], []>} : vector<2x800xbf16>, vector<800x400xbf16>, vector<2x400xf32> -> vector<2x400xf32>
    %c0_79 = arith.constant 0 : index
    %c0_80 = arith.constant 0 : index
    %c0_81 = arith.constant 0 : index
    %135 = vector.load %arg14[%c0_79, %c0_80, %c0_81] : memref<1x1x400xf32, #tpu.memory_space<vmem>>, vector<1x1x400xf32>
    %136 = vector.shape_cast %135 : vector<1x1x400xf32> to vector<1x400xf32>
    %137 = vector.broadcast %136 : vector<1x400xf32> to vector<2x400xf32>
    %138 = arith.addf %134, %137 : vector<2x400xf32>
    %c0_82 = arith.constant 0 : index
    %c0_83 = arith.constant 0 : index
    %c0_84 = arith.constant 0 : index
    %139 = vector.load %arg15[%c0_82, %c0_83, %c0_84] : memref<1x2x400xf32, #tpu.memory_space<vmem>>, vector<1x2x400xf32>
    %140 = vector.shape_cast %139 : vector<1x2x400xf32> to vector<2x400xf32>
    %141 = vector.shape_cast %138 : vector<2x400xf32> to vector<1x2x400xf32>
    tpu.vector_store %arg15[%c0_82, %c0_83, %c0_84], %141 {strides = array<i32>} : memref<1x2x400xf32, #tpu.memory_space<vmem>>, vector<1x2x400xf32>,
    return
  }
  func.func @transform_0(%arg0: i32) -> (i32, i32, i32) {
    %c0_i32 = arith.constant 0 : i32
    %c0_i32_0 = arith.constant 0 : i32
    %c0_i32_1 = arith.constant 0 : i32
    return %arg0, %c0_i32, %c0_i32_0 : i32, i32, i32
  }
  func.func @transform_1(%arg0: i32) -> (i32, i32, i32) {
    %c0_i32 = arith.constant 0 : i32
    %c0_i32_0 = arith.constant 0 : i32
    %c0_i32_1 = arith.constant 0 : i32
    return %arg0, %c0_i32, %c0_i32_0 : i32, i32, i32
  }
  func.func @transform_2(%arg0: i32) -> (i32, i32, i32) {
    %c0_i32 = arith.constant 0 : i32
    %c0_i32_0 = arith.constant 0 : i32
    %c0_i32_1 = arith.constant 0 : i32
    return %arg0, %c0_i32, %c0_i32_0 : i32, i32, i32
  }
  func.func @transform_3(%arg0: i32) -> (i32, i32, i32) {
    %c0_i32 = arith.constant 0 : i32
    %c0_i32_0 = arith.constant 0 : i32
    %c0_i32_1 = arith.constant 0 : i32
    return %arg0, %c0_i32, %c0_i32_0 : i32, i32, i32
  }
  func.func @transform_4(%arg0: i32) -> (i32, i32, i32) {
    %c0_i32 = arith.constant 0 : i32
    %c0_i32_0 = arith.constant 0 : i32
    %c0_i32_1 = arith.constant 0 : i32
    return %arg0, %c0_i32, %c0_i32_0 : i32, i32, i32
  }
  func.func @transform_5(%arg0: i32) -> (i32, i32, i32) {
    %c0_i32 = arith.constant 0 : i32
    %c0_i32_0 = arith.constant 0 : i32
    %c0_i32_1 = arith.constant 0 : i32
    %c0_i32_2 = arith.constant 0 : i32
    return %c0_i32, %c0_i32_0, %c0_i32_1 : i32, i32, i32
  }
  func.func @transform_6(%arg0: i32) -> (i32, i32, i32) {
    %c0_i32 = arith.constant 0 : i32
    %c0_i32_0 = arith.constant 0 : i32
    %c0_i32_1 = arith.constant 0 : i32
    return %arg0, %c0_i32, %c0_i32_0 : i32, i32, i32
  }
  func.func @transform_7(%arg0: i32) -> (i32, i32, i32) {
    %c0_i32 = arith.constant 0 : i32
    %c0_i32_0 = arith.constant 0 : i32
    %c0_i32_1 = arith.constant 0 : i32
    return %arg0, %c0_i32, %c0_i32_0 : i32, i32, i32
  }
  func.func @transform_8(%arg0: i32) -> (i32, i32, i32) {
    %c0_i32 = arith.constant 0 : i32
    %c0_i32_0 = arith.constant 0 : i32
    %c0_i32_1 = arith.constant 0 : i32
    return %arg0, %c0_i32, %c0_i32_0 : i32, i32, i32
  }
  func.func @transform_9(%arg0: i32) -> (i32, i32, i32) {
    %c0_i32 = arith.constant 0 : i32
    %c0_i32_0 = arith.constant 0 : i32
    %c0_i32_1 = arith.constant 0 : i32
    return %arg0, %c0_i32, %c0_i32_0 : i32, i32, i32
  }
  func.func @transform_10(%arg0: i32) -> (i32, i32, i32) {
    %c0_i32 = arith.constant 0 : i32
    %c0_i32_0 = arith.constant 0 : i32
    %c0_i32_1 = arith.constant 0 : i32
    return %arg0, %c0_i32, %c0_i32_0 : i32, i32, i32
  }
  func.func @transform_11(%arg0: i32) -> (i32, i32, i32) {
    %c0_i32 = arith.constant 0 : i32
    %c0_i32_0 = arith.constant 0 : i32
    %c0_i32_1 = arith.constant 0 : i32
    return %arg0, %c0_i32, %c0_i32_0 : i32, i32, i32
  }
  func.func @transform_12(%arg0: i32) -> (i32, i32, i32) {
    %c0_i32 = arith.constant 0 : i32
    %c0_i32_0 = arith.constant 0 : i32
    %c0_i32_1 = arith.constant 0 : i32
    return %arg0, %c0_i32, %c0_i32_0 : i32, i32, i32
  }
  func.func @transform_13(%arg0: i32) -> (i32, i32, i32) {
    %c0_i32 = arith.constant 0 : i32
    %c0_i32_0 = arith.constant 0 : i32
    %c0_i32_1 = arith.constant 0 : i32
    return %arg0, %c0_i32, %c0_i32_0 : i32, i32, i32
  }
  func.func @transform_14(%arg0: i32) -> (i32, i32, i32) {
    %c0_i32 = arith.constant 0 : i32
    %c0_i32_0 = arith.constant 0 : i32
    %c0_i32_1 = arith.constant 0 : i32
    return %arg0, %c0_i32, %c0_i32_0 : i32, i32, i32
  }
}

</mosaic_0001>

<bundles_post_ra>
// kernel: images_encoder_forward.1
= control target key start
LH: loop header
LB: loop body
LE: loop exit
PB: predicated region body
PF: predicated region fallthrough
CT: control target
= control target key end

     0   :  { %s5749_s29 = smov 0   ;;  %s6640_s0 = inlined_call_operand.vmem [shape: bf16[3,36,512], index: 0, kind: input, shape index: {}]   ;;  %s6641_s1 = inlined_call_operand.vmem [shape: bf16[3,8,36], index: 1, kind: input, shape index: {}]   ;;  %s6642_s2 = inlined_call_operand.vmem [shape: f32[3,8,1], index: 2, kind: input, shape index: {}]   ;;  %s6643_s3 = inlined_call_operand.vmem [shape: f32[3,8,1], index: 3, kind: input, shape index: {}]   ;;  %s6644_s4 = inlined_call_operand.vmem [shape: f32[3,8,1], index: 4, kind: input, shape index: {}]   ;;  %s6645_s5 = inlined_call_operand.vmem [shape: bf16[9,128,32], index: 5, kind: input, shape index: {}]   ;;  %s6646_s6 = inlined_call_operand.vmem [shape: bf16[3,16,72], index: 6, kind: input, shape index: {}]   ;;  %s6647_s7 = inlined_call_operand.vmem [shape: f32[3,16,1], index: 7, kind: input, shape index: {}]   ;;  %s6648_s8 = inlined_call_operand.vmem [shape: f32[3,16,1], index: 8, kind: input, shape index: {}]   ;;  %s6649_s9 = inlined_call_operand.vmem [shape: f32[3,16,1], index: 9, kind: input, shape index: {}]   ;;  %s6650_s10 = inlined_call_operand.vmem [shape: bf16[3,64,800], index: 10, kind: input, shape index: {}]   ;;  %s6651_s11 = inlined_call_operand.vmem [shape: f32[3,1,800], index: 11, kind: input, shape index: {}]   ;;  %s6652_s12 = inlined_call_operand.vmem [shape: bf16[3,800,400], index: 12, kind: input, shape index: {}]   ;;  %s6653_s13 = inlined_call_operand.vmem [shape: f32[3,1,400], index: 13, kind: input, shape index: {}]   ;;  %s6654_s14 = inlined_call_operand.vmem [shape: f32[3,2,400], index: 14, kind: output, shape index: {}]  }
   0x1   :  { %6656 = sst [smem:[#allocation2_spill]] %s6640_s0 }
   0x2 LB: > { %s3881_s30 = sadd.s32 4294967295, %s5664_s29   ;;  %p3885_p0 = scmp.ge.s32.totalorder %s5664_s29, 1  ;;  %s5664_s29 = sphi %s5749_s29, %s24_s29  }
   0x3   : > { %p526_p1 = scmp.lt.s32.totalorder %s5664_s29, 4 }
   0x5   : > { %p527_p2 = pnand %p3885_p0, %p526_p1 }
   0x6   : > { %p626_p3 = scmp.lt.s32.totalorder (!%p527_p2), %s3881_s30, 2  ;;  %s6657_s0 = sld [smem:[#allocation2_spill]] (!%p527_p2) }
   0x7   : > { %530 = sbr.rel (%p527_p2) target bundleno = 1961 (0x7a9), region = 76  ;;  %s5671_s17 = smov (!%p527_p2), 122  }
   0x8   : > { %s5673_s22 = smov (!%p527_p2), 126  }
   0xc   : > { %v5666_v0 = vmov 0   ;;  %s6660_s30 = smov (!%p626_p3, %s3881_s30), 2  ;;  %vm762_vm0 = vcmask 1041408   ;;  %vm758_vm1 = vcmask 293888   ;;  %v5667_v62 = vmov 512.0  }
   0xd   : > { %5620 = vset.pattern.permute.xlu0 %v5666_v0  ;;  %5621 = vset.pattern.permute.xlu1 %v5666_v0  ;;  %s5600_s15 = smul.u32 80, %s6660_s30  ;;  %s6655_s19 = sshll.u32 %s6660_s30, 2  ;;  %5648 = vrcp.f32 %v5667_v62  ;;  %v5345_v62 = vld [vmem:[%s6645_s5 + $0x170] sm:$0xff]  ;;  %vm1626_vm6 = vcmask 1043456   ;;  %vm1622_vm7 = vcmask 588800   ;;  %vm1646_vm8 = vcmask 261120  }
   0xe   : > { %5622 = vset.pattern.permute.xlu2 %v5666_v0  ;;  %s5786_s20 = sshll.u32 %s6660_s30, 3  ;;  %s634_s26 = scalar_lea.vmem %s6641_s1, %s6655_s19 }
   0xf   : > { %s5763_s18 = scalar_lea.vmem %s6657_s0, %s5600_s15  ;;  %s638_s23 = scalar_lea.vmem %s6642_s2, %s5786_s20  ;;  %v691_v40 = vld [vmem:[%s634_s26] sm:$0xf] }
  0x10   : > { %v700_v1 = vld [vmem:[%s5763_s18 + $0x40] sm:$0x33]  ;;  %v701_v2 = vld [vmem:[%s5763_s18 + $0x48] sm:$0x33]  ;;  %v5297_v8 = vld [vmem:[%s5763_s18 + $0x2c] sm:$0xf0]  ;;  %s646_s21 = scalar_lea.vmem %s6644_s4, %s5786_s20  ;;  %s651_s25 = scalar_lea.vmem %s6646_s6, %s5786_s20 }
  0x11   : > { %v734_v3 = vunpack.c.l.b16 %v700_v1  ;;  %v735_v4 = vunpack.c.h.b16 %v700_v1  ;;  %v736_v5 = vunpack.c.l.b16 %v701_v2  ;;  %v737_v6 = vunpack.c.h.b16 %v701_v2  ;;  %v3922_v7 = vld [vmem:[%s5763_s18 + $0x20] sm:$0xf]  ;;  %v5295_v13 = vld [vmem:[%s5763_s18 + $0x24] sm:$0xf]  ;;  %v3924_v14 = vld [vmem:[%s5763_s18 + $0x30] sm:$0xf0] }
  0x12   : > { %v3930_v15 = vld [vmem:[%s5763_s18 + $0x28] sm:$0xf]  ;;  %v5298_v16 = vld [vmem:[%s5763_s18 + $0x34] sm:$0xf0]  ;;  %v5296_v17 = vld [vmem:[%s5763_s18 + $0x2c] sm:$0xf]  ;;  %v3923_v23 = vor.u32 %v5297_v8, %v3922_v7  ;;  %v3927_v24 = vor.u32 %v5295_v13, %v3924_v14 }
  0x13   : > { %v746_v9 = vpack.c.b16 %v734_v3, %v734_v3  ;;  %v747_v10 = vpack.c.b16 %v735_v4, %v735_v4  ;;  %v748_v11 = vpack.c.b16 %v736_v5, %v736_v5  ;;  %v749_v12 = vpack.c.b16 %v737_v6, %v737_v6  ;;  %v3932_v18 = vld [vmem:[%s5763_s18 + $0x38] sm:$0xf0]  ;;  %v3906_v25 = vld [vmem:[%s5763_s18] sm:$0xf]  ;;  %v5293_v26 = vld [vmem:[%s5763_s18 + $0xc] sm:$0xf0]  ;;  %v5649_v63 = vpop.eup %5648 }
  0x14   : > { %v5291_v27 = vld [vmem:[%s5763_s18 + $0x4] sm:$0xf]  ;;  %v3931_v28 = vor.u32 %v5298_v16, %v3930_v15  ;;  %v3935_v29 = vor.u32 %v5296_v17, %v3932_v18  ;;  %v3908_v30 = vld [vmem:[%s5763_s18 + $0x10] sm:$0xf0]  ;;  %v3914_v31 = vld [vmem:[%s5763_s18 + $0x8] sm:$0xf]  ;;  %v3907_v36 = vor.u32 %v5293_v26, %v3906_v25  ;;  %vm841_vm2 = vweird.f32 %v5649_v63 }
  0x15   : > { %v764_v19 = vsel %vm762_vm0, %v746_v9, 0  ;;  %v767_v20 = vsel %vm762_vm0, %v747_v10, 0  ;;  %v770_v21 = vsel %vm762_vm0, %v748_v11, 0  ;;  %v773_v22 = vsel %vm762_vm0, %v749_v12, 0  ;;  %v5294_v32 = vld [vmem:[%s5763_s18 + $0x14] sm:$0xf0] }
  0x16   : > { %780 = vmatpush.bf16.msra.mxu0 %v764_v19  ;;  %793 = vmatpush.bf16.msra.mxu1 %v767_v20  ;;  %v5292_v33 = vld [vmem:[%s5763_s18 + $0xc] sm:$0xf]  ;;  %v3916_v34 = vld [vmem:[%s5763_s18 + $0x18] sm:$0xf0]  ;;  %v702_v35 = vld [vmem:[%s638_s23] sm:$0xff]  ;;  %v3911_v37 = vor.u32 %v5291_v27, %v3908_v30  ;;  %v3915_v38 = vor.u32 %v5294_v32, %v3914_v31  ;;  %s5801_s27 = sshll.u32 %s6660_s30, 4 }
  0x17   : > { %806 = vmatpush.bf16.msra.mxu2 %v770_v21  ;;  %819 = vmatpush.bf16.msra.mxu3 %v773_v22  ;;  %v3919_v39 = vor.u32 %v5292_v33, %v3916_v34  ;;  %s5807_s16 = scalar_lea.vmem %s6648_s8, %s5801_s27  ;;  %v837_v0 = vmul.f32 512.0, %v5649_v63  ;;  %v883_v13 = vld [vmem:[%s646_s21] sm:$0xff]  ;;  %v5306_v16 = vld [vmem:[%s6645_s5 + $0x38] sm:$0xff]  ;;  %s656_s18 = scalar_lea.vmem %s6647_s7, %s5801_s27  ;;  %v5305_v21 = vld [vmem:[%s6645_s5 + $0x30] sm:$0xff] }
  0x18   : > { %705 = vperm.xlu0 %5620, %v702_v35   ;;  %v1675_v61 = vld [vmem:[%s5807_s16 + $0x8] sm:$0xff]  ;;  %886 = vperm.xlu2 %5622, %v883_v13   ;;  %v5314_v17 = vld [vmem:[%s6645_s5 + $0x78] sm:$0xff]  ;;  %v5329_v26 = vld [vmem:[%s6645_s5 + $0xf0] sm:$0xff]  ;;  %s642_s21 = scalar_lea.vmem %s6643_s3, %s5786_s20  ;;  %s666_s15 = scalar_lea.vmem %s6649_s9, %s5801_s27 }
  0x19   : > { %v838_v1 = vsub.f32 1.0, %v837_v0  ;;  %v5322_v18 = vld [vmem:[%s6645_s5 + $0xb8] sm:$0xff]  ;;  %v1605_v27 = vld [vmem:[%s656_s18] sm:$0xff]  ;;  %v1606_v30 = vld [vmem:[%s656_s18 + $0x8] sm:$0xff]  ;;  %s5669_s27 = smov 120   ;;  %s5601_s18 = smul.u32 224, %s6660_s30 }
  0x1a   : > { %781 = vmatpush.bf16.msra.mxu0 %v3923_v23  ;;  %794 = vmatpush.bf16.msra.mxu1 %v3927_v24  ;;  %v5330_v22 = vld [vmem:[%s6645_s5 + $0xf8] sm:$0xff]  ;;  %v5313_v23 = vld [vmem:[%s6645_s5 + $0x70] sm:$0xff]  ;;  %v858_v33 = vld [vmem:[%s642_s21] sm:$0xff]  ;;  %s5672_s21 = smov 124   ;;  %s5603_s24 = smul.u32 1600, %s6660_s30 }
  0x1b   : > { %807 = vmatpush.bf16.msra.mxu2 %v3931_v28  ;;  %820 = vmatpush.bf16.msra.mxu3 %v3935_v29  ;;  %v839_v2 = vmul.f32 %v5649_v63, %v838_v1  ;;  %v5321_v24 = vld [vmem:[%s6645_s5 + $0xb0] sm:$0xff]  ;;  %v5304_v28 = vld [vmem:[%s6645_s5 + $0x28] sm:$0xff]  ;;  %v5303_v29 = vld [vmem:[%s6645_s5 + $0x20] sm:$0xff]  ;;  %s6080_s23 = scalar_lea.vmem %s6650_s10, %s5601_s18 }
  0x1c   : > { %v5302_v31 = vld [vmem:[%s6645_s5 + $0x18] sm:$0xff]  ;;  %v5301_v32 = vld [vmem:[%s6645_s5 + $0x10] sm:$0xff]  ;;  %v5312_v34 = vld [vmem:[%s6645_s5 + $0x68] sm:$0xff]  ;;  %s6136_s28 = scalar_lea.vmem %s6652_s12, %s5603_s24 }
  0x1d   : > { %v840_v3 = vadd.f32 %v5649_v63, %v839_v2  ;;  %v5320_v35 = vld [vmem:[%s6645_s5 + $0xa8] sm:$0xff]  ;;  %v5361_v0 = vld [vmem:[%s6645_s5 + $0x1f0] sm:$0xff]  ;;  %v5351_v13 = vld [vmem:[%s6645_s5 + $0x1a0] sm:$0xff] }
  0x1e   : > { %782 = vmatpush.bf16.msra.mxu0 %v3907_v36  ;;  %795 = vmatpush.bf16.msra.mxu1 %v3911_v37  ;;  %v5328_v36 = vld [vmem:[%s6645_s5 + $0xe8] sm:$0xff]  ;;  %v5333_v1 = vld [vmem:[%s6645_s5 + $0x110] sm:$0xff] }
  0x1f   : > { %808 = vmatpush.bf16.msra.mxu2 %v3915_v38  ;;  %821 = vmatpush.bf16.msra.mxu3 %v3919_v39  ;;  %v5810_v4 = vsel %vm841_vm2, %v5649_v63, %v840_v3  ;;  %v5300_v37 = vld [vmem:[%s6645_s5 + $0x8] sm:$0xff]  ;;  %v5311_v38 = vld [vmem:[%s6645_s5 + $0x60] sm:$0xff]  ;;  %v5353_v63 = vld [vmem:[%s6645_s5 + $0x1b0] sm:$0xff]  ;;  %vm3676_vm2 = vcmask 1043458  }
  0x20   : > { %1609 = vperm.xlu2 %5622, %v1605_v27   ;;  %v5319_v39 = vld [vmem:[%s6645_s5 + $0xa0] sm:$0xff]  ;;  %v5344_v2 = vld [vmem:[%s6645_s5 + $0x168] sm:$0xff] }
  0x21   : > { %3936 = vmatmul.msk.bf16.vlgmr.msra.gmra.mxu0 %vm758_vm1, %v691_v40  ;;  %3937 = vmatmul.msk.bf16.vlgmr.msra.gmra.mxu1 %vm758_vm1, %v691_v40  ;;  %v5352_v3 = vld [vmem:[%s6645_s5 + $0x1a8] sm:$0xff] }
  0x22   : > { %3938 = vmatmul.msk.bf16.vlgmr.msra.gmra.mxu2 %vm758_vm1, %v691_v40  ;;  %3939 = vmatmul.msk.bf16.vlgmr.msra.gmra.mxu3 %vm758_vm1, %v691_v40  ;;  %v5327_v40 = vld [vmem:[%s6645_s5 + $0xe0] sm:$0xff]  ;;  %v5356_v27 = vld [vmem:[%s6645_s5 + $0x1c8] sm:$0xff]  ;;  %vm1978_vm1 = vcmask 523264  }
  0x23   : > { %961 = vmatpush.bf16.msrb.mxu0 %v5306_v16  ;;  %1039 = vmatpush.bf16.msrb.mxu1 %v5314_v17  ;;  %v5331_v17 = vld [vmem:[%s6645_s5 + $0x100] sm:$0xff] }
  0x24   : > { %1117 = vmatpush.bf16.msrb.mxu2 %v5322_v18  ;;  %1195 = vmatpush.bf16.msrb.mxu3 %v5330_v22  ;;  %v5342_v18 = vld [vmem:[%s6645_s5 + $0x158] sm:$0xff]  ;;  %v5357_v22 = vld [vmem:[%s6645_s5 + $0x1d0] sm:$0xff] }
  0x27   : > { %962 = vmatpush.bf16.msrb.mxu0 %v5305_v21  ;;  %1040 = vmatpush.bf16.msrb.mxu1 %v5313_v23  ;;  %v5349_v21 = vld [vmem:[%s6645_s5 + $0x190] sm:$0xff] }
  0x28   : > { %1118 = vmatpush.bf16.msrb.mxu2 %v5321_v24  ;;  %1196 = vmatpush.bf16.msrb.mxu3 %v5329_v26  ;;  %v5340_v24 = vld [vmem:[%s6645_s5 + $0x148] sm:$0xff] }
  0x29   : > { %1614 = vperm.xlu2 %5622, %v1606_v30   ;;  %v5347_v30 = vld [vmem:[%s6645_s5 + $0x180] sm:$0xff] }
  0x2b   : > { %963 = vmatpush.bf16.msrb.mxu0 %v5304_v28  ;;  %1041 = vmatpush.bf16.msrb.mxu1 %v5312_v34 }
  0x2c   : > { %1119 = vmatpush.bf16.msrb.mxu2 %v5320_v35  ;;  %1197 = vmatpush.bf16.msrb.mxu3 %v5328_v36 }
  0x2f   : > { %964 = vmatpush.bf16.msrb.mxu0 %v5303_v29  ;;  %1042 = vmatpush.bf16.msrb.mxu1 %v5311_v38  ;;  %v5339_v29 = vld [vmem:[%s6645_s5 + $0x140] sm:$0xff] }
  0x30   : > { %1120 = vmatpush.bf16.msrb.mxu2 %v5319_v39  ;;  %1198 = vmatpush.bf16.msrb.mxu3 %v5327_v40 }
  0x33   : > { %965 = vmatpush.bf16.msrb.mxu0 %v5302_v31 }
  0x37   : > { %966 = vmatpush.bf16.msrb.mxu0 %v5301_v32  ;;  %v5355_v32 = vld [vmem:[%s6645_s5 + $0x1c0] sm:$0xff] }
  0x3b   : > { %967 = vmatpush.bf16.msrb.mxu0 %v5300_v37 }
  0x8a   : > { %v706_v41 = vpop.permute.xlu0 %705 }
  0x9e   : > { %v784_v42 = vpop.f32.mrf.mxu0  ;;  %v797_v43 = vpop.f32.mrf.mxu1 }
  0x9f   : > { %v785_v44 = vadd.f32 %v784_v42, %v706_v41  ;;  %v798_v45 = vadd.f32 %v797_v43, %v706_v41  ;;  %v5310_v42 = vld [vmem:[%s6645_s5 + $0x58] sm:$0xff] }
  0xa0   : > { %v5318_v43 = vld [vmem:[%s6645_s5 + $0x98] sm:$0xff]  ;;  %1043 = vmatpush.bf16.msrb.mxu1 %v5310_v42 }
  0xa1   : > { %v827_v46 = vmax.f32 %v785_v44, 0.0  ;;  %v828_v47 = vmax.f32 %v798_v45, 0.0  ;;  %v5326_v44 = vld [vmem:[%s6645_s5 + $0xd8] sm:$0xff]  ;;  %1121 = vmatpush.bf16.msrb.mxu2 %v5318_v43 }
  0xa2   : > { %v5338_v45 = vld [vmem:[%s6645_s5 + $0x138] sm:$0xff]  ;;  %1199 = vmatpush.bf16.msrb.mxu3 %v5326_v44 }
  0xa3   : > { %v831_v51 = vadd.f32 %v828_v47, %v827_v46 }
  0xa5   : > { %v810_v48 = vpop.f32.mrf.mxu2  ;;  %v823_v49 = vpop.f32.mrf.mxu3 }
  0xa6   : > { %v811_v50 = vadd.f32 %v810_v48, %v706_v41  ;;  %v824_v52 = vadd.f32 %v823_v49, %v706_v41  ;;  %v786_v53 = vpop.f32.mrf.mxu0  ;;  %v799_v54 = vpop.f32.mrf.mxu1  ;;  %v5299_v41 = vld [vmem:[%s6645_s5] sm:$0xff]  ;;  %v5325_v48 = vld [vmem:[%s6645_s5 + $0xd0] sm:$0xff] }
  0xa7   : > { %968 = vmatpush.bf16.msrb.mxu0 %v5299_v41  ;;  %v5337_v49 = vld [vmem:[%s6645_s5 + $0x130] sm:$0xff]  ;;  %1200 = vmatpush.bf16.msrb.mxu3 %v5325_v48  ;;  %v5336_v53 = vld [vmem:[%s6645_s5 + $0x128] sm:$0xff]  ;;  %v5307_v54 = vld [vmem:[%s6645_s5 + $0x40] sm:$0xff] }
  0xa8   : > { %v829_v55 = vmax.f32 %v811_v50, 0.0  ;;  %v830_v57 = vmax.f32 %v824_v52, 0.0  ;;  %v5308_v50 = vld [vmem:[%s6645_s5 + $0x48] sm:$0xff] }
  0xa9   : > { %v5324_v52 = vld [vmem:[%s6645_s5 + $0xc8] sm:$0xff] }
  0xaa   : > { %v832_v56 = vadd.f32 %v831_v51, %v829_v55  ;;  %v5316_v51 = vld [vmem:[%s6645_s5 + $0x88] sm:$0xff] }
  0xab   : > { %1273 = vmatpush.bf16.msra.mxu0 %v5338_v45  ;;  %1201 = vmatpush.bf16.msrb.mxu3 %v5324_v52  ;;  %v887_v45 = vpop.permute.xlu2 %886 }
  0xac   : > { %v833_v58 = vadd.f32 %v832_v56, %v830_v57  ;;  %v5323_v56 = vld [vmem:[%s6645_s5 + $0xc0] sm:$0xff] }
  0xad   : > { %v812_v59 = vpop.f32.mrf.mxu2  ;;  %v825_v60 = vpop.f32.mrf.mxu3 }
  0xae   : > { %834 = vadd.xlane.f32.xlu0 %v833_v58  ;;  %v5346_v58 = vld [vmem:[%s6645_s5 + $0x178] sm:$0xff] }
  0xaf   : > { %1274 = vmatpush.bf16.msra.mxu0 %v5337_v49  ;;  %v5354_v59 = vld [vmem:[%s6645_s5 + $0x1b8] sm:$0xff]  ;;  %1202 = vmatpush.bf16.msrb.mxu3 %v5323_v56  ;;  %v5364_v56 = vld [vmem:[%s6645_s5 + $0x208] sm:$0xff] }
  0xb0   : > { %v5362_v60 = vld [vmem:[%s6645_s5 + $0x1f8] sm:$0xff] }
  0xb3   : > { %1275 = vmatpush.bf16.msra.mxu0 %v5336_v53  ;;  %1507 = vmatpush.bf16.msra.mxu3 %v5362_v60  ;;  %v5367_v53 = vld [vmem:[%s6645_s5 + $0x220] sm:$0xff] }
  0xb7   : > { %1508 = vmatpush.bf16.msra.mxu3 %v5361_v0 }
  0xc2   : > { %1683 = vperm.xlu0 %5620, %v1675_v61   ;;  %v5334_v61 = vld [vmem:[%s6645_s5 + $0x118] sm:$0xff] }
 0x121   : > { %v835_v5 = vpop.xlane.xlu0 %834 }
 0x122   : > { %v843_v6 = vmul.f32 %v5810_v4, %v835_v5  ;;  %v5360_v5 = vld [vmem:[%s6645_s5 + $0x1e8] sm:$0xff] }
 0x123   : > { %1509 = vmatpush.bf16.msra.mxu3 %v5360_v5 }
 0x124   : > { %v5813_v7 = vsub.f32 %v827_v46, %v843_v6  ;;  %v5815_v8 = vsub.f32 %v828_v47, %v843_v6  ;;  %v5817_v9 = vsub.f32 %v829_v55, %v843_v6  ;;  %v5823_v10 = vsub.f32 %v830_v57, %v843_v6  ;;  %v5309_v46 = vld [vmem:[%s6645_s5 + $0x50] sm:$0xff]  ;;  %v5315_v55 = vld [vmem:[%s6645_s5 + $0x80] sm:$0xff]  ;;  %v5332_v6 = vld [vmem:[%s6645_s5 + $0x108] sm:$0xff] }
 0x125   : > { %v5317_v47 = vld [vmem:[%s6645_s5 + $0x90] sm:$0xff]  ;;  %1044 = vmatpush.bf16.msrb.mxu1 %v5309_v46  ;;  %v5335_v57 = vld [vmem:[%s6645_s5 + $0x120] sm:$0xff] }
 0x126   : > { %v848_v11 = vmul.f32 %v5813_v7, %v5813_v7  ;;  %v849_v12 = vmul.f32 %v5815_v8, %v5815_v8  ;;  %v850_v14 = vmul.f32 %v5817_v9, %v5817_v9  ;;  %v851_v19 = vmul.f32 %v5823_v10, %v5823_v10  ;;  %1122 = vmatpush.bf16.msrb.mxu2 %v5317_v47 }
 0x127   : > { %1276 = vmatpush.bf16.msra.mxu0 %v5335_v57  ;;  %v5363_v57 = vld [vmem:[%s6645_s5 + $0x200] sm:$0xff] }
 0x128   : > { %v852_v15 = vadd.f32 %v849_v12, %v848_v11  ;;  %v5343_v12 = vld [vmem:[%s6645_s5 + $0x160] sm:$0xff] }
 0x129   : > { %1045 = vmatpush.bf16.msrb.mxu1 %v5308_v50 }
 0x12a   : > { %v853_v20 = vadd.f32 %v852_v15, %v850_v14  ;;  %1123 = vmatpush.bf16.msrb.mxu2 %v5316_v51  ;;  %v5359_v14 = vld [vmem:[%s6645_s5 + $0x1e0] sm:$0xff] }
 0x12b   : > { %1277 = vmatpush.bf16.msra.mxu0 %v5334_v61  ;;  %1510 = vmatpush.bf16.msra.mxu3 %v5359_v14 }
 0x12c   : > { %v854_v25 = vadd.f32 %v853_v20, %v851_v19  ;;  %v5350_v19 = vld [vmem:[%s6645_s5 + $0x198] sm:$0xff]  ;;  %v5341_v20 = vld [vmem:[%s6645_s5 + $0x150] sm:$0xff] }
 0x12d   : > { %1046 = vmatpush.bf16.msrb.mxu1 %v5307_v54  ;;  %v5366_v54 = vld [vmem:[%s6645_s5 + $0x218] sm:$0xff] }
 0x12e   : > { %855 = vadd.xlane.f32.xlu1 %v854_v25  ;;  %1124 = vmatpush.bf16.msrb.mxu2 %v5315_v55  ;;  %v5348_v25 = vld [vmem:[%s6645_s5 + $0x188] sm:$0xff]  ;;  %v5365_v55 = vld [vmem:[%s6645_s5 + $0x210] sm:$0xff] }
 0x12f   : > { %1278 = vmatpush.bf16.msra.mxu0 %v5333_v1 }
 0x131   : > { %1351 = vmatpush.bf16.msra.mxu1 %v5346_v58 }
 0x132   : > { %1429 = vmatpush.bf16.msra.mxu2 %v5354_v59 }
 0x133   : > { %1279 = vmatpush.bf16.msra.mxu0 %v5332_v6 }
 0x135   : > { %1352 = vmatpush.bf16.msra.mxu1 %v5345_v62 }
 0x136   : > { %1430 = vmatpush.bf16.msra.mxu2 %v5353_v63 }
 0x137   : > { %1280 = vmatpush.bf16.msra.mxu0 %v5331_v17 }
 0x139   : > { %1353 = vmatpush.bf16.msra.mxu1 %v5344_v2 }
 0x13a   : > { %1431 = vmatpush.bf16.msra.mxu2 %v5352_v3 }
 0x13d   : > { %1354 = vmatpush.bf16.msra.mxu1 %v5343_v12 }
 0x13e   : > { %1432 = vmatpush.bf16.msra.mxu2 %v5351_v13 }
 0x141   : > { %1355 = vmatpush.bf16.msra.mxu1 %v5342_v18 }
 0x142   : > { %1433 = vmatpush.bf16.msra.mxu2 %v5350_v19 }
 0x145   : > { %1356 = vmatpush.bf16.msra.mxu1 %v5341_v20 }
 0x146   : > { %1434 = vmatpush.bf16.msra.mxu2 %v5349_v21 }
 0x147   : > { %861 = vperm.xlu1 %5621, %v858_v33  }
 0x149   : > { %1357 = vmatpush.bf16.msra.mxu1 %v5340_v24 }
 0x14a   : > { %1435 = vmatpush.bf16.msra.mxu2 %v5348_v25 }
 0x14d   : > { %1358 = vmatpush.bf16.msra.mxu1 %v5339_v29 }
 0x14e   : > { %1436 = vmatpush.bf16.msra.mxu2 %v5347_v30 }
 0x1a1   : > { %v856_v11 = vpop.xlane.xlu1 %855 }
 0x1a2   : > { %v857_v15 = vmul.f32 %v856_v11, %v5810_v4  ;;  %v5358_v4 = vld [vmem:[%s6645_s5 + $0x1d8] sm:$0xff] }
 0x1a3   : > { %1511 = vmatpush.bf16.msra.mxu3 %v5358_v4 }
 0x1a4   : > { %v868_v16 = vadd.f32 1e-05, %v857_v15 }
 0x1a6   : > { %5650 = vrsqrt.f32 %v868_v16  ;;  %vm875_vm4 = vweird.f32 %v868_v16 }
 0x1a7   : > { %1512 = vmatpush.bf16.msra.mxu3 %v5357_v22  ;;  %v5371_v22 = vld [vmem:[%s651_s25] sm:$0xff] }
 0x1ab   : > { %1513 = vmatpush.bf16.msra.mxu3 %v5356_v27 }
 0x1ac   : > { %v5651_v23 = vpop.eup %5650 }
 0x1ad   : > { %v870_v26 = vmul.f32 %v5651_v23, %v868_v16  ;;  %vm876_vm3 = vweird.f32 %v5651_v23 }
 0x1ae   : > { %vm877_vm5 = vmor %vm875_vm4, %vm876_vm3  ;;  %vm3672_vm3 = vcmask 1045508  }
 0x1af   : > { %v871_v28 = vmul.f32 %v5651_v23, %v870_v26  ;;  %1514 = vmatpush.bf16.msra.mxu3 %v5355_v32  ;;  %vm3677_vm4 = vmor %vm3676_vm2, %vm762_vm0 }
 0x1b1   : > { %v872_v31 = vmul.f32 0.5, %v871_v28 }
 0x1b3   : > { %v873_v33 = vsub.f32 1.5, %v872_v31 }
 0x1b5   : > { %v874_v34 = vmul.f32 %v5651_v23, %v873_v33  ;;  %v1674_v33 = vld [vmem:[%s5807_s16] sm:$0xff]  ;;  %s5670_s16 = smov 112  }
 0x1b7   : > { %v878_v40 = vsel %vm877_vm5, %v5651_v23, %v874_v34  ;;  %v1610_v23 = vpop.permute.xlu2 %1609  ;;  %v1712_v34 = vld [vmem:[%s666_s15] sm:$0xff]  ;;  %vm3678_vm5 = vmor %vm3672_vm3, %vm3677_vm4 }
 0x1b9   : > { %v862_v35 = vpop.permute.xlu1 %861 }
 0x1ba   : > { %v864_v36 = vmul.f32 %v862_v35, %v5813_v7  ;;  %v865_v37 = vmul.f32 %v862_v35, %v5815_v8  ;;  %v866_v38 = vmul.f32 %v862_v35, %v5817_v9  ;;  %v867_v39 = vmul.f32 %v862_v35, %v5823_v10  ;;  %v5370_v8 = vld [vmem:[%s6645_s5 + $0x238] sm:$0xff]  ;;  %v5369_v9 = vld [vmem:[%s6645_s5 + $0x230] sm:$0xff]  ;;  %v5368_v10 = vld [vmem:[%s6645_s5 + $0x228] sm:$0xff] }
 0x1bb   : > { %v5668_v35 = vmov 32.0  }
 0x1bc   : > { %v879_v41 = vmul.f32 %v878_v40, %v864_v36  ;;  %v880_v42 = vmul.f32 %v878_v40, %v865_v37  ;;  %v881_v43 = vmul.f32 %v878_v40, %v866_v38  ;;  %v882_v44 = vmul.f32 %v878_v40, %v867_v39 }
 0x1bd   : > { %5652 = vrcp.f32 %v5668_v35 }
 0x1be   : > { %v889_v46 = vadd.f32 %v887_v45, %v879_v41  ;;  %v890_v47 = vadd.f32 %v887_v45, %v880_v42  ;;  %v891_v48 = vadd.f32 %v887_v45, %v881_v43  ;;  %v892_v49 = vadd.f32 %v887_v45, %v882_v44 }
 0x1bf   : > { %v1615_v28 = vpop.permute.xlu2 %1614 }
 0x1c0   : > { %v893_v50 = vmax.f32 %v889_v46, %v890_v47  ;;  %v894_v51 = vmax.f32 %v891_v48, %v892_v49 }
 0x1c2   : > { %v895_v52 = vmax.f32 %v893_v50, %v894_v51 }
 0x1c3   : > { %v5653_v36 = vpop.eup %5652 }
 0x1c4   : > { %v896_v7 = vpack.c.bf16 %v895_v52, %v895_v52  ;;  %v1654_v37 = vmul.f32 32.0, %v5653_v36  ;;  %vm1658_vm9 = vweird.f32 %v5653_v36  ;;  %v1713_v52 = vld [vmem:[%s666_s15 + $0x8] sm:$0xff]  ;;  %s5602_s15 = smul.u32 7, %s6660_s30 }
 0x1c6   : > { %969 = vmatmul.bf16.vlgmr.msrb.gmra.mxu0 %v896_v7  ;;  %1047 = vmatmul.bf16.vlgmr.msrb.gmra.mxu1 %v896_v7  ;;  %v1655_v38 = vsub.f32 1.0, %v1654_v37  ;;  %v4447_v37 = vld [vmem:[%s6080_s23 + $0xa8] sm:$0xf] }
 0x1c7   : > { %1125 = vmatmul.bf16.vlgmr.msrb.gmra.mxu2 %v896_v7  ;;  %1203 = vmatmul.bf16.vlgmr.msrb.gmra.mxu3 %v896_v7 }
 0x1c8   : > { %1585 = vmatpush.bf16.msrb.mxu0 %v5370_v8  ;;  %v1656_v39 = vmul.f32 %v5653_v36, %v1655_v38  ;;  %v5396_v38 = vld [vmem:[%s6080_s23 + $0xc0] sm:$0xf0] }
 0x1ca   : > { %v1657_v40 = vadd.f32 %v5653_v36, %v1656_v39  ;;  %v5393_v39 = vld [vmem:[%s6080_s23 + $0xac] sm:$0xf] }
 0x1cc   : > { %1586 = vmatpush.bf16.msrb.mxu0 %v5369_v9  ;;  %v1659_v41 = vsel %vm1658_vm9, %v5653_v36, %v1657_v40  ;;  %v4448_v40 = vor.u32 %v5396_v38, %v4447_v37  ;;  %v5387_v37 = vld [vmem:[%s6080_s23 + $0x7c] sm:$0xf] }
 0x1ce   : > { %1986 = vmatpush.bf16.msrb.mxu2 %v4448_v40 }
 0x1d0   : > { %1587 = vmatpush.bf16.msrb.mxu0 %v5368_v10 }
 0x1d4   : > { %1588 = vmatpush.bf16.msrb.mxu0 %v5367_v53 }
 0x1d6   : > { %1281 = vmatmul.bf16.vlgmr.msra.gmra.mxu0 %v896_v7  ;;  %1359 = vmatmul.bf16.vlgmr.msra.gmra.mxu1 %v896_v7 }
 0x1d7   : > { %1437 = vmatmul.bf16.vlgmr.msra.gmra.mxu2 %v896_v7  ;;  %1515 = vmatmul.bf16.vlgmr.msra.gmra.mxu3 %v896_v7 }
 0x1d8   : > { %1589 = vmatpush.bf16.msrb.mxu0 %v5366_v54 }
 0x1dc   : > { %1590 = vmatpush.bf16.msrb.mxu0 %v5365_v55 }
 0x1e0   : > { %1591 = vmatpush.bf16.msrb.mxu0 %v5364_v56 }
 0x1e4   : > { %1592 = vmatpush.bf16.msrb.mxu0 %v5363_v57 }
 0x1e7   : > { %1593 = vmatmul.bf16.vlgmr.msrb.gmra.mxu0 %v896_v7  ;;  %v1684_v7 = vpop.permute.xlu0 %1683 }
 0x243   : > { %v970_v58 = vpop.f32.mrf.mxu0  ;;  %v1048_v59 = vpop.f32.mrf.mxu1 }
 0x244   : > { %v1598_v21 = vpack.c.bf16 %v1048_v59, %v970_v58 }
 0x24a   : > { %v1126_v60 = vpop.f32.mrf.mxu2  ;;  %v1204_v61 = vpop.f32.mrf.mxu3 }
 0x24b   : > { %v972_v62 = vpop.f32.mrf.mxu0  ;;  %v1050_v63 = vpop.f32.mrf.mxu1  ;;  %v1599_v20 = vpack.c.bf16 %v1204_v61, %v1126_v60 }
 0x252   : > { %v1128_v0 = vpop.f32.mrf.mxu2  ;;  %v1206_v1 = vpop.f32.mrf.mxu3 }
 0x253   : > { %v1282_v2 = vpop.f32.mrf.mxu0  ;;  %v1360_v3 = vpop.f32.mrf.mxu1 }
 0x254   : > { %v1600_v4 = vpack.c.bf16 %v1360_v3, %v1282_v2 }
 0x25a   : > { %v1438_v5 = vpop.f32.mrf.mxu2  ;;  %v1516_v6 = vpop.f32.mrf.mxu3 }
 0x25b   : > { %v1284_v11 = vpop.f32.mrf.mxu0  ;;  %v1362_v12 = vpop.f32.mrf.mxu1  ;;  %v1601_v18 = vpack.c.bf16 %v1516_v6, %v1438_v5 }
 0x262   : > { %v1440_v13 = vpop.f32.mrf.mxu2  ;;  %v1518_v14 = vpop.f32.mrf.mxu3 }
 0x264   : > { %v1594_v15 = vpop.f32.mrf.mxu0 }
 0x265   : > { %v1602_v16 = vpack.c.bf16 %v1594_v15, %v1594_v15 }
 0x267   : > { %v1628_v17 = vsel %vm1626_vm6, %v1602_v16, 0 }
 0x268   : > { %1633 = vmatpush.bf16.msrb.mxu1 %v1628_v17 }
 0x26c   : > { %v1596_v19 = vpop.f32.mrf.mxu0  ;;  %1634 = vmatpush.bf16.msrb.mxu1 %v1601_v18 }
 0x270   : > { %1635 = vmatpush.bf16.msrb.mxu1 %v1600_v4 }
 0x274   : > { %1636 = vmatpush.bf16.msrb.mxu1 %v1599_v20 }
 0x278   : > { %1637 = vmatpush.bf16.msrb.mxu1 %v1598_v21 }
 0x27b   : > { %4360 = vmatmul.msk.bf16.vlgmr.msrb.gmra.mxu1 %vm1622_vm7, %v5371_v22  ;;  %vm3679_vm7 = vcmask 130054  }
 0x2f8   : > { %v1639_v24 = vpop.f32.mrf.mxu1 }
 0x2f9   : > { %v1640_v25 = vadd.f32 %v1639_v24, %v1610_v23 }
 0x2fb   : > { %v1644_v26 = vmax.f32 %v1640_v25, 0.0 }
 0x2fd   : > { %v1647_v27 = vsel %vm1646_vm8, %v1644_v26, 0.0 }
 0x2fe   : > { %1648 = vadd.xlane.f32.xlu2 %v1647_v27 }
 0x300   : > { %v1641_v29 = vpop.f32.mrf.mxu1 }
 0x301   : > { %v1642_v30 = vadd.f32 %v1641_v29, %v1615_v28 }
 0x303   : > { %v1645_v31 = vmax.f32 %v1642_v30, 0.0 }
 0x305   : > { %v1650_v32 = vsel %vm1646_vm8, %v1645_v31, 0.0 }
 0x306   : > { %1651 = vadd.xlane.f32.xlu1 %v1650_v32 }
 0x316   : > { %1678 = vperm.xlu2 %5622, %v1674_v33  }
 0x31f   : > { %1716 = vperm.xlu1 %5621, %v1712_v34  }
 0x371   : > { %v1649_v42 = vpop.xlane.xlu2 %1648 }
 0x372   : > { %v1660_v43 = vmul.f32 %v1659_v41, %v1649_v42  ;;  %v4463_v42 = vld [vmem:[%s6080_s23 + $0xb8] sm:$0xf] }
 0x374   : > { %v1662_v44 = vsub.f32 %v1644_v26, %v1660_v43  ;;  %v5398_v43 = vld [vmem:[%s6080_s23 + $0xd0] sm:$0xf0] }
 0x376   : > { %v1664_v45 = vmul.f32 %v1662_v44, %v1662_v44 }
 0x378   : > { %v1666_v46 = vsel %vm1646_vm8, %v1664_v45, 0.0  ;;  %v4464_v45 = vor.u32 %v5398_v43, %v4463_v42  ;;  %v5383_v42 = vld [vmem:[%s6080_s23 + $0x58] sm:$0xf0]  ;;  %v5380_v43 = vld [vmem:[%s6080_s23 + $0x44] sm:$0xf] }
 0x379   : > { %v1652_v47 = vpop.xlane.xlu1 %1651  ;;  %1667 = vadd.xlane.f32.xlu0 %v1666_v46  ;;  %v1679_v1 = vpop.permute.xlu2 %1678  ;;  %v5395_v46 = vld [vmem:[%s6080_s23 + $0xbc] sm:$0xf] }
 0x37a   : > { %v1661_v48 = vmul.f32 %v1659_v41, %v1652_v47  ;;  %v1686_v6 = vmul.f32 %v1679_v1, %v1662_v44  ;;  %v4465_v47 = vld [vmem:[%s6080_s23 + $0xd4] sm:$0xf0]  ;;  %2038 = vmatpush.bf16.msra.mxu1 %v4464_v45  ;;  %v4409_v1 = vld [vmem:[%s6080_s23 + $0x64] sm:$0xf0] }
 0x37c   : > { %v1663_v49 = vsub.f32 %v1645_v31, %v1661_v48  ;;  %v4419_v48 = vld [vmem:[%s6080_s23 + $0x70] sm:$0xf] }
 0x37e   : > { %v1665_v50 = vmul.f32 %v1663_v49, %v1663_v49  ;;  %v1687_v12 = vmul.f32 %v1684_v7, %v1663_v49  ;;  %v4468_v49 = vor.u32 %v5395_v46, %v4465_v47  ;;  %v4371_v47 = vld [vmem:[%s6080_s23 + $0x8] sm:$0xf] }
 0x380   : > { %v1669_v51 = vsel %vm1646_vm8, %v1665_v50, 0.0  ;;  %v5389_v50 = vld [vmem:[%s6080_s23 + $0x88] sm:$0xf0]  ;;  %2051 = vmatpush.bf16.msra.mxu0 %v4468_v49 }
 0x381   : > { %1670 = vadd.xlane.f32.xlu0 %v1669_v51  ;;  %v5386_v51 = vld [vmem:[%s6080_s23 + $0x74] sm:$0xf]  ;;  %v4420_v7 = vor.u32 %v5389_v50, %v4419_v48  ;;  %v5376_v48 = vld [vmem:[%s6080_s23 + $0x20] sm:$0xf0]  ;;  %v5373_v49 = vld [vmem:[%s6080_s23 + $0xc] sm:$0xf] }
 0x382   : > { %v4373_v50 = vld [vmem:[%s6080_s23 + $0x24] sm:$0xf0] }
 0x383   : > { %1987 = vmatpush.bf16.msrb.mxu2 %v4420_v7  ;;  %v4471_v7 = vld [vmem:[%s6080_s23 + $0xc0] sm:$0xf] }
 0x391   : > { %v1717_v16 = vpop.permute.xlu1 %1716 }
 0x395   : > { %1721 = vperm.xlu0 %5620, %v1713_v52   ;;  %v4421_v52 = vld [vmem:[%s6080_s23 + $0x8c] sm:$0xf0] }
 0x3ec   : > { %v1668_v8 = vpop.xlane.xlu0 %1667 }
 0x3ed   : > { %v1672_v9 = vmul.f32 %v1668_v8, %v1659_v41  ;;  %v4424_v8 = vor.u32 %v5386_v51, %v4421_v52  ;;  %v4372_v51 = vor.u32 %v5376_v48, %v4371_v47  ;;  %v4376_v52 = vor.u32 %v5373_v49, %v4373_v50  ;;  %v4498_v47 = vld [vmem:[%s6136_s28 + $0x20] sm:$0xf]  ;;  %v5406_v48 = vld [vmem:[%s6136_s28 + $0x2c] sm:$0xf0] }
 0x3ef   : > { %v1688_v10 = vadd.f32 1e-05, %v1672_v9  ;;  %v4435_v9 = vld [vmem:[%s6080_s23 + $0x80] sm:$0xf] }
 0x3f1   : > { %5654 = vrsqrt.f32 %v1688_v10  ;;  %vm1696_vm11 = vweird.f32 %v1688_v10 }
 0x3f4   : > { %v1671_v53 = vpop.xlane.xlu0 %1670 }
 0x3f5   : > { %v1673_v54 = vmul.f32 %v1671_v53, %v1659_v41  ;;  %v4449_v41 = vld [vmem:[%s6080_s23 + $0xc4] sm:$0xf0]  ;;  %v5388_v53 = vld [vmem:[%s6080_s23 + $0x84] sm:$0xf] }
 0x3f6   : > { %v4452_v44 = vor.u32 %v5393_v39, %v4449_v41  ;;  %v4429_v39 = vld [vmem:[%s6080_s23 + $0x94] sm:$0xf0]  ;;  %v4399_v41 = vld [vmem:[%s6080_s23 + $0x40] sm:$0xf] }
 0x3f7   : > { %v5655_v55 = vpop.eup %5654  ;;  %v1689_v56 = vadd.f32 1e-05, %v1673_v54  ;;  %v4432_v40 = vor.u32 %v5387_v37, %v4429_v39  ;;  %v4400_v45 = vor.u32 %v5383_v42, %v4399_v41  ;;  %v5410_v37 = vld [vmem:[%s6136_s28 + $0x4c] sm:$0xf0]  ;;  %v4642_v39 = vld [vmem:[%s6136_s28 + $0x140] sm:$0xf] }
 0x3f8   : > { %v1691_v57 = vmul.f32 %v5655_v55, %v1688_v10  ;;  %vm1697_vm10 = vweird.f32 %v5655_v55  ;;  %1999 = vmatpush.bf16.msrb.mxu3 %v4452_v44  ;;  %v5391_v10 = vld [vmem:[%s6080_s23 + $0x98] sm:$0xf0]  ;;  %v4401_v44 = vld [vmem:[%s6080_s23 + $0x5c] sm:$0xf0] }
 0x3f9   : > { %5656 = vrsqrt.f32 %v1689_v56  ;;  %vm1698_vm12 = vmor %vm1696_vm11, %vm1697_vm10  ;;  %vm1706_vm14 = vweird.f32 %v1689_v56  ;;  %v4436_v54 = vor.u32 %v5391_v10, %v4435_v9  ;;  %v4404_v46 = vor.u32 %v5380_v43, %v4401_v44  ;;  %v4946_v42 = vld [vmem:[%s6136_s28 + $0x3a0] sm:$0xf]  ;;  %v5518_v43 = vld [vmem:[%s6136_s28 + $0x3ac] sm:$0xf0] }
 0x3fa   : > { %v1692_v58 = vmul.f32 %v5655_v55, %v1691_v57  ;;  %v5382_v57 = vld [vmem:[%s6080_s23 + $0x50] sm:$0xf0]  ;;  %v4850_v44 = vld [vmem:[%s6136_s28 + $0x2e0] sm:$0xf] }
 0x3fb   : > { %2039 = vmatpush.bf16.msra.mxu1 %v4436_v54  ;;  %v5392_v54 = vld [vmem:[%s6080_s23 + $0xa0] sm:$0xf0] }
 0x3fc   : > { %v1693_v59 = vmul.f32 0.5, %v1692_v58  ;;  %2000 = vmatpush.bf16.msrb.mxu3 %v4424_v8  ;;  %v5399_v8 = vld [vmem:[%s6080_s23 + $0xd8] sm:$0xf0] }
 0x3fd   : > { %v4472_v9 = vor.u32 %v5399_v8, %v4471_v7  ;;  %v4834_v7 = vld [vmem:[%s6136_s28 + $0x2c0] sm:$0xf]  ;;  %v5490_v8 = vld [vmem:[%s6136_s28 + $0x2cc] sm:$0xf0] }
 0x3fe   : > { %v1694_v60 = vsub.f32 1.5, %v1693_v59  ;;  %v5379_v59 = vld [vmem:[%s6080_s23 + $0x3c] sm:$0xf] }
 0x3ff   : > { %v5657_v61 = vpop.eup %5656 }
 0x400   : > { %v1701_v62 = vmul.f32 %v5657_v61, %v1689_v56  ;;  %v1695_v63 = vmul.f32 %v5655_v55, %v1694_v60  ;;  %vm1707_vm13 = vweird.f32 %v5657_v61  ;;  %v4391_v56 = vld [vmem:[%s6080_s23 + $0x38] sm:$0xf] }
 0x401   : > { %vm1708_vm15 = vmor %vm1706_vm14, %vm1707_vm13  ;;  %v4393_v60 = vld [vmem:[%s6080_s23 + $0x54] sm:$0xf0] }
 0x402   : > { %v1702_v0 = vmul.f32 %v5657_v61, %v1701_v62  ;;  %v1699_v5 = vsel %vm1698_vm12, %v5655_v55, %v1695_v63  ;;  %v4437_v55 = vld [vmem:[%s6080_s23 + $0x9c] sm:$0xf0]  ;;  %v4392_v62 = vor.u32 %v5382_v57, %v4391_v56  ;;  %v5384_v63 = vld [vmem:[%s6080_s23 + $0x60] sm:$0xf0]  ;;  %v5430_v56 = vld [vmem:[%s6136_s28 + $0xec] sm:$0xf0] }
 0x403   : > { %v1710_v13 = vmul.f32 %v1699_v5, %v1686_v6  ;;  %v4440_v58 = vor.u32 %v5388_v53, %v4437_v55  ;;  %v4363_v5 = vld [vmem:[%s6080_s23] sm:$0xf]  ;;  %v5375_v6 = vld [vmem:[%s6080_s23 + $0x18] sm:$0xf0]  ;;  %v4443_v53 = vld [vmem:[%s6080_s23 + $0x88] sm:$0xf] }
 0x404   : > { %v1703_v2 = vmul.f32 0.5, %v1702_v0  ;;  %v5381_v0 = vld [vmem:[%s6080_s23 + $0x4c] sm:$0xf]  ;;  %1988 = vmatpush.bf16.msrb.mxu2 %v4392_v62  ;;  %v4594_v55 = vld [vmem:[%s6136_s28 + $0xe0] sm:$0xf]  ;;  %v4444_v62 = vor.u32 %v5392_v54, %v4443_v53 }
 0x405   : > { %v1724_v18 = vadd.f32 %v1717_v16, %v1710_v13  ;;  %2052 = vmatpush.bf16.msra.mxu0 %v4440_v58  ;;  %v4365_v13 = vld [vmem:[%s6080_s23 + $0x1c] sm:$0xf0]  ;;  %v5374_v16 = vld [vmem:[%s6080_s23 + $0x14] sm:$0xf]  ;;  %v4595_v58 = vor.u32 %v5430_v56, %v4594_v55  ;;  %v5514_v54 = vld [vmem:[%s6136_s28 + $0x38c] sm:$0xf0]  ;;  %v4835_v55 = vor.u32 %v5490_v8, %v4834_v7  ;;  %v4499_v56 = vor.u32 %v5406_v48, %v4498_v47 }
 0x406   : > { %v1704_v3 = vsub.f32 1.5, %v1703_v2  ;;  %v4396_v2 = vor.u32 %v5379_v59, %v4393_v60  ;;  %v4722_v57 = vld [vmem:[%s6136_s28 + $0x1e0] sm:$0xf]  ;;  %v5462_v59 = vld [vmem:[%s6136_s28 + $0x1ec] sm:$0xf0] }
 0x407   : > { %v1722_v17 = vpop.permute.xlu0 %1721  ;;  %v4578_v60 = vld [vmem:[%s6136_s28 + $0xc0] sm:$0xf]  ;;  %v5538_v7 = vld [vmem:[%s6136_s28 + $0x44c] sm:$0xf0] }
 0x408   : > { %v1705_v11 = vmul.f32 %v5657_v61, %v1704_v3  ;;  %2001 = vmatpush.bf16.msrb.mxu3 %v4396_v2  ;;  %v4415_v2 = vld [vmem:[%s6080_s23 + $0x50] sm:$0xf]  ;;  %v4930_v53 = vld [vmem:[%s6136_s28 + $0x380] sm:$0xf] }
 0x409   : > { %v5154_v8 = vld [vmem:[%s6136_s28 + $0x540] sm:$0xf] }
 0x40a   : > { %v1709_v14 = vsel %vm1708_vm15, %v5657_v61, %v1705_v11  ;;  %v4407_v61 = vld [vmem:[%s6080_s23 + $0x48] sm:$0xf]  ;;  %v4412_v11 = vor.u32 %v5381_v0, %v4409_v1  ;;  %v4706_v0 = vld [vmem:[%s6136_s28 + $0x1c0] sm:$0xf]  ;;  %v5458_v1 = vld [vmem:[%s6136_s28 + $0x1cc] sm:$0xf0] }
 0x40b   : > { %v1711_v15 = vmul.f32 %v1709_v14, %v1687_v12  ;;  %v4408_v3 = vor.u32 %v5384_v63, %v4407_v61  ;;  %v5372_v12 = vld [vmem:[%s6080_s23 + $0x4] sm:$0xf]  ;;  %v4379_v14 = vld [vmem:[%s6080_s23 + $0x10] sm:$0xf]  ;;  %v4723_v63 = vor.u32 %v5462_v59, %v4722_v57  ;;  %v4482_v57 = vld [vmem:[%s6136_s28] sm:$0xf] }
 0x40c   : > { %2053 = vmatpush.bf16.msra.mxu0 %v4412_v11  ;;  %v5426_v61 = vld [vmem:[%s6136_s28 + $0xcc] sm:$0xf0]  ;;  %v4562_v11 = vld [vmem:[%s6136_s28 + $0xa0] sm:$0xf] }
 0x40d   : > { %v1725_v19 = vadd.f32 %v1722_v17, %v1711_v15  ;;  %v5377_v15 = vld [vmem:[%s6080_s23 + $0x28] sm:$0xf0]  ;;  %v4381_v17 = vld [vmem:[%s6080_s23 + $0x2c] sm:$0xf0]  ;;  %2040 = vmatpush.bf16.msra.mxu1 %v4408_v3 }
 0x40e   : > { %v5385_v3 = vld [vmem:[%s6080_s23 + $0x68] sm:$0xf0] }
 0x40f   : > { %v5623_v4 = vpack.i.bf16 %v1725_v19, %v1724_v18 }
 0x411   : > { %5624 = vrot.lane.b32.xlu2 %v5623_v4, %s5669_s27 }
 0x46b   : > { %v5625_v20 = vpop.permute.xlu2 %5624 }
 0x46c   : > { %v5627_v21 = vunpack.i.h.bf16 %v5625_v20  ;;  %v5626_v22 = vunpack.i.l.bf16 %v5625_v20 }
 0x46e   : > { %v1735_v23 = vmax.f32 %v1725_v19, %v5627_v21  ;;  %v1734_v24 = vmax.f32 %v1724_v18, %v5626_v22  ;;  %v4364_v19 = vor.u32 %v5375_v6, %v4363_v5  ;;  %v4368_v21 = vor.u32 %v5372_v12, %v4365_v13  ;;  %v5422_v12 = vld [vmem:[%s6136_s28 + $0xac] sm:$0xf0]  ;;  %v4690_v13 = vld [vmem:[%s6136_s28 + $0x1a0] sm:$0xf] }
 0x46f   : > { %v4380_v22 = vor.u32 %v5377_v15, %v4379_v14  ;;  %v4579_v5 = vor.u32 %v5426_v61, %v4578_v60  ;;  %v4707_v6 = vor.u32 %v5458_v1, %v4706_v0  ;;  %v5454_v14 = vld [vmem:[%s6136_s28 + $0x1ac] sm:$0xf0]  ;;  %v4416_v15 = vor.u32 %v5385_v3, %v4415_v2  ;;  %v4610_v60 = vld [vmem:[%s6136_s28 + $0x100] sm:$0xf] }
 0x470   : > { %v5628_v25 = vpack.i.bf16 %v1735_v23, %v1734_v24  ;;  %1989 = vmatpush.bf16.msrb.mxu2 %v4364_v19  ;;  %2002 = vmatpush.bf16.msrb.mxu3 %v4368_v21  ;;  %v4691_v19 = vor.u32 %v5454_v14, %v4690_v13  ;;  %v4674_v21 = vld [vmem:[%s6136_s28 + $0x180] sm:$0xf]  ;;  %v4931_v61 = vor.u32 %v5514_v54, %v4930_v53  ;;  %v5434_v0 = vld [vmem:[%s6136_s28 + $0x10c] sm:$0xf0]  ;;  %v5424_v54 = vld [vmem:[%s6136_s28 + $0xc4] sm:$0xf] }
 0x471   : > { %2041 = vmatpush.bf16.msra.mxu1 %v4380_v22  ;;  %v4914_v1 = vld [vmem:[%s6136_s28 + $0x360] sm:$0xf]  ;;  %v5510_v2 = vld [vmem:[%s6136_s28 + $0x36c] sm:$0xf0] }
 0x472   : > { %5629 = vrot.lane.b32.xlu0 %v5628_v25, %s5670_s16  ;;  %v4915_v13 = vor.u32 %v5510_v2, %v4914_v1  ;;  %v5090_v14 = vld [vmem:[%s6136_s28 + $0x4c0] sm:$0xf]  ;;  %v5570_v53 = vld [vmem:[%s6136_s28 + $0x54c] sm:$0xf0]  ;;  %v5420_v2 = vld [vmem:[%s6136_s28 + $0xa4] sm:$0xf] }
 0x473   : > { %v5566_v1 = vld [vmem:[%s6136_s28 + $0x52c] sm:$0xf0] }
 0x475   : > { %3313 = vmatpush.bf16.msrb.mxu1 %v4723_v63  ;;  %v5558_v63 = vld [vmem:[%s6136_s28 + $0x4ec] sm:$0xf0] }
 0x479   : > { %3314 = vmatpush.bf16.msrb.mxu1 %v4707_v6  ;;  %v5590_v6 = vld [vmem:[%s6136_s28 + $0x5ec] sm:$0xf0] }
 0x47d   : > { %3315 = vmatpush.bf16.msrb.mxu1 %v4691_v19  ;;  %v5218_v19 = vld [vmem:[%s6136_s28 + $0x5c0] sm:$0xf] }
 0x4e4   : > { %v5630_v26 = vpop.permute.xlu0 %5629 }
 0x4e5   : > { %v5632_v27 = vunpack.i.h.bf16 %v5630_v26  ;;  %v5631_v28 = vunpack.i.l.bf16 %v5630_v26 }
 0x4e7   : > { %v1745_v29 = vmax.f32 %v1735_v23, %v5632_v27  ;;  %v1744_v30 = vmax.f32 %v1734_v24, %v5631_v28  ;;  %v4384_v23 = vor.u32 %v5374_v16, %v4381_v17  ;;  %v4387_v16 = vld [vmem:[%s6080_s23 + $0x18] sm:$0xf]  ;;  %v5378_v17 = vld [vmem:[%s6080_s23 + $0x30] sm:$0xf0] }
 0x4e8   : > { %v4388_v22 = vor.u32 %v5378_v17, %v4387_v16  ;;  %v4898_v17 = vld [vmem:[%s6136_s28 + $0x340] sm:$0xf] }
 0x4e9   : > { %v5643_v31 = vpack.i.bf16 %v1745_v29, %v1744_v30  ;;  %v1766_v32 = vpack.c.bf16 %v1745_v29, %v1744_v30  ;;  %2054 = vmatpush.bf16.msra.mxu0 %v4384_v23  ;;  %v4455_v29 = vld [vmem:[%s6080_s23 + $0xb0] sm:$0xf]  ;;  %v5397_v30 = vld [vmem:[%s6080_s23 + $0xc8] sm:$0xf0] }
 0x4ea   : > { %v5450_v23 = vld [vmem:[%s6136_s28 + $0x18c] sm:$0xf0] }
 0x4eb   : > { %5644 = vrot.lane.b32.xlu0 %v5643_v31, %s5671_s17  ;;  %5639 = vrot.lane.b32.xlu1 %v5643_v31, %s5672_s21  ;;  %s675_s17 = scalar_lea.vmem %s6651_s11, %s5602_s15  ;;  %s6658_s21 = sshll.u32 %s6660_s30, 2 }
 0x4ec   : > { %5634 = vrot.lane.b32.xlu2 %v5643_v31, %s5673_s22  ;;  %v4456_v31 = vor.u32 %v5397_v30, %v4455_v29  ;;  %v4675_v29 = vor.u32 %v5450_v23, %v4674_v21  ;;  %v4658_v30 = vld [vmem:[%s6136_s28 + $0x160] sm:$0xf]  ;;  %v5550_v23 = vld [vmem:[%s6136_s28 + $0x4ac] sm:$0xf0]  ;;  %s684_s0 = scalar_lea.vmem %s6653_s13, %s6658_s21 }
 0x4ee   : > { %2012 = vmatpush.bf16.msra.mxu2 %v4456_v31  ;;  %3316 = vmatpush.bf16.msrb.mxu1 %v4675_v29 }
 0x512   : > { %1818 = vxpose.xlu2.c.b16.start [1/4] (short) (narrow) %v1766_v32, 16  ;;  %v5394_v32 = vld [vmem:[%s6080_s23 + $0xb4] sm:$0xf] }
 0x546   : > { %v5635_v33 = vpop.permute.xlu2 %5634 }
 0x547   : > { %v5637_v34 = vunpack.i.h.bf16 %v5635_v33  ;;  %v5636_v35 = vunpack.i.l.bf16 %v5635_v33  ;;  %v4457_v33 = vld [vmem:[%s6080_s23 + $0xcc] sm:$0xf0] }
 0x549   : > { %v1767_v36 = vpack.c.bf16 %v5637_v34, %v5636_v35  ;;  %v4460_v34 = vor.u32 %v5394_v32, %v4457_v33  ;;  %v4427_v35 = vld [vmem:[%s6080_s23 + $0x78] sm:$0xf]  ;;  %v5446_v32 = vld [vmem:[%s6136_s28 + $0x16c] sm:$0xf0]  ;;  %v4962_v33 = vld [vmem:[%s6136_s28 + $0x3c0] sm:$0xf] }
 0x54b   : > { %1819 = vxpose.xlu2.c.b16.cont [2/4] (short) (narrow) %v1767_v36, 16  ;;  %v5390_v36 = vld [vmem:[%s6080_s23 + $0x90] sm:$0xf0]  ;;  %2025 = vmatpush.bf16.msra.mxu3 %v4460_v34  ;;  %v5522_v34 = vld [vmem:[%s6136_s28 + $0x3cc] sm:$0xf0]  ;;  %s689_s23 = scalar_lea.vmem %s6654_s14, %s5786_s20 }
 0x54c   : > { %v4428_v38 = vor.u32 %v5390_v36, %v4427_v35  ;;  %v4514_v36 = vld [vmem:[%s6136_s28 + $0x40] sm:$0xf]  ;;  %v4963_v41 = vor.u32 %v5522_v34, %v4962_v33  ;;  %v5498_v34 = vld [vmem:[%s6136_s28 + $0x30c] sm:$0xf0] }
 0x54d   : > { %v4866_v33 = vld [vmem:[%s6136_s28 + $0x300] sm:$0xf] }
 0x54e   : > { %2013 = vmatpush.bf16.msra.mxu2 %v4428_v38  ;;  %v4659_v38 = vor.u32 %v5446_v32, %v4658_v30  ;;  %v5058_v30 = vld [vmem:[%s6136_s28 + $0x480] sm:$0xf] }
 0x54f   : > { %2026 = vmatpush.bf16.msra.mxu3 %v4432_v40  ;;  %v5442_v40 = vld [vmem:[%s6136_s28 + $0x14c] sm:$0xf0] }
 0x550   : > { %3317 = vmatpush.bf16.msrb.mxu1 %v4659_v38  ;;  %v4643_v50 = vor.u32 %v5442_v40, %v4642_v39  ;;  %v4867_v38 = vor.u32 %v5498_v34, %v4866_v33  ;;  %v5042_v40 = vld [vmem:[%s6136_s28 + $0x460] sm:$0xf]  ;;  %v5466_v34 = vld [vmem:[%s6136_s28 + $0x20c] sm:$0xf0] }
 0x551   : > { %v4738_v33 = vld [vmem:[%s6136_s28 + $0x200] sm:$0xf] }
 0x552   : > { %2014 = vmatpush.bf16.msra.mxu2 %v4400_v45  ;;  %v4515_v45 = vor.u32 %v5410_v37, %v4514_v36  ;;  %v5578_v36 = vld [vmem:[%s6136_s28 + $0x58c] sm:$0xf0] }
 0x553   : > { %2027 = vmatpush.bf16.msra.mxu3 %v4404_v46  ;;  %v5494_v46 = vld [vmem:[%s6136_s28 + $0x2ec] sm:$0xf0] }
 0x554   : > { %v4851_v49 = vor.u32 %v5494_v46, %v4850_v44  ;;  %3318 = vmatpush.bf16.msrb.mxu1 %v4643_v50  ;;  %v5574_v44 = vld [vmem:[%s6136_s28 + $0x56c] sm:$0xf0]  ;;  %v4596_v46 = vld [vmem:[%s6136_s28 + $0xf0] sm:$0xf0] }
 0x555   : > { %v5486_v50 = vld [vmem:[%s6136_s28 + $0x2ac] sm:$0xf0] }
 0x556   : > { %2015 = vmatpush.bf16.msra.mxu2 %v4372_v51  ;;  %v4626_v51 = vld [vmem:[%s6136_s28 + $0x120] sm:$0xf]  ;;  %3326 = vmatpush.bf16.msrb.mxu0 %v4851_v49 }
 0x557   : > { %2028 = vmatpush.bf16.msra.mxu3 %v4376_v52  ;;  %v4947_v52 = vor.u32 %v5518_v43, %v4946_v42  ;;  %v5170_v42 = vld [vmem:[%s6136_s28 + $0x560] sm:$0xf] }
 0x558   : > { %v5171_v47 = vor.u32 %v5574_v44, %v5170_v42  ;;  %v4818_v49 = vld [vmem:[%s6136_s28 + $0x2a0] sm:$0xf]  ;;  %v5400_v44 = vld [vmem:[%s6136_s28 + $0x4] sm:$0xf] }
 0x559   : > { %v5250_v42 = vld [vmem:[%s6136_s28 + $0x600] sm:$0xf] }
 0x55a   : > { %3327 = vmatpush.bf16.msrb.mxu0 %v4835_v55  ;;  %v4580_v55 = vld [vmem:[%s6136_s28 + $0xd0] sm:$0xf0] }
 0x55d   : > { %v5640_v18 = vpop.permute.xlu1 %5639  ;;  %v5645_v25 = vpop.permute.xlu0 %5644 }
 0x55e   : > { %v5642_v4 = vunpack.i.h.bf16 %v5640_v18  ;;  %v5641_v20 = vunpack.i.l.bf16 %v5640_v18  ;;  %v5647_v26 = vunpack.i.h.bf16 %v5645_v25  ;;  %v5646_v27 = vunpack.i.l.bf16 %v5645_v25  ;;  %v5526_v25 = vld [vmem:[%s6136_s28 + $0x3ec] sm:$0xf0] }
 0x55f   : > { %v4563_v18 = vor.u32 %v5422_v12, %v4562_v11  ;;  %v4611_v12 = vor.u32 %v5434_v0, %v4610_v60  ;;  %v5138_v0 = vld [vmem:[%s6136_s28 + $0x520] sm:$0xf] }
 0x560   : > { %v1768_v24 = vpack.c.bf16 %v5642_v4, %v5641_v20  ;;  %v1769_v28 = vpack.c.bf16 %v5647_v26, %v5646_v27  ;;  %v4546_v4 = vld [vmem:[%s6136_s28 + $0x80] sm:$0xf]  ;;  %v5418_v20 = vld [vmem:[%s6136_s28 + $0x8c] sm:$0xf0] }
 0x561   : > { %v4547_v26 = vor.u32 %v5418_v20, %v4546_v4  ;;  %v4530_v27 = vld [vmem:[%s6136_s28 + $0x60] sm:$0xf]  ;;  %v5586_v4 = vld [vmem:[%s6136_s28 + $0x5cc] sm:$0xf0] }
 0x562   : > { %1820 = vxpose.xlu2.c.b16.cont [3/4] (short) (narrow) %v1768_v24, 16  ;;  %v4978_v24 = vld [vmem:[%s6136_s28 + $0x3e0] sm:$0xf] }
 0x563   : > { %v4979_v31 = vor.u32 %v5526_v25, %v4978_v24  ;;  %v5219_v24 = vor.u32 %v5586_v4, %v5218_v19  ;;  %v4882_v25 = vld [vmem:[%s6136_s28 + $0x320] sm:$0xf]  ;;  %v5416_v19 = vld [vmem:[%s6136_s28 + $0x84] sm:$0xf]  ;;  %v4548_v4 = vld [vmem:[%s6136_s28 + $0x90] sm:$0xf0] }
 0x572   : > { %1821 = vxpose.xlu2.c.b16.end [4/4] (short) (narrow) %v1769_v28, 16  ;;  %v5414_v28 = vld [vmem:[%s6136_s28 + $0x6c] sm:$0xf0] }
 0x573   : > { %v4531_v35 = vor.u32 %v5414_v28, %v4530_v27  ;;  %v5202_v27 = vld [vmem:[%s6136_s28 + $0x5a0] sm:$0xf]  ;;  %v5582_v28 = vld [vmem:[%s6136_s28 + $0x5ac] sm:$0xf0] }
 0x574   : > { %v5203_v32 = vor.u32 %v5582_v28, %v5202_v27  ;;  %v4754_v28 = vld [vmem:[%s6136_s28 + $0x220] sm:$0xf] }
 0x5e3   : > { %v6138_v10 = vpop.trf.xlu2 }
 0x5e4   : > { %4473 = vmatmul.msk.bf16.vlgmr.msrb.gmra.mxu2 %vm1978_vm1, %v6138_v10  ;;  %4474 = vmatmul.msk.bf16.vlgmr.msrb.gmra.mxu3 %vm1978_vm1, %v6138_v10 }
 0x5e5   : > { %4477 = vmatmul.msk.bf16.vlgmr.msra.gmra.mxu1 %vm1978_vm1, %v6138_v10  ;;  %4478 = vmatmul.msk.bf16.vlgmr.msra.gmra.mxu0 %vm1978_vm1, %v6138_v10 }
 0x5e6   : > { %2064 = vmatpush.bf16.msrb.mxu2 %v4472_v9  ;;  %3300 = vmatpush.bf16.msrb.mxu3 %v4595_v58  ;;  %v5438_v9 = vld [vmem:[%s6136_s28 + $0x12c] sm:$0xf0] }
 0x5e7   : > { %v5402_v58 = vld [vmem:[%s6136_s28 + $0xc] sm:$0xf0]  ;;  %v4627_v59 = vor.u32 %v5438_v9, %v4626_v51  ;;  %v4819_v51 = vor.u32 %v5486_v50, %v4818_v49  ;;  %v6280_v50 = vld [vmem:[%s675_s17] sm:$0x7f] }
 0x5e8   : > { %v4483_v3 = vor.u32 %v5402_v58, %v4482_v57  ;;  %v4583_v57 = vor.u32 %v5424_v54, %v4580_v55  ;;  %v4802_v58 = vld [vmem:[%s6136_s28 + $0x280] sm:$0xf]  ;;  %v4852_v55 = vld [vmem:[%s6136_s28 + $0x2f0] sm:$0xf0] }
 0x5e9   : > { %3319 = vmatpush.bf16.msrb.mxu1 %v4627_v59  ;;  %3328 = vmatpush.bf16.msrb.mxu0 %v4819_v51  ;;  %v5482_v59 = vld [vmem:[%s6136_s28 + $0x28c] sm:$0xf0]  ;;  %v1804_v51 = vperm.slane %v6280_v50, 0 }
 0x5ea   : > { %2065 = vmatpush.bf16.msrb.mxu2 %v4444_v62  ;;  %3301 = vmatpush.bf16.msrb.mxu3 %v4579_v5  ;;  %v5106_v62 = vld [vmem:[%s6136_s28 + $0x4e0] sm:$0xf]  ;;  %v4803_v60 = vor.u32 %v5482_v59, %v4802_v58 }
 0x5eb   : > { %v5234_v5 = vld [vmem:[%s6136_s28 + $0x5e0] sm:$0xf]  ;;  %v5107_v11 = vor.u32 %v5558_v63, %v5106_v62  ;;  %v5534_v62 = vld [vmem:[%s6136_s28 + $0x42c] sm:$0xf0] }
 0x5ec   : > { %v5235_v16 = vor.u32 %v5590_v6, %v5234_v5  ;;  %v4564_v5 = vld [vmem:[%s6136_s28 + $0xb0] sm:$0xf0] }
 0x5ed   : > { %3320 = vmatpush.bf16.msrb.mxu1 %v4611_v12  ;;  %3329 = vmatpush.bf16.msrb.mxu0 %v4803_v60  ;;  %v4567_v6 = vor.u32 %v5420_v2, %v4564_v5  ;;  %v5478_v12 = vld [vmem:[%s6136_s28 + $0x26c] sm:$0xf0]  ;;  %v5520_v5 = vld [vmem:[%s6136_s28 + $0x3c4] sm:$0xf] }
 0x5ee   : > { %2066 = vmatpush.bf16.msrb.mxu2 %v4416_v15  ;;  %3302 = vmatpush.bf16.msrb.mxu3 %v4563_v18  ;;  %v5554_v15 = vld [vmem:[%s6136_s28 + $0x4cc] sm:$0xf0] }
 0x5ef   : > { %v5506_v18 = vld [vmem:[%s6136_s28 + $0x34c] sm:$0xf0]  ;;  %v5091_v20 = vor.u32 %v5554_v15, %v5090_v14  ;;  %v4994_v14 = vld [vmem:[%s6136_s28 + $0x400] sm:$0xf] }
 0x5f0   : > { %v4899_v21 = vor.u32 %v5506_v18, %v4898_v17  ;;  %v5530_v15 = vld [vmem:[%s6136_s28 + $0x40c] sm:$0xf0] }
 0x5f1   : > { %3365 = vmatpush.bf16.msra.mxu1 %v5235_v16  ;;  %v5122_v16 = vld [vmem:[%s6136_s28 + $0x500] sm:$0xf]  ;;  %v4995_v17 = vor.u32 %v5530_v15, %v4994_v14  ;;  %v5562_v18 = vld [vmem:[%s6136_s28 + $0x50c] sm:$0xf0]  ;;  %v5484_v15 = vld [vmem:[%s6136_s28 + $0x2a4] sm:$0xf] }
 0x5f2   : > { %2067 = vmatpush.bf16.msrb.mxu2 %v4388_v22  ;;  %3303 = vmatpush.bf16.msrb.mxu3 %v4547_v26  ;;  %v5074_v22 = vld [vmem:[%s6136_s28 + $0x4a0] sm:$0xf]  ;;  %v5502_v26 = vld [vmem:[%s6136_s28 + $0x32c] sm:$0xf0] }
 0x5f3   : > { %v4883_v29 = vor.u32 %v5502_v26, %v4882_v25  ;;  %v5412_v25 = vld [vmem:[%s6136_s28 + $0x64] sm:$0xf]  ;;  %v4532_v26 = vld [vmem:[%s6136_s28 + $0x70] sm:$0xf0] }
 0x5f4   : > { %4475 = vmatmul.msk.bf16.vlgmr.msra.gmra.mxu2 %vm1978_vm1, %v6138_v10  ;;  %4476 = vmatmul.msk.bf16.vlgmr.msra.gmra.mxu3 %vm1978_vm1, %v6138_v10  ;;  %v4535_v27 = vor.u32 %v5412_v25, %v4532_v26  ;;  %v4804_v25 = vld [vmem:[%s6136_s28 + $0x290] sm:$0xf0]  ;;  %v5512_v26 = vld [vmem:[%s6136_s28 + $0x384] sm:$0xf] }
 0x5f5   : > { %3366 = vmatpush.bf16.msra.mxu1 %v5219_v24 }
 0x5f6   : > { %3339 = vmatpush.bf16.msra.mxu2 %v4979_v31  ;;  %3304 = vmatpush.bf16.msrb.mxu3 %v4531_v35  ;;  %v5546_v31 = vld [vmem:[%s6136_s28 + $0x48c] sm:$0xf0]  ;;  %v5186_v35 = vld [vmem:[%s6136_s28 + $0x580] sm:$0xf] }
 0x5f7   : > { %v5059_v37 = vor.u32 %v5546_v31, %v5058_v30  ;;  %v5187_v39 = vor.u32 %v5578_v36, %v5186_v35  ;;  %v5408_v30 = vld [vmem:[%s6136_s28 + $0x44] sm:$0xf]  ;;  %v4516_v31 = vld [vmem:[%s6136_s28 + $0x50] sm:$0xf0]  ;;  %v4739_v35 = vor.u32 %v5466_v34, %v4738_v33  ;;  %v5266_v36 = vld [vmem:[%s6136_s28 + $0x620] sm:$0xf] }
 0x5f8   : > { %v5460_v33 = vld [vmem:[%s6136_s28 + $0x1e4] sm:$0xf] }
 0x5f9   : > { %3367 = vmatpush.bf16.msra.mxu1 %v5203_v32  ;;  %v4519_v32 = vor.u32 %v5408_v30, %v4516_v31 }
 0x5fa   : > { %3340 = vmatpush.bf16.msra.mxu2 %v4963_v41  ;;  %3305 = vmatpush.bf16.msrb.mxu3 %v4515_v45  ;;  %v5542_v41 = vld [vmem:[%s6136_s28 + $0x46c] sm:$0xf0]  ;;  %v5428_v45 = vld [vmem:[%s6136_s28 + $0xe4] sm:$0xf] }
 0x5fb   : > { %v5043_v43 = vor.u32 %v5542_v41, %v5042_v40  ;;  %v4599_v48 = vor.u32 %v5428_v45, %v4596_v46  ;;  %v4500_v40 = vld [vmem:[%s6136_s28 + $0x30] sm:$0xf0] }
 0x5fc   : > { %v4484_v46 = vld [vmem:[%s6136_s28 + $0x10] sm:$0xf0] }
 0x5fd   : > { %3368 = vmatpush.bf16.msra.mxu1 %v5187_v39  ;;  %v5404_v39 = vld [vmem:[%s6136_s28 + $0x24] sm:$0xf] }
 0x5fe   : > { %3341 = vmatpush.bf16.msra.mxu2 %v4947_v52  ;;  %3306 = vmatpush.bf16.msrb.mxu3 %v4499_v56  ;;  %v5026_v52 = vld [vmem:[%s6136_s28 + $0x440] sm:$0xf]  ;;  %v5155_v56 = vor.u32 %v5570_v53, %v5154_v8  ;;  %v4503_v41 = vor.u32 %v5404_v39, %v4500_v40 }
 0x5ff   : > { %v5027_v9 = vor.u32 %v5538_v7, %v5026_v52  ;;  %v1805_v52 = vperm.slane %v6280_v50, 1 }
 0x601   : > { %3369 = vmatpush.bf16.msra.mxu1 %v5171_v47  ;;  %v4487_v47 = vor.u32 %v5400_v44, %v4484_v46  ;;  %v5108_v46 = vld [vmem:[%s6136_s28 + $0x4f0] sm:$0xf0] }
 0x602   : > { %3342 = vmatpush.bf16.msra.mxu2 %v4931_v61  ;;  %3307 = vmatpush.bf16.msrb.mxu3 %v4483_v3  ;;  %v5010_v61 = vld [vmem:[%s6136_s28 + $0x420] sm:$0xf]  ;;  %v5139_v3 = vor.u32 %v5566_v1, %v5138_v0  ;;  %v5488_v0 = vld [vmem:[%s6136_s28 + $0x2c4] sm:$0xf] }
 0x603   : > { %v5011_v63 = vor.u32 %v5534_v62, %v5010_v61 }
 0x604   : > { %4479 = vmatmul.msk.bf16.vlgmr.msrb.gmra.mxu2 %vm1978_vm1, %v6138_v10  ;;  %v5075_v10 = vor.u32 %v5550_v23, %v5074_v22  ;;  %v4770_v22 = vld [vmem:[%s6136_s28 + $0x240] sm:$0xf]  ;;  %v5474_v23 = vld [vmem:[%s6136_s28 + $0x24c] sm:$0xf0] }
 0x605   : > { %3370 = vmatpush.bf16.msra.mxu1 %v5155_v56  ;;  %v4771_v24 = vor.u32 %v5474_v23, %v4770_v22  ;;  %v5524_v56 = vld [vmem:[%s6136_s28 + $0x3e4] sm:$0xf]  ;;  %v1806_v22 = vperm.slane %v6280_v50, 2  ;;  %v1807_v23 = vperm.slane %v6280_v50, 3 }
 0x606   : > { %3352 = vmatpush.bf16.msra.mxu3 %v5107_v11  ;;  %3343 = vmatpush.bf16.msra.mxu2 %v4915_v13  ;;  %v4786_v11 = vld [vmem:[%s6136_s28 + $0x260] sm:$0xf] }
 0x607   : > { %v4787_v13 = vor.u32 %v5478_v12, %v4786_v11 }
 0x609   : > { %3371 = vmatpush.bf16.msra.mxu1 %v5139_v3  ;;  %3330 = vmatpush.bf16.msrb.mxu0 %v4787_v13  ;;  %v4836_v3 = vld [vmem:[%s6136_s28 + $0x2d0] sm:$0xf0] }
 0x60a   : > { %3353 = vmatpush.bf16.msra.mxu3 %v5091_v20  ;;  %3344 = vmatpush.bf16.msra.mxu2 %v4899_v21  ;;  %v5123_v20 = vor.u32 %v5562_v18, %v5122_v16  ;;  %v4551_v21 = vor.u32 %v5416_v19, %v4548_v4  ;;  %v4839_v13 = vor.u32 %v5488_v0, %v4836_v3  ;;  %v4820_v16 = vld [vmem:[%s6136_s28 + $0x2b0] sm:$0xf0]  ;;  %v1808_v19 = vperm.slane %v6280_v50, 4  ;;  %v5452_v3 = vld [vmem:[%s6136_s28 + $0x1a4] sm:$0xf] }
 0x60b   : > { %v4948_v18 = vld [vmem:[%s6136_s28 + $0x3b0] sm:$0xf0]  ;;  %v1809_v4 = vperm.slane %v6280_v50, 5 }
 0x60d   : > { %3372 = vmatpush.bf16.msra.mxu1 %v5123_v20  ;;  %3331 = vmatpush.bf16.msrb.mxu0 %v4771_v24  ;;  %v4823_v20 = vor.u32 %v5484_v15, %v4820_v16  ;;  %v5480_v24 = vld [vmem:[%s6136_s28 + $0x284] sm:$0xf]  ;;  %v4884_v15 = vld [vmem:[%s6136_s28 + $0x330] sm:$0xf0] }
 0x60e   : > { %3354 = vmatpush.bf16.msra.mxu3 %v5075_v10  ;;  %3345 = vmatpush.bf16.msra.mxu2 %v4883_v29  ;;  %v5470_v10 = vld [vmem:[%s6136_s28 + $0x22c] sm:$0xf0]  ;;  %v4807_v31 = vor.u32 %v5480_v24, %v4804_v25  ;;  %v5548_v16 = vld [vmem:[%s6136_s28 + $0x4a4] sm:$0xf]  ;;  %v4740_v25 = vld [vmem:[%s6136_s28 + $0x210] sm:$0xf0] }
 0x60f   : > { %v4755_v29 = vor.u32 %v5470_v10, %v4754_v28 }
 0x611   : > { %3332 = vmatpush.bf16.msrb.mxu0 %v4755_v29 }
 0x612   : > { %3355 = vmatpush.bf16.msra.mxu3 %v5059_v37  ;;  %3346 = vmatpush.bf16.msra.mxu2 %v4867_v38  ;;  %v5598_v37 = vld [vmem:[%s6136_s28 + $0x62c] sm:$0xf0] }
 0x613   : > { %v5267_v38 = vor.u32 %v5598_v37, %v5266_v36  ;;  %v4724_v36 = vld [vmem:[%s6136_s28 + $0x1f0] sm:$0xf0]  ;;  %v5476_v37 = vld [vmem:[%s6136_s28 + $0x264] sm:$0xf] }
 0x615   : > { %3333 = vmatpush.bf16.msrb.mxu0 %v4739_v35 }
 0x616   : > { %3356 = vmatpush.bf16.msra.mxu3 %v5043_v43  ;;  %3391 = vmatpush.bf16.msrb.mxu2 %v4599_v48  ;;  %v5594_v43 = vld [vmem:[%s6136_s28 + $0x60c] sm:$0xf0] }
 0x617   : > { %v5251_v45 = vor.u32 %v5594_v43, %v5250_v42  ;;  %v4916_v42 = vld [vmem:[%s6136_s28 + $0x370] sm:$0xf0] }
 0x619   : > { %3384 = vmatpush.bf16.msra.mxu0 %v5267_v38  ;;  %v4788_v38 = vld [vmem:[%s6136_s28 + $0x270] sm:$0xf0] }
 0x61a   : > { %3357 = vmatpush.bf16.msra.mxu3 %v5027_v9  ;;  %3392 = vmatpush.bf16.msrb.mxu2 %v4583_v57  ;;  %v5492_v9 = vld [vmem:[%s6136_s28 + $0x2e4] sm:$0xf]  ;;  %v4980_v57 = vld [vmem:[%s6136_s28 + $0x3f0] sm:$0xf0] }
 0x61b   : > { %v4855_v62 = vor.u32 %v5492_v9, %v4852_v55  ;;  %v5472_v55 = vld [vmem:[%s6136_s28 + $0x244] sm:$0xf] }
 0x61d   : > { %3385 = vmatpush.bf16.msra.mxu0 %v5251_v45  ;;  %v5556_v45 = vld [vmem:[%s6136_s28 + $0x4e4] sm:$0xf] }
 0x61e   : > { %3358 = vmatpush.bf16.msra.mxu3 %v5011_v63  ;;  %3393 = vmatpush.bf16.msrb.mxu2 %v4567_v6  ;;  %v4983_v63 = vor.u32 %v5524_v56, %v4980_v57  ;;  %v4964_v6 = vld [vmem:[%s6136_s28 + $0x3d0] sm:$0xf0]  ;;  %v5504_v57 = vld [vmem:[%s6136_s28 + $0x344] sm:$0xf] }
 0x61f   : > { %v4967_v14 = vor.u32 %v5520_v5, %v4964_v6  ;;  %v4772_v56 = vld [vmem:[%s6136_s28 + $0x250] sm:$0xf0] }
 0x620   : > { %v4775_v0 = vor.u32 %v5472_v55, %v4772_v56  ;;  %v4692_v5 = vld [vmem:[%s6136_s28 + $0x1b0] sm:$0xf0]  ;;  %v5440_v56 = vld [vmem:[%s6136_s28 + $0x144] sm:$0xf] }
 0x622   : > { %3359 = vmatpush.bf16.msra.mxu3 %v4995_v17  ;;  %3394 = vmatpush.bf16.msrb.mxu2 %v4551_v21  ;;  %v5516_v17 = vld [vmem:[%s6136_s28 + $0x3a4] sm:$0xf] }
 0x623   : > { %v4951_v21 = vor.u32 %v5516_v17, %v4948_v18  ;;  %v5076_v17 = vld [vmem:[%s6136_s28 + $0x4b0] sm:$0xf0]  ;;  %v1810_v18 = vperm.slane %v6280_v50, 6  ;;  %v5544_v50 = vld [vmem:[%s6136_s28 + $0x484] sm:$0xf] }
 0x624   : > { %v5079_v24 = vor.u32 %v5548_v16, %v5076_v17  ;;  %v5532_v16 = vld [vmem:[%s6136_s28 + $0x424] sm:$0xf]  ;;  %v5012_v17 = vld [vmem:[%s6136_s28 + $0x430] sm:$0xf0] }
 0x626   : > { %3395 = vmatpush.bf16.msrb.mxu2 %v4535_v27  ;;  %v4932_v27 = vld [vmem:[%s6136_s28 + $0x390] sm:$0xf0] }
 0x62a   : > { %3396 = vmatpush.bf16.msrb.mxu2 %v4519_v32  ;;  %v4935_v32 = vor.u32 %v5512_v26, %v4932_v27  ;;  %v5496_v26 = vld [vmem:[%s6136_s28 + $0x304] sm:$0xf]  ;;  %v4868_v27 = vld [vmem:[%s6136_s28 + $0x310] sm:$0xf0] }
 0x62e   : > { %3397 = vmatpush.bf16.msrb.mxu2 %v4503_v41  ;;  %v5508_v41 = vld [vmem:[%s6136_s28 + $0x364] sm:$0xf] }
 0x632   : > { %3398 = vmatpush.bf16.msrb.mxu2 %v4487_v47 }
 0x662   : > { %v2043_v48 = vpop.f32.mrf.mxu1  ;;  %v2056_v49 = vpop.f32.mrf.mxu0 }
 0x663   : > { %v2044_v28 = vadd.f32 %v2043_v48, %v1808_v19  ;;  %v2057_v10 = vadd.f32 %v2056_v49, %v1809_v4  ;;  %v4727_v49 = vor.u32 %v5460_v33, %v4724_v36  ;;  %v4695_v19 = vor.u32 %v5452_v3, %v4692_v5  ;;  %v5423_v3 = vld [vmem:[%s6136_s28 + $0xb4] sm:$0xf0] }
 0x664   : > { %v4871_v36 = vor.u32 %v5496_v26, %v4868_v27  ;;  %v5528_v26 = vld [vmem:[%s6136_s28 + $0x404] sm:$0xf]  ;;  %v4996_v27 = vld [vmem:[%s6136_s28 + $0x410] sm:$0xf0] }
 0x665   : > { %v2077_v39 = vmax.f32 %v2044_v28, 0.0  ;;  %v2078_v40 = vmax.f32 %v2057_v10, 0.0  ;;  %v5060_v28 = vld [vmem:[%s6136_s28 + $0x490] sm:$0xf0]  ;;  %v5596_v10 = vld [vmem:[%s6136_s28 + $0x624] sm:$0xf] }
 0x667   : > { %v1991_v7 = vpop.f32.mrf.mxu2  ;;  %v2004_v8 = vpop.f32.mrf.mxu3  ;;  %v6326_v9 = vpack.c.bf16 %v2078_v40, %v2078_v40  ;;  %v5540_v40 = vld [vmem:[%s6136_s28 + $0x464] sm:$0xf] }
 0x668   : > { %v1992_v53 = vadd.f32 %v1991_v7, %v1804_v51  ;;  %v2005_v54 = vadd.f32 %v2004_v8, %v1805_v52  ;;  %v4791_v51 = vor.u32 %v5476_v37, %v4788_v38  ;;  %v5456_v52 = vld [vmem:[%s6136_s28 + $0x1c4] sm:$0xf]  ;;  %v4708_v7 = vld [vmem:[%s6136_s28 + $0x1d0] sm:$0xf0]  ;;  %v6324_v8 = vpack.c.bf16 %v2077_v39, %v2077_v39 }
 0x669   : > { %v5063_v37 = vor.u32 %v5544_v50, %v5060_v28  ;;  %v5444_v38 = vld [vmem:[%s6136_s28 + $0x164] sm:$0xf]  ;;  %v4660_v39 = vld [vmem:[%s6136_s28 + $0x170] sm:$0xf0] }
 0x66a   : > { %v2073_v58 = vmax.f32 %v1992_v53, 0.0  ;;  %v2074_v59 = vmax.f32 %v2005_v54, 0.0  ;;  %v2045_v60 = vpop.f32.mrf.mxu1  ;;  %v2058_v61 = vpop.f32.mrf.mxu0  ;;  %v4919_v53 = vor.u32 %v5508_v41, %v4916_v42  ;;  %v5111_v54 = vor.u32 %v5556_v45, %v5108_v46  ;;  %v5592_v45 = vld [vmem:[%s6136_s28 + $0x604] sm:$0xf]  ;;  %v5252_v46 = vld [vmem:[%s6136_s28 + $0x610] sm:$0xf0] }
 0x66b   : > { %v5092_v60 = vld [vmem:[%s6136_s28 + $0x4d0] sm:$0xf0]  ;;  %v5588_v28 = vld [vmem:[%s6136_s28 + $0x5e4] sm:$0xf] }
 0x66c   : > { %v6289_v1 = vpack.c.bf16 %v2073_v58, %v2073_v58  ;;  %v6291_v2 = vpack.c.bf16 %v2074_v59, %v2074_v59  ;;  %v4900_v58 = vld [vmem:[%s6136_s28 + $0x350] sm:$0xf0]  ;;  %v5552_v59 = vld [vmem:[%s6136_s28 + $0x4c4] sm:$0xf] }
 0x66d   : > { %v4903_v6 = vor.u32 %v5504_v57, %v4900_v58  ;;  %v4644_v57 = vld [vmem:[%s6136_s28 + $0x150] sm:$0xf0]  ;;  %v5255_v58 = vor.u32 %v5592_v45, %v5252_v46  ;;  %v5411_v45 = vld [vmem:[%s6136_s28 + $0x54] sm:$0xf0]  ;;  %v4714_v46 = vld [vmem:[%s6136_s28 + $0x1c8] sm:$0xf] }
 0x66e   : > { %3308 = vmatmul.bf16.vlgmr.msrb.gmra.mxu3 %v6289_v1  ;;  %3321 = vmatmul.bf16.vlgmr.msrb.gmra.mxu1 %v6291_v2  ;;  %v4647_v5 = vor.u32 %v5440_v56, %v4644_v57  ;;  %v5580_v56 = vld [vmem:[%s6136_s28 + $0x5a4] sm:$0xf]  ;;  %v5204_v57 = vld [vmem:[%s6136_s28 + $0x5b0] sm:$0xf0] }
 0x66f   : > { %3417 = vmatpush.bf16.msrb.mxu3 %v4855_v62  ;;  %3430 = vmatpush.bf16.msrb.mxu1 %v4983_v63  ;;  %v1993_v11 = vpop.f32.mrf.mxu2  ;;  %v2006_v12 = vpop.f32.mrf.mxu3  ;;  %v4711_v63 = vor.u32 %v5456_v52, %v4708_v7  ;;  %v4663_v7 = vor.u32 %v5444_v38, %v4660_v39 }
 0x670   : > { %v5095_v11 = vor.u32 %v5552_v59, %v5092_v60  ;;  %v5468_v12 = vld [vmem:[%s6136_s28 + $0x224] sm:$0xf] }
 0x671   : > { %v5536_v60 = vld [vmem:[%s6136_s28 + $0x444] sm:$0xf] }
 0x673   : > { %3418 = vmatpush.bf16.msrb.mxu3 %v4839_v13  ;;  %3431 = vmatpush.bf16.msrb.mxu1 %v4967_v14  ;;  %v4756_v13 = vld [vmem:[%s6136_s28 + $0x230] sm:$0xf0]  ;;  %v5500_v14 = vld [vmem:[%s6136_s28 + $0x324] sm:$0xf] }
 0x674   : > { %v4759_v4 = vor.u32 %v5468_v12, %v4756_v13  ;;  %v5436_v13 = vld [vmem:[%s6136_s28 + $0x124] sm:$0xf] }
 0x677   : > { %3419 = vmatpush.bf16.msrb.mxu3 %v4823_v20  ;;  %3432 = vmatpush.bf16.msrb.mxu1 %v4951_v21  ;;  %v2017_v29 = vpop.f32.mrf.mxu2  ;;  %v2030_v30 = vpop.f32.mrf.mxu3  ;;  %v5448_v20 = vld [vmem:[%s6136_s28 + $0x184] sm:$0xf]  ;;  %v4676_v21 = vld [vmem:[%s6136_s28 + $0x190] sm:$0xf0] }
 0x678   : > { %v2018_v34 = vadd.f32 %v2017_v29, %v1806_v22  ;;  %v2031_v35 = vadd.f32 %v2030_v30, %v1807_v23  ;;  %v5464_v22 = vld [vmem:[%s6136_s28 + $0x204] sm:$0xf]  ;;  %v4887_v23 = vor.u32 %v5500_v14, %v4884_v15  ;;  %v5268_v30 = vld [vmem:[%s6136_s28 + $0x630] sm:$0xf0] }
 0x679   : > { %v5271_v42 = vor.u32 %v5596_v10, %v5268_v30  ;;  %v4628_v14 = vld [vmem:[%s6136_s28 + $0x130] sm:$0xf0] }
 0x67a   : > { %v2075_v43 = vmax.f32 %v2018_v34, 0.0  ;;  %v2076_v44 = vmax.f32 %v2031_v35, 0.0  ;;  %v4679_v34 = vor.u32 %v5448_v20, %v4676_v21  ;;  %v4743_v35 = vor.u32 %v5464_v22, %v4740_v25  ;;  %v4826_v21 = vld [vmem:[%s6136_s28 + $0x2a8] sm:$0xf]  ;;  %v5487_v22 = vld [vmem:[%s6136_s28 + $0x2b4] sm:$0xf0] }
 0x67b   : > { %3420 = vmatpush.bf16.msrb.mxu3 %v4807_v31  ;;  %3433 = vmatpush.bf16.msrb.mxu1 %v4935_v32  ;;  %v4602_v31 = vld [vmem:[%s6136_s28 + $0xe8] sm:$0xf]  ;;  %v5431_v32 = vld [vmem:[%s6136_s28 + $0xf4] sm:$0xf0]  ;;  %v4631_v20 = vor.u32 %v5436_v13, %v4628_v14  ;;  %v4612_v25 = vld [vmem:[%s6136_s28 + $0x110] sm:$0xf0]  ;;  %v4827_v30 = vor.u32 %v5487_v22, %v4826_v21 }
 0x67c   : > { %v6318_v47 = vpack.c.bf16 %v2075_v43, %v2075_v43  ;;  %v6320_v48 = vpack.c.bf16 %v2076_v44, %v2076_v44  ;;  %v4603_v43 = vor.u32 %v5431_v32, %v4602_v31  ;;  %v5044_v44 = vld [vmem:[%s6136_s28 + $0x470] sm:$0xf0]  ;;  %v5415_v31 = vld [vmem:[%s6136_s28 + $0x74] sm:$0xf0]  ;;  %v4730_v32 = vld [vmem:[%s6136_s28 + $0x1e8] sm:$0xf] }
 0x67d   : > { %v5047_v55 = vor.u32 %v5540_v40, %v5044_v44  ;;  %v5236_v10 = vld [vmem:[%s6136_s28 + $0x5f0] sm:$0xf0]  ;;  %v4490_v13 = vld [vmem:[%s6136_s28 + $0x8] sm:$0xf]  ;;  %v5403_v14 = vld [vmem:[%s6136_s28 + $0x14] sm:$0xf0] }
 0x67e   : > { %3334 = vmatmul.bf16.vlgmr.msrb.gmra.mxu0 %v6318_v47  ;;  %3347 = vmatmul.bf16.vlgmr.msra.gmra.mxu2 %v6320_v48  ;;  %v5239_v38 = vor.u32 %v5588_v28, %v5236_v10  ;;  %v4491_v22 = vor.u32 %v5403_v14, %v4490_v13  ;;  %v5447_v28 = vld [vmem:[%s6136_s28 + $0x174] sm:$0xf0]  ;;  %v4746_v10 = vld [vmem:[%s6136_s28 + $0x208] sm:$0xf] }
 0x67f   : > { %3360 = vmatmul.bf16.vlgmr.msra.gmra.mxu3 %v6324_v8  ;;  %3373 = vmatmul.bf16.vlgmr.msra.gmra.mxu1 %v6326_v9  ;;  %v2019_v61 = vpop.f32.mrf.mxu2  ;;  %v2032_v62 = vpop.f32.mrf.mxu3  ;;  %v5435_v13 = vld [vmem:[%s6136_s28 + $0x114] sm:$0xf0] }
 0x680   : > { %3404 = vmatpush.bf16.msrb.mxu0 %v4727_v49  ;;  %3421 = vmatpush.bf16.msrb.mxu3 %v4791_v51  ;;  %v4586_v49 = vld [vmem:[%s6136_s28 + $0xc8] sm:$0xf]  ;;  %v5427_v51 = vld [vmem:[%s6136_s28 + $0xd4] sm:$0xf0]  ;;  %v5028_v61 = vld [vmem:[%s6136_s28 + $0x450] sm:$0xf0] }
 0x681   : > { %3434 = vmatpush.bf16.msrb.mxu1 %v4919_v53  ;;  %3443 = vmatpush.bf16.msra.mxu2 %v5111_v54  ;;  %v4858_v53 = vld [vmem:[%s6136_s28 + $0x2e8] sm:$0xf]  ;;  %v5495_v54 = vld [vmem:[%s6136_s28 + $0x2f4] sm:$0xf0]  ;;  %v4587_v59 = vor.u32 %v5427_v51, %v4586_v49  ;;  %v5031_v12 = vor.u32 %v5536_v60, %v5028_v61 }
 0x682   : > { %v5459_v49 = vld [vmem:[%s6136_s28 + $0x1d4] sm:$0xf0]  ;;  %v4794_v51 = vld [vmem:[%s6136_s28 + $0x268] sm:$0xf] }
 0x683   : > { %v5407_v60 = vld [vmem:[%s6136_s28 + $0x34] sm:$0xf0]  ;;  %v4698_v61 = vld [vmem:[%s6136_s28 + $0x1a8] sm:$0xf] }
 0x684   : > { %3405 = vmatpush.bf16.msrb.mxu0 %v4711_v63  ;;  %3422 = vmatpush.bf16.msrb.mxu3 %v4775_v0  ;;  %v4859_v63 = vor.u32 %v5495_v54, %v4858_v53  ;;  %v4570_v0 = vld [vmem:[%s6136_s28 + $0xa8] sm:$0xf] }
 0x685   : > { %3435 = vmatpush.bf16.msrb.mxu1 %v4903_v6  ;;  %3444 = vmatpush.bf16.msra.mxu2 %v5095_v11  ;;  %v4842_v6 = vld [vmem:[%s6136_s28 + $0x2c8] sm:$0xf]  ;;  %v5491_v11 = vld [vmem:[%s6136_s28 + $0x2d4] sm:$0xf0]  ;;  %v4571_v15 = vor.u32 %v5423_v3, %v4570_v0  ;;  %v5207_v3 = vor.u32 %v5580_v56, %v5204_v57 }
 0x686   : > { %v5475_v0 = vld [vmem:[%s6136_s28 + $0x254] sm:$0xf0]  ;;  %v4634_v57 = vld [vmem:[%s6136_s28 + $0x128] sm:$0xf] }
 0x687   : > { %v2069_v29 = vpop.f32.mrf.mxu2 }
 0x688   : > { %3406 = vmatpush.bf16.msrb.mxu0 %v4695_v19  ;;  %3423 = vmatpush.bf16.msrb.mxu3 %v4759_v4  ;;  %v2070_v33 = vadd.f32 %v2069_v29, %v1810_v18  ;;  %v4843_v18 = vor.u32 %v5491_v11, %v4842_v6  ;;  %v4554_v19 = vld [vmem:[%s6136_s28 + $0x88] sm:$0xf]  ;;  %v5419_v4 = vld [vmem:[%s6136_s28 + $0x94] sm:$0xf0] }
 0x689   : > { %3436 = vmatpush.bf16.msrb.mxu1 %v4887_v23  ;;  %3445 = vmatpush.bf16.msra.mxu2 %v5079_v24  ;;  %v5432_v23 = vld [vmem:[%s6136_s28 + $0x104] sm:$0xf]  ;;  %v5015_v24 = vor.u32 %v5532_v16, %v5012_v17  ;;  %v4555_v50 = vor.u32 %v5419_v4, %v4554_v19  ;;  %v4538_v29 = vld [vmem:[%s6136_s28 + $0x68] sm:$0xf]  ;;  %v5451_v17 = vld [vmem:[%s6136_s28 + $0x194] sm:$0xf0] }
 0x68a   : > { %v2079_v41 = vmax.f32 %v2070_v33, 0.0  ;;  %v5463_v33 = vld [vmem:[%s6136_s28 + $0x1f4] sm:$0xf0]  ;;  %v4539_v39 = vor.u32 %v5415_v31, %v4538_v29  ;;  %v4682_v16 = vld [vmem:[%s6136_s28 + $0x188] sm:$0xf] }
 0x68b   : > { %v4731_v40 = vor.u32 %v5463_v33, %v4730_v32  ;;  %v5471_v19 = vld [vmem:[%s6136_s28 + $0x234] sm:$0xf0]  ;;  %v5114_v4 = vld [vmem:[%s6136_s28 + $0x4e8] sm:$0xf] }
 0x68c   : > { %v6367_v52 = vpack.c.bf16 %v2079_v41, %v2079_v41  ;;  %3407 = vmatpush.bf16.msrb.mxu0 %v4679_v34  ;;  %3424 = vmatpush.bf16.msrb.mxu3 %v4743_v35  ;;  %v4615_v34 = vor.u32 %v5432_v23, %v4612_v25  ;;  %v4810_v35 = vld [vmem:[%s6136_s28 + $0x288] sm:$0xf]  ;;  %v5584_v41 = vld [vmem:[%s6136_s28 + $0x5c4] sm:$0xf]  ;;  %v4683_v23 = vor.u32 %v5451_v17, %v4682_v16  ;;  %v5172_v25 = vld [vmem:[%s6136_s28 + $0x570] sm:$0xf0] }
 0x68d   : > { %3437 = vmatpush.bf16.msrb.mxu1 %v4871_v36  ;;  %3446 = vmatpush.bf16.msra.mxu2 %v5063_v37  ;;  %v5483_v36 = vld [vmem:[%s6136_s28 + $0x294] sm:$0xf0]  ;;  %v4999_v37 = vor.u32 %v5528_v26, %v4996_v27  ;;  %v5274_v33 = vld [vmem:[%s6136_s28 + $0x628] sm:$0xf] }
 0x68e   : > { %5280 = vmatmul.msk.bf16.vlgmr.msra.gmra.mxu0 %vm1646_vm8, %v6367_v52  ;;  %3399 = vmatmul.bf16.vlgmr.msrb.gmra.mxu2 %v6289_v1  ;;  %v4811_v44 = vor.u32 %v5483_v36, %v4810_v35  ;;  %v5467_v29 = vld [vmem:[%s6136_s28 + $0x214] sm:$0xf0]  ;;  %v5568_v36 = vld [vmem:[%s6136_s28 + $0x544] sm:$0xf]  ;;  %v5050_v17 = vld [vmem:[%s6136_s28 + $0x468] sm:$0xf] }
 0x68f   : > { %v2071_v62 = vpop.f32.mrf.mxu2  ;;  %3425 = vmatmul.bf16.vlgmr.msrb.gmra.mxu3 %v6318_v47  ;;  %v5555_v31 = vld [vmem:[%s6136_s28 + $0x4d4] sm:$0xf0] }
 0x690   : > { %3475 = vmatpush.bf16.msra.mxu3 %v5271_v42  ;;  %3408 = vmatpush.bf16.msrb.mxu0 %v4663_v7  ;;  %v5220_v42 = vld [vmem:[%s6136_s28 + $0x5d0] sm:$0xf0]  ;;  %v5479_v7 = vld [vmem:[%s6136_s28 + $0x274] sm:$0xf0] }
 0x691   : > { %3482 = vmatpush.bf16.msra.mxu1 %v4603_v43  ;;  %3447 = vmatpush.bf16.msra.mxu2 %v5047_v55  ;;  %v4522_v43 = vld [vmem:[%s6136_s28 + $0x48] sm:$0xf]  ;;  %v5223_v53 = vor.u32 %v5584_v41, %v5220_v42  ;;  %v4715_v55 = vor.u32 %v5459_v49, %v4714_v46  ;;  %v5455_v62 = vld [vmem:[%s6136_s28 + $0x1b4] sm:$0xf0] }
 0x692   : > { %3438 = vmatmul.bf16.vlgmr.msrb.gmra.mxu1 %v6320_v48  ;;  %v4523_v54 = vor.u32 %v5411_v45, %v4522_v43  ;;  %v4699_v11 = vor.u32 %v5455_v62, %v4698_v61  ;;  %v5443_v41 = vld [vmem:[%s6136_s28 + $0x154] sm:$0xf0]  ;;  %v5082_v43 = vld [vmem:[%s6136_s28 + $0x4a8] sm:$0xf] }
 0x693   : > { %v5258_v46 = vld [vmem:[%s6136_s28 + $0x608] sm:$0xf]  ;;  %v5595_v49 = vld [vmem:[%s6136_s28 + $0x614] sm:$0xf0] }
 0x694   : > { %3476 = vmatpush.bf16.msra.mxu3 %v5255_v58  ;;  %3409 = vmatpush.bf16.msrb.mxu0 %v4647_v5  ;;  %v4506_v58 = vld [vmem:[%s6136_s28 + $0x28] sm:$0xf]  ;;  %v5576_v5 = vld [vmem:[%s6136_s28 + $0x584] sm:$0xf]  ;;  %v5547_v61 = vld [vmem:[%s6136_s28 + $0x494] sm:$0xf0] }
 0x695   : > { %3483 = vmatpush.bf16.msra.mxu1 %v4587_v59  ;;  %3448 = vmatpush.bf16.msra.mxu2 %v5031_v12  ;;  %v4795_v59 = vor.u32 %v5479_v7, %v4794_v51  ;;  %v4507_v6 = vor.u32 %v5407_v60, %v4506_v58  ;;  %v5188_v12 = vld [vmem:[%s6136_s28 + $0x590] sm:$0xf0]  ;;  %v5461_v51 = vld [vmem:[%s6136_s28 + $0x1ec] sm:$0xf]  ;;  %v5439_v58 = vld [vmem:[%s6136_s28 + $0x134] sm:$0xf0] }
 0x696   : > { %v5191_v21 = vor.u32 %v5576_v5, %v5188_v12  ;;  %v5066_v60 = vld [vmem:[%s6136_s28 + $0x488] sm:$0xf]  ;;  %v5560_v5 = vld [vmem:[%s6136_s28 + $0x504] sm:$0xf]  ;;  %v5527_v16 = vld [vmem:[%s6136_s28 + $0x3f4] sm:$0xf0] }
 0x697   : > { %v4618_v12 = vld [vmem:[%s6136_s28 + $0x108] sm:$0xf]  ;;  %v5067_v14 = vor.u32 %v5547_v61, %v5066_v60  ;;  %v5493_v60 = vld [vmem:[%s6136_s28 + $0x2ec] sm:$0xf]  ;;  %v4860_v61 = vld [vmem:[%s6136_s28 + $0x2f8] sm:$0xf0] }
 0x698   : > { %3508 = vmatpush.bf16.msrb.mxu3 %v4859_v63  ;;  %3410 = vmatpush.bf16.msrb.mxu0 %v4631_v20  ;;  %v4778_v63 = vld [vmem:[%s6136_s28 + $0x248] sm:$0xf]  ;;  %v5559_v20 = vld [vmem:[%s6136_s28 + $0x4f4] sm:$0xf0] }
 0x699   : > { %3484 = vmatpush.bf16.msra.mxu1 %v4571_v15  ;;  %3449 = vmatpush.bf16.msra.mxu2 %v5015_v24  ;;  %v4779_v15 = vor.u32 %v5475_v0, %v4778_v63  ;;  %v5572_v24 = vld [vmem:[%s6136_s28 + $0x564] sm:$0xf]  ;;  %v5115_v27 = vor.u32 %v5559_v20, %v5114_v4  ;;  %v5457_v0 = vld [vmem:[%s6136_s28 + $0x1cc] sm:$0xf]  ;;  %v5591_v4 = vld [vmem:[%s6136_s28 + $0x5f4] sm:$0xf0] }
 0x69a   : > { %v5175_v32 = vor.u32 %v5572_v24, %v5172_v25  ;;  %v5453_v24 = vld [vmem:[%s6136_s28 + $0x1ac] sm:$0xf]  ;;  %v4700_v25 = vld [vmem:[%s6136_s28 + $0x1b8] sm:$0xf0] }
 0x69c   : > { %3509 = vmatpush.bf16.msrb.mxu3 %v4843_v18  ;;  %3411 = vmatpush.bf16.msrb.mxu0 %v4615_v34  ;;  %v4762_v18 = vld [vmem:[%s6136_s28 + $0x228] sm:$0xf]  ;;  %v5599_v34 = vld [vmem:[%s6136_s28 + $0x634] sm:$0xf0] }
 0x69d   : > { %3485 = vmatpush.bf16.msra.mxu1 %v4555_v50  ;;  %3450 = vmatpush.bf16.msra.mxu2 %v4999_v37  ;;  %v4763_v26 = vor.u32 %v5471_v19, %v4762_v18  ;;  %v4666_v50 = vld [vmem:[%s6136_s28 + $0x168] sm:$0xf]  ;;  %v5156_v37 = vld [vmem:[%s6136_s28 + $0x550] sm:$0xf0]  ;;  %v5275_v42 = vor.u32 %v5599_v34, %v5274_v33  ;;  %v5543_v18 = vld [vmem:[%s6136_s28 + $0x474] sm:$0xf0] }
 0x69e   : > { %v4667_v35 = vor.u32 %v5447_v28, %v4666_v50  ;;  %v5159_v45 = vor.u32 %v5568_v36, %v5156_v37  ;;  %v5242_v19 = vld [vmem:[%s6136_s28 + $0x5e8] sm:$0xf]  ;;  %v5523_v28 = vld [vmem:[%s6136_s28 + $0x3d4] sm:$0xf0]  ;;  %v5449_v34 = vld [vmem:[%s6136_s28 + $0x18c] sm:$0xf] }
 0x69f   : > { %3412 = vmatmul.bf16.vlgmr.msrb.gmra.mxu0 %v6291_v2  ;;  %5281 = vmatmul.msk.bf16.vlgmr.msra.gmra.mxu3 %vm1646_vm8, %v6367_v52  ;;  %v4970_v50 = vld [vmem:[%s6136_s28 + $0x3c8] sm:$0xf] }
 0x6a0   : > { %3510 = vmatpush.bf16.msrb.mxu3 %v4827_v30  ;;  %3456 = vmatpush.bf16.msra.mxu0 %v5239_v38  ;;  %v5098_v30 = vld [vmem:[%s6136_s28 + $0x4c8] sm:$0xf]  ;;  %v4747_v38 = vor.u32 %v5467_v29, %v4746_v10  ;;  %v5539_v29 = vld [vmem:[%s6136_s28 + $0x454] sm:$0xf0]  ;;  %v4971_v33 = vor.u32 %v5523_v28, %v4970_v50  ;;  %v4828_v50 = vld [vmem:[%s6136_s28 + $0x2b8] sm:$0xf0] }
 0x6a1   : > { %3486 = vmatpush.bf16.msra.mxu1 %v4539_v39  ;;  %3495 = vmatpush.bf16.msrb.mxu2 %v4731_v40  ;;  %v5099_v39 = vor.u32 %v5555_v31, %v5098_v30  ;;  %v4650_v40 = vld [vmem:[%s6136_s28 + $0x148] sm:$0xf]  ;;  %v5587_v31 = vld [vmem:[%s6136_s28 + $0x5d4] sm:$0xf0] }
 0x6a2   : > { %3451 = vmatmul.bf16.vlgmr.msra.gmra.mxu2 %v6324_v8  ;;  %v4651_v7 = vor.u32 %v5443_v41, %v4650_v40  ;;  %v5034_v10 = vld [vmem:[%s6136_s28 + $0x448] sm:$0xf]  ;;  %v5535_v41 = vld [vmem:[%s6136_s28 + $0x434] sm:$0xf0] }
 0x6a3   : > { %v5226_v30 = vld [vmem:[%s6136_s28 + $0x5c8] sm:$0xf]  ;;  %v5035_v36 = vor.u32 %v5539_v29, %v5034_v10  ;;  %v5433_v10 = vld [vmem:[%s6136_s28 + $0x10c] sm:$0xf]  ;;  %v4620_v29 = vld [vmem:[%s6136_s28 + $0x118] sm:$0xf0] }
 0x6a4   : > { %3511 = vmatpush.bf16.msrb.mxu3 %v4811_v44  ;;  %3457 = vmatpush.bf16.msra.mxu0 %v5223_v53  ;;  %v5551_v44 = vld [vmem:[%s6136_s28 + $0x4b4] sm:$0xf0]  ;;  %v4732_v53 = vld [vmem:[%s6136_s28 + $0x1f8] sm:$0xf0]  ;;  %v5227_v37 = vor.u32 %v5587_v31, %v5226_v30  ;;  %v5018_v40 = vld [vmem:[%s6136_s28 + $0x428] sm:$0xf] }
 0x6a5   : > { %3487 = vmatpush.bf16.msra.mxu1 %v4523_v54  ;;  %3496 = vmatpush.bf16.msrb.mxu2 %v4715_v55  ;;  %v5564_v54 = vld [vmem:[%s6136_s28 + $0x524] sm:$0xf]  ;;  %v5140_v55 = vld [vmem:[%s6136_s28 + $0x530] sm:$0xf0]  ;;  %v5083_v56 = vor.u32 %v5551_v44, %v5082_v43  ;;  %v4735_v62 = vor.u32 %v5461_v51, %v4732_v53  ;;  %v5583_v43 = vld [vmem:[%s6136_s28 + $0x5b4] sm:$0xf0]  ;;  %v5019_v51 = vor.u32 %v5535_v41, %v5018_v40 }
 0x6a6   : > { %v5143_v63 = vor.u32 %v5564_v54, %v5140_v55  ;;  %v4938_v53 = vld [vmem:[%s6136_s28 + $0x388] sm:$0xf]  ;;  %v5515_v54 = vld [vmem:[%s6136_s28 + $0x394] sm:$0xf0]  ;;  %v5589_v30 = vld [vmem:[%s6136_s28 + $0x5ec] sm:$0xf] }
 0x6a7   : > { %v5002_v55 = vld [vmem:[%s6136_s28 + $0x408] sm:$0xf]  ;;  %v4812_v40 = vld [vmem:[%s6136_s28 + $0x298] sm:$0xf0] }
 0x6a8   : > { %3512 = vmatpush.bf16.msrb.mxu3 %v4795_v59  ;;  %3458 = vmatpush.bf16.msra.mxu0 %v5207_v3  ;;  %v5259_v59 = vor.u32 %v5595_v49, %v5258_v46  ;;  %v4716_v3 = vld [vmem:[%s6136_s28 + $0x1d8] sm:$0xf0]  ;;  %v5445_v46 = vld [vmem:[%s6136_s28 + $0x16c] sm:$0xf] }
 0x6a9   : > { %3488 = vmatpush.bf16.msra.mxu1 %v4507_v6  ;;  %3497 = vmatpush.bf16.msrb.mxu2 %v4699_v11  ;;  %v4635_v6 = vor.u32 %v5439_v58, %v4634_v57  ;;  %v5124_v11 = vld [vmem:[%s6136_s28 + $0x510] sm:$0xf0]  ;;  %v4719_v20 = vor.u32 %v5457_v0, %v4716_v3  ;;  %v4668_v49 = vld [vmem:[%s6136_s28 + $0x178] sm:$0xf0]  ;;  %v5194_v57 = vld [vmem:[%s6136_s28 + $0x588] sm:$0xf] }
 0x6aa   : > { %v5579_v58 = vld [vmem:[%s6136_s28 + $0x594] sm:$0xf0]  ;;  %v4652_v0 = vld [vmem:[%s6136_s28 + $0x158] sm:$0xf0] }
 0x6ac   : > { %3513 = vmatpush.bf16.msrb.mxu3 %v4779_v15  ;;  %3459 = vmatpush.bf16.msra.mxu0 %v5191_v21  ;;  %v4986_v15 = vld [vmem:[%s6136_s28 + $0x3e8] sm:$0xf]  ;;  %v5127_v21 = vor.u32 %v5560_v5, %v5124_v11  ;;  %v5195_v5 = vor.u32 %v5579_v58, %v5194_v57  ;;  %v5511_v11 = vld [vmem:[%s6136_s28 + $0x374] sm:$0xf0]  ;;  %v4796_v57 = vld [vmem:[%s6136_s28 + $0x278] sm:$0xf0] }
 0x6ad   : > { %3489 = vmatpush.bf16.msra.mxu1 %v4491_v22  ;;  %3498 = vmatpush.bf16.msrb.mxu2 %v4683_v23  ;;  %v4619_v22 = vor.u32 %v5435_v13, %v4618_v12  ;;  %v4987_v23 = vor.u32 %v5527_v16, %v4986_v15  ;;  %v4863_v12 = vor.u32 %v5493_v60, %v4860_v61  ;;  %v5178_v13 = vld [vmem:[%s6136_s28 + $0x568] sm:$0xf]  ;;  %v5489_v16 = vld [vmem:[%s6136_s28 + $0x2cc] sm:$0xf] }
 0x6ae   : > { %v5525_v58 = vld [vmem:[%s6136_s28 + $0x3ec] sm:$0xf] }
 0x6b0   : > { %3514 = vmatpush.bf16.msrb.mxu3 %v4763_v26  ;;  %3490 = vmatmul.bf16.vlgmr.msra.gmra.mxu1 %v6289_v1  ;;  %v5051_v26 = vor.u32 %v5543_v18, %v5050_v17  ;;  %v4844_v17 = vld [vmem:[%s6136_s28 + $0x2d8] sm:$0xf0] }
 0x6b1   : > { %3534 = vmatpush.bf16.msrb.mxu1 %v5115_v27  ;;  %3460 = vmatpush.bf16.msra.mxu0 %v5175_v32  ;;  %v5243_v27 = vor.u32 %v5591_v4, %v5242_v19  ;;  %v4703_v32 = vor.u32 %v5453_v24, %v4700_v25  ;;  %v5437_v19 = vld [vmem:[%s6136_s28 + $0x12c] sm:$0xf]  ;;  %v4636_v4 = vld [vmem:[%s6136_s28 + $0x138] sm:$0xf0]  ;;  %v5162_v24 = vld [vmem:[%s6136_s28 + $0x548] sm:$0xf] }
 0x6b2   : > { %3499 = vmatpush.bf16.msrb.mxu2 %v4667_v35  ;;  %v4684_v35 = vld [vmem:[%s6136_s28 + $0x198] sm:$0xf0]  ;;  %v5571_v25 = vld [vmem:[%s6136_s28 + $0x554] sm:$0xf0] }
 0x6b3   : > { %v4687_v44 = vor.u32 %v5449_v34, %v4684_v35  ;;  %v5163_v31 = vor.u32 %v5571_v25, %v5162_v24  ;;  %v5503_v34 = vld [vmem:[%s6136_s28 + $0x334] sm:$0xf0]  ;;  %v4764_v24 = vld [vmem:[%s6136_s28 + $0x238] sm:$0xf0]  ;;  %v5517_v25 = vld [vmem:[%s6136_s28 + $0x3ac] sm:$0xf] }
 0x6b4   : > { %3515 = vmatpush.bf16.msrb.mxu3 %v4747_v38  ;;  %v4954_v38 = vld [vmem:[%s6136_s28 + $0x3a8] sm:$0xf] }
 0x6b5   : > { %3535 = vmatpush.bf16.msrb.mxu1 %v5099_v39  ;;  %3461 = vmatpush.bf16.msra.mxu0 %v5159_v45  ;;  %v5519_v39 = vld [vmem:[%s6136_s28 + $0x3b4] sm:$0xf0] }
 0x6b6   : > { %3500 = vmatpush.bf16.msrb.mxu2 %v4651_v7  ;;  %v4955_v45 = vor.u32 %v5519_v39, %v4954_v38  ;;  %v4623_v38 = vor.u32 %v5433_v10, %v4620_v29  ;;  %v5481_v39 = vld [vmem:[%s6136_s28 + $0x28c] sm:$0xf]  ;;  %v5180_v10 = vld [vmem:[%s6136_s28 + $0x578] sm:$0xf0] }
 0x6b7   : > { %3516 = vmatmul.bf16.vlgmr.msrb.gmra.mxu3 %v6318_v47 }
 0x6b8   : > { %3566 = vmatpush.bf16.msra.mxu3 %v5275_v42  ;;  %v5210_v42 = vld [vmem:[%s6136_s28 + $0x5a8] sm:$0xf] }
 0x6b9   : > { %3536 = vmatpush.bf16.msrb.mxu1 %v5083_v56  ;;  %3462 = vmatpush.bf16.msra.mxu0 %v5143_v63  ;;  %v5211_v7 = vor.u32 %v5583_v43, %v5210_v42  ;;  %v5531_v56 = vld [vmem:[%s6136_s28 + $0x414] sm:$0xf0]  ;;  %v5441_v63 = vld [vmem:[%s6136_s28 + $0x14c] sm:$0xf] }
 0x6ba   : > { %3501 = vmatpush.bf16.msrb.mxu2 %v4635_v6  ;;  %v5003_v3 = vor.u32 %v5531_v56, %v5002_v55  ;;  %v4922_v6 = vld [vmem:[%s6136_s28 + $0x368] sm:$0xf]  ;;  %v4655_v15 = vor.u32 %v5441_v63, %v4652_v0  ;;  %v5585_v43 = vld [vmem:[%s6136_s28 + $0x5cc] sm:$0xf]  ;;  %v4604_v55 = vld [vmem:[%s6136_s28 + $0xf8] sm:$0xf0] }
 0x6bb   : > { %v4923_v18 = vor.u32 %v5511_v11, %v4922_v6  ;;  %v5477_v56 = vld [vmem:[%s6136_s28 + $0x26c] sm:$0xf] }
 0x6bc   : > { %3567 = vmatpush.bf16.msra.mxu3 %v5259_v59  ;;  %v4671_v59 = vor.u32 %v5445_v46, %v4668_v49  ;;  %v5499_v49 = vld [vmem:[%s6136_s28 + $0x314] sm:$0xf0]  ;;  %v5581_v0 = vld [vmem:[%s6136_s28 + $0x5ac] sm:$0xf] }
 0x6bd   : > { %3537 = vmatpush.bf16.msrb.mxu1 %v5067_v14  ;;  %3463 = vmatpush.bf16.msra.mxu0 %v5127_v21  ;;  %v5575_v14 = vld [vmem:[%s6136_s28 + $0x574] sm:$0xf0]  ;;  %v4906_v21 = vld [vmem:[%s6136_s28 + $0x348] sm:$0xf]  ;;  %v5425_v11 = vld [vmem:[%s6136_s28 + $0xcc] sm:$0xf] }
 0x6be   : > { %3502 = vmatpush.bf16.msrb.mxu2 %v4619_v22  ;;  %v5507_v22 = vld [vmem:[%s6136_s28 + $0x354] sm:$0xf0] }
 0x6bf   : > { %v4907_v28 = vor.u32 %v5507_v22, %v4906_v21  ;;  %v5421_v21 = vld [vmem:[%s6136_s28 + $0xac] sm:$0xf]  ;;  %v4572_v22 = vld [vmem:[%s6136_s28 + $0xb8] sm:$0xf0] }
 0x6c0   : > { %3586 = vmatpush.bf16.msrb.mxu3 %v4735_v62  ;;  %3464 = vmatmul.bf16.vlgmr.msra.gmra.mxu0 %v6326_v9  ;;  %v4939_v62 = vor.u32 %v5515_v54, %v4938_v53  ;;  %v4815_v53 = vor.u32 %v5481_v39, %v4812_v40  ;;  %v5429_v54 = vld [vmem:[%s6136_s28 + $0xec] sm:$0xf]  ;;  %v5276_v39 = vld [vmem:[%s6136_s28 + $0x638] sm:$0xf0] }
 0x6c1   : > { %3521 = vmatpush.bf16.msrb.mxu0 %v4987_v23  ;;  %3538 = vmatpush.bf16.msrb.mxu1 %v5051_v26  ;;  %v4847_v23 = vor.u32 %v5489_v16, %v4844_v17  ;;  %v4639_v26 = vor.u32 %v5437_v19, %v4636_v4  ;;  %v4607_v63 = vor.u32 %v5429_v54, %v4604_v55  ;;  %v4972_v16 = vld [vmem:[%s6136_s28 + $0x3d8] sm:$0xf0]  ;;  %v5593_v54 = vld [vmem:[%s6136_s28 + $0x60c] sm:$0xf] }
 0x6c2   : > { %3547 = vmatpush.bf16.msra.mxu2 %v5243_v27  ;;  %v5485_v27 = vld [vmem:[%s6136_s28 + $0x2ac] sm:$0xf]  ;;  %v5196_v19 = vld [vmem:[%s6136_s28 + $0x598] sm:$0xf0] }
 0x6c3   : > { %3503 = vmatmul.bf16.vlgmr.msrb.gmra.mxu2 %v6291_v2  ;;  %v4831_v35 = vor.u32 %v5485_v27, %v4828_v50  ;;  %v4575_v50 = vor.u32 %v5421_v21, %v4572_v22  ;;  %v5260_v55 = vld [vmem:[%s6136_s28 + $0x618] sm:$0xf0]  ;;  %v5497_v21 = vld [vmem:[%s6136_s28 + $0x30c] sm:$0xf] }
 0x6c4   : > { %3587 = vmatpush.bf16.msrb.mxu3 %v4719_v20  ;;  %v5179_v20 = vor.u32 %v5575_v14, %v5178_v13  ;;  %v5473_v13 = vld [vmem:[%s6136_s28 + $0x24c] sm:$0xf]  ;;  %v4780_v14 = vld [vmem:[%s6136_s28 + $0x258] sm:$0xf0] }
 0x6c5   : > { %3522 = vmatpush.bf16.msrb.mxu0 %v4971_v33  ;;  %3539 = vmatpush.bf16.msrb.mxu1 %v5035_v36  ;;  %v4890_v33 = vld [vmem:[%s6136_s28 + $0x328] sm:$0xf]  ;;  %v4783_v4 = vor.u32 %v5473_v13, %v4780_v14  ;;  %v5405_v13 = vld [vmem:[%s6136_s28 + $0x2c] sm:$0xf]  ;;  %v4508_v14 = vld [vmem:[%s6136_s28 + $0x38] sm:$0xf0] }
 0x6c6   : > { %3548 = vmatpush.bf16.msra.mxu2 %v5227_v37  ;;  %v5146_v36 = vld [vmem:[%s6136_s28 + $0x528] sm:$0xf]  ;;  %v5567_v37 = vld [vmem:[%s6136_s28 + $0x534] sm:$0xf0]  ;;  %v4891_v42 = vor.u32 %v5503_v34, %v4890_v33  ;;  %v5465_v33 = vld [vmem:[%s6136_s28 + $0x20c] sm:$0xf] }
 0x6c7   : > { %5282 = vmatmul.msk.bf16.vlgmr.msra.gmra.mxu3 %vm1646_vm8, %v6367_v52  ;;  %v5147_v46 = vor.u32 %v5567_v37, %v5146_v36  ;;  %v4748_v34 = vld [vmem:[%s6136_s28 + $0x218] sm:$0xf0] }
 0x6c8   : > { %3588 = vmatpush.bf16.msrb.mxu3 %v4703_v32  ;;  %v5244_v32 = vld [vmem:[%s6136_s28 + $0x5f8] sm:$0xf0] }
 0x6c9   : > { %3523 = vmatpush.bf16.msrb.mxu0 %v4955_v45  ;;  %3540 = vmatpush.bf16.msrb.mxu1 %v5019_v51  ;;  %v5247_v41 = vor.u32 %v5589_v30, %v5244_v32  ;;  %v4874_v45 = vld [vmem:[%s6136_s28 + $0x308] sm:$0xf]  ;;  %v4556_v32 = vld [vmem:[%s6136_s28 + $0x98] sm:$0xf0] }
 0x6ca   : > { %3549 = vmatpush.bf16.msra.mxu2 %v5211_v7  ;;  %v5130_v51 = vld [vmem:[%s6136_s28 + $0x508] sm:$0xf]  ;;  %v5563_v7 = vld [vmem:[%s6136_s28 + $0x514] sm:$0xf0]  ;;  %v4875_v61 = vor.u32 %v5499_v49, %v4874_v45  ;;  %v4940_v36 = vld [vmem:[%s6136_s28 + $0x398] sm:$0xf0] }
 0x6cb   : > { %v5413_v45 = vld [vmem:[%s6136_s28 + $0x6c] sm:$0xf]  ;;  %v4876_v22 = vld [vmem:[%s6136_s28 + $0x318] sm:$0xf0] }
 0x6cc   : > { %3589 = vmatpush.bf16.msrb.mxu3 %v4687_v44  ;;  %v5228_v44 = vld [vmem:[%s6136_s28 + $0x5d8] sm:$0xf0]  ;;  %v5509_v49 = vld [vmem:[%s6136_s28 + $0x36c] sm:$0xf] }
 0x6cd   : > { %3524 = vmatpush.bf16.msrb.mxu0 %v4939_v62  ;;  %3541 = vmatpush.bf16.msrb.mxu1 %v5003_v3  ;;  %v5231_v60 = vor.u32 %v5585_v43, %v5228_v44  ;;  %v5131_v62 = vor.u32 %v5563_v7, %v5130_v51  ;;  %v5212_v3 = vld [vmem:[%s6136_s28 + $0x5b8] sm:$0xf0]  ;;  %v4751_v43 = vor.u32 %v5465_v33, %v4748_v34  ;;  %v5549_v34 = vld [vmem:[%s6136_s28 + $0x4ac] sm:$0xf] }
 0x6ce   : > { %3550 = vmatpush.bf16.msra.mxu2 %v5195_v5  ;;  %v4799_v5 = vor.u32 %v5477_v56, %v4796_v57  ;;  %v5215_v17 = vor.u32 %v5581_v0, %v5212_v3  ;;  %v4924_v51 = vld [vmem:[%s6136_s28 + $0x378] sm:$0xf0]  ;;  %v5565_v57 = vld [vmem:[%s6136_s28 + $0x52c] sm:$0xf]  ;;  %v5263_v0 = vor.u32 %v5593_v54, %v5260_v55 }
 0x6cf   : > { %v5533_v55 = vld [vmem:[%s6136_s28 + $0x42c] sm:$0xf] }
 0x6d0   : > { %3590 = vmatpush.bf16.msrb.mxu3 %v4671_v59  ;;  %3542 = vmatmul.bf16.vlgmr.msrb.gmra.mxu1 %v6324_v8  ;;  %v4988_v59 = vld [vmem:[%s6136_s28 + $0x3f8] sm:$0xf0] }
 0x6d1   : > { %3599 = vmatpush.bf16.msra.mxu1 %v4863_v12  ;;  %3525 = vmatpush.bf16.msrb.mxu0 %v4923_v18  ;;  %v4991_v6 = vor.u32 %v5525_v58, %v4988_v59  ;;  %v4588_v12 = vld [vmem:[%s6136_s28 + $0xd8] sm:$0xf0]  ;;  %v5577_v18 = vld [vmem:[%s6136_s28 + $0x58c] sm:$0xf]  ;;  %v4927_v59 = vor.u32 %v5509_v49, %v4924_v51 }
 0x6d2   : > { %3551 = vmatpush.bf16.msra.mxu2 %v5179_v20  ;;  %v5199_v27 = vor.u32 %v5577_v18, %v5196_v19  ;;  %v5148_v58 = vld [vmem:[%s6136_s28 + $0x538] sm:$0xf0]  ;;  %v4511_v18 = vor.u32 %v5405_v13, %v4508_v14 }
 0x6d3   : > { %v5151_v3 = vor.u32 %v5565_v57, %v5148_v58 }
 0x6d4   : > { %3591 = vmatpush.bf16.msrb.mxu3 %v4655_v15  ;;  %v5521_v15 = vld [vmem:[%s6136_s28 + $0x3cc] sm:$0xf] }
 0x6d5   : > { %3600 = vmatpush.bf16.msra.mxu1 %v4847_v23  ;;  %3526 = vmatpush.bf16.msrb.mxu0 %v4907_v28  ;;  %v4975_v20 = vor.u32 %v5521_v15, %v4972_v16  ;;  %v5469_v23 = vld [vmem:[%s6136_s28 + $0x22c] sm:$0xf] }
 0x6d6   : > { %3552 = vmatpush.bf16.msra.mxu2 %v5163_v31  ;;  %v5573_v28 = vld [vmem:[%s6136_s28 + $0x56c] sm:$0xf]  ;;  %v4767_v29 = vor.u32 %v5469_v23, %v4764_v24  ;;  %v5116_v24 = vld [vmem:[%s6136_s28 + $0x4f8] sm:$0xf0] }
 0x6d7   : > { %v5417_v31 = vld [vmem:[%s6136_s28 + $0x8c] sm:$0xf]  ;;  %v5183_v37 = vor.u32 %v5573_v28, %v5180_v10 }
 0x6d8   : > { %3592 = vmatpush.bf16.msrb.mxu3 %v4639_v26  ;;  %v4956_v26 = vld [vmem:[%s6136_s28 + $0x3b8] sm:$0xf0]  ;;  %v4559_v40 = vor.u32 %v5417_v31, %v4556_v32  ;;  %v5501_v15 = vld [vmem:[%s6136_s28 + $0x32c] sm:$0xf] }
 0x6d9   : > { %3601 = vmatpush.bf16.msra.mxu1 %v4831_v35  ;;  %3527 = vmatpush.bf16.msrb.mxu0 %v4891_v42  ;;  %v4959_v30 = vor.u32 %v5517_v25, %v4956_v26  ;;  %v5513_v35 = vld [vmem:[%s6136_s28 + $0x38c] sm:$0xf]  ;;  %v5164_v42 = vld [vmem:[%s6136_s28 + $0x558] sm:$0xf0] }
 0x6da   : > { %3553 = vmatpush.bf16.msra.mxu2 %v5147_v46  ;;  %v4943_v44 = vor.u32 %v5513_v35, %v4940_v36  ;;  %v4540_v46 = vld [vmem:[%s6136_s28 + $0x78] sm:$0xf0]  ;;  %v5557_v23 = vld [vmem:[%s6136_s28 + $0x4ec] sm:$0xf] }
 0x6db   : > { %v4543_v56 = vor.u32 %v5413_v45, %v4540_v46  ;;  %v5553_v10 = vld [vmem:[%s6136_s28 + $0x4cc] sm:$0xf]  ;;  %v5084_v35 = vld [vmem:[%s6136_s28 + $0x4b8] sm:$0xf0] }
 0x6dc   : > { %3593 = vmatpush.bf16.msrb.mxu3 %v4623_v38  ;;  %v5597_v38 = vld [vmem:[%s6136_s28 + $0x62c] sm:$0xf]  ;;  %v5036_v45 = vld [vmem:[%s6136_s28 + $0x458] sm:$0xf0] }
 0x6dd   : > { %3602 = vmatpush.bf16.msra.mxu1 %v4815_v53  ;;  %3528 = vmatpush.bf16.msrb.mxu0 %v4875_v61  ;;  %v5279_v7 = vor.u32 %v5597_v38, %v5276_v39  ;;  %v4524_v61 = vld [vmem:[%s6136_s28 + $0x58] sm:$0xf0] }
 0x6de   : > { %3554 = vmatpush.bf16.msra.mxu2 %v5131_v62  ;;  %v5505_v62 = vld [vmem:[%s6136_s28 + $0x34c] sm:$0xf]  ;;  %v5068_v38 = vld [vmem:[%s6136_s28 + $0x498] sm:$0xf0] }
 0x6df   : > { %3594 = vmatmul.bf16.vlgmr.msrb.gmra.mxu3 %v6291_v2  ;;  %v4591_v2 = vor.u32 %v5425_v11, %v4588_v12  ;;  %v5132_v11 = vld [vmem:[%s6136_s28 + $0x518] sm:$0xf0] }
 0x6e0   : > { %3638 = vmatpush.bf16.msra.mxu3 %v5247_v41  ;;  %3529 = vmatmul.bf16.vlgmr.msrb.gmra.mxu0 %v6320_v48  ;;  %v5569_v41 = vld [vmem:[%s6136_s28 + $0x54c] sm:$0xf] }
 0x6e1   : > { %3573 = vmatpush.bf16.msra.mxu0 %v4607_v63  ;;  %3603 = vmatpush.bf16.msra.mxu1 %v4799_v5  ;;  %v5167_v53 = vor.u32 %v5569_v41, %v5164_v42  ;;  %v4908_v63 = vld [vmem:[%s6136_s28 + $0x358] sm:$0xf0] }
 0x6e2   : > { %3612 = vmatpush.bf16.msrb.mxu2 %v4991_v6  ;;  %v5561_v6 = vld [vmem:[%s6136_s28 + $0x50c] sm:$0xf]  ;;  %v4911_v12 = vor.u32 %v5505_v62, %v4908_v63 }
 0x6e3   : > { %3555 = vmatmul.bf16.vlgmr.msra.gmra.mxu2 %v6326_v9  ;;  %v5135_v16 = vor.u32 %v5561_v6, %v5132_v11 }
 0x6e4   : > { %3639 = vmatpush.bf16.msra.mxu3 %v5231_v60  ;;  %v5409_v60 = vld [vmem:[%s6136_s28 + $0x4c] sm:$0xf] }
 0x6e5   : > { %3574 = vmatpush.bf16.msra.mxu0 %v4591_v2  ;;  %3604 = vmatpush.bf16.msra.mxu1 %v4783_v4  ;;  %v4527_v5 = vor.u32 %v5409_v60, %v4524_v61  ;;  %v5401_v4 = vld [vmem:[%s6136_s28 + $0xc] sm:$0xf]  ;;  %v5004_v61 = vld [vmem:[%s6136_s28 + $0x418] sm:$0xf0] }
 0x6e6   : > { %3613 = vmatpush.bf16.msrb.mxu2 %v4975_v20  ;;  %v4492_v20 = vld [vmem:[%s6136_s28 + $0x18] sm:$0xf0]  ;;  %v5529_v60 = vld [vmem:[%s6136_s28 + $0x40c] sm:$0xf] }
 0x6e7   : > { %v4495_v26 = vor.u32 %v5401_v4, %v4492_v20 }
 0x6e8   : > { %3640 = vmatpush.bf16.msra.mxu3 %v5215_v17  ;;  %v6598_v17 = vld [vmem:[%s684_s0] sm:$0xf] }
 0x6e9   : > { %3575 = vmatpush.bf16.msra.mxu0 %v4575_v50  ;;  %3605 = vmatpush.bf16.msra.mxu1 %v4767_v29  ;;  %v2289_v25 = vperm.slane %v6598_v17, 0  ;;  %v5119_v50 = vor.u32 %v5557_v23, %v5116_v24  ;;  %v5100_v29 = vld [vmem:[%s6136_s28 + $0x4d8] sm:$0xf0]  ;;  %v2290_v6 = vperm.slane %v6598_v17, 1  ;;  %v2291_v24 = vperm.slane %v6598_v17, 2 }
 0x6ea   : > { %3614 = vmatpush.bf16.msrb.mxu2 %v4959_v30  ;;  %v5103_v32 = vor.u32 %v5553_v10, %v5100_v29 }
 0x6eb   : > { %v3322_v2 = vpop.f32.mrf.mxu1 }
 0x6ec   : > { %3641 = vmatpush.bf16.msra.mxu3 %v5199_v27  ;;  %v4879_v27 = vor.u32 %v5497_v21, %v4876_v22 }
 0x6ed   : > { %3576 = vmatpush.bf16.msra.mxu0 %v4559_v40  ;;  %3606 = vmatpush.bf16.msra.mxu1 %v4751_v43  ;;  %v5052_v43 = vld [vmem:[%s6136_s28 + $0x478] sm:$0xf0] }
 0x6ee   : > { %3615 = vmatpush.bf16.msrb.mxu2 %v4943_v44 }
 0x6f0   : > { %3642 = vmatpush.bf16.msra.mxu3 %v5183_v37  ;;  %3607 = vmatmul.bf16.vlgmr.msra.gmra.mxu1 %v6318_v47  ;;  %v4892_v47 = vld [vmem:[%s6136_s28 + $0x338] sm:$0xf0]  ;;  %v5545_v37 = vld [vmem:[%s6136_s28 + $0x48c] sm:$0xf] }
 0x6f1   : > { %3657 = vmatpush.bf16.msrb.mxu1 %v5279_v7  ;;  %3577 = vmatpush.bf16.msra.mxu0 %v4543_v56  ;;  %v4895_v19 = vor.u32 %v5501_v15, %v4892_v47  ;;  %v3309_v28 = vpop.f32.mrf.mxu3  ;;  %v5071_v42 = vor.u32 %v5545_v37, %v5068_v38  ;;  %v5020_v56 = vld [vmem:[%s6136_s28 + $0x438] sm:$0xf0] }
 0x6f2   : > { %3616 = vmatpush.bf16.msrb.mxu2 %v4927_v59  ;;  %v3310_v30 = vadd.f32 %v3309_v28, %v2289_v25  ;;  %v5023_v58 = vor.u32 %v5533_v55, %v5020_v56 }
 0x6f3   : > { %v3324_v31 = vpop.f32.mrf.mxu1 }
 0x6f4   : > { %3643 = vmatpush.bf16.msra.mxu3 %v5167_v53  ;;  %v3323_v33 = vadd.f32 %v3322_v2, %v3310_v30 }
 0x6f5   : > { %3658 = vmatpush.bf16.msrb.mxu1 %v5263_v0  ;;  %3578 = vmatpush.bf16.msra.mxu0 %v4527_v5  ;;  %v5007_v0 = vor.u32 %v5529_v60, %v5004_v61  ;;  %v2292_v61 = vperm.slane %v6598_v17, 3 }
 0x6f6   : > { %3617 = vmatpush.bf16.msrb.mxu2 %v4911_v12 }
 0x6f8   : > { %3644 = vmatpush.bf16.msra.mxu3 %v5151_v3 }
 0x6f9   : > { %3579 = vmatpush.bf16.msra.mxu0 %v4511_v18  ;;  %v3311_v36 = vpop.f32.mrf.mxu3 }
 0x6fa   : > { %3618 = vmatpush.bf16.msrb.mxu2 %v4895_v19 }
 0x6fb   : > { %v3335_v39 = vpop.f32.mrf.mxu0 }
 0x6fc   : > { %3645 = vmatpush.bf16.msra.mxu3 %v5135_v16  ;;  %v3336_v40 = vadd.f32 %v3335_v39, %v3323_v33  ;;  %v3374_v41 = vpop.f32.mrf.mxu1 }
 0x6fd   : > { %3580 = vmatpush.bf16.msra.mxu0 %v4495_v26 }
 0x6fe   : > { %3619 = vmatpush.bf16.msrb.mxu2 %v4879_v27 }
 0x6ff   : > { %3646 = vmatmul.bf16.vlgmr.msra.gmra.mxu3 %v6326_v9  ;;  %v5087_v9 = vor.u32 %v5549_v34, %v5084_v35 }
 0x700   : > { %3581 = vmatmul.bf16.vlgmr.msra.gmra.mxu0 %v6289_v1  ;;  %5283 = vmatmul.msk.bf16.vlgmr.msrb.gmra.mxu1 %vm1646_vm8, %v6367_v52  ;;  %v5541_v1 = vld [vmem:[%s6136_s28 + $0x46c] sm:$0xf]  ;;  %vm3680_vm8 = vmor %vm3679_vm7, %vm3678_vm5 }
 0x701   : > { %3625 = vmatpush.bf16.msrb.mxu0 %v5119_v50  ;;  %3620 = vmatmul.bf16.vlgmr.msrb.gmra.mxu2 %v6320_v48  ;;  %v5055_v48 = vor.u32 %v5541_v1, %v5052_v43  ;;  %v3348_v44 = vpop.f32.mrf.mxu2  ;;  %v5537_v52 = vld [vmem:[%s6136_s28 + $0x44c] sm:$0xf] }
 0x702   : > { %v3349_v46 = vadd.f32 %v3348_v44, %v3336_v40  ;;  %v3361_v49 = vpop.f32.mrf.mxu3  ;;  %v5039_v54 = vor.u32 %v5537_v52, %v5036_v45 }
 0x703   : > { %v3337_v51 = vpop.f32.mrf.mxu0 }
 0x704   : > { %v3362_v7 = vadd.f32 %v3361_v49, %v3349_v46  ;;  %v3376_v53 = vpop.f32.mrf.mxu1 }
 0x705   : > { %3626 = vmatpush.bf16.msrb.mxu0 %v5103_v32 }
 0x706   : > { %v3375_v57 = vadd.f32 %v3374_v41, %v3362_v7 }
 0x709   : > { %3627 = vmatpush.bf16.msrb.mxu0 %v5087_v9  ;;  %v3350_v59 = vpop.f32.mrf.mxu2 }
 0x70a   : > { %v3363_v62 = vpop.f32.mrf.mxu3 }
 0x70b   : > { %v3387_v63 = vpop.f32.mrf.mxu0 }
 0x70c   : > { %v3388_v3 = vadd.f32 %v3387_v63, %v3375_v57 }
 0x70d   : > { %3628 = vmatpush.bf16.msrb.mxu0 %v5071_v42 }
 0x70f   : > { %v3439_v5 = vpop.f32.mrf.mxu1 }
 0x711   : > { %3629 = vmatpush.bf16.msrb.mxu0 %v5055_v48  ;;  %v3400_v11 = vpop.f32.mrf.mxu2 }
 0x712   : > { %v3401_v12 = vadd.f32 %v3400_v11, %v2290_v6  ;;  %v3426_v13 = vpop.f32.mrf.mxu3 }
 0x713   : > { %v3389_v14 = vpop.f32.mrf.mxu0 }
 0x715   : > { %3630 = vmatpush.bf16.msrb.mxu0 %v5039_v54 }
 0x717   : > { %v3441_v15 = vpop.f32.mrf.mxu1 }
 0x719   : > { %3631 = vmatpush.bf16.msrb.mxu0 %v5023_v58  ;;  %v3402_v47 = vpop.f32.mrf.mxu2 }
 0x71a   : > { %v3428_v16 = vpop.f32.mrf.mxu3 }
 0x71c   : > { %v3413_v2 = vpop.f32.mrf.mxu0 }
 0x71d   : > { %3632 = vmatpush.bf16.msrb.mxu0 %v5007_v0  ;;  %v3414_v18 = vadd.f32 %v3413_v2, %v3401_v12 }
 0x71f   : > { %v3427_v19 = vadd.f32 %v3426_v13, %v3414_v18 }
 0x720   : > { %3633 = vmatmul.bf16.vlgmr.msrb.gmra.mxu0 %v6324_v8 }
 0x721   : > { %v3440_v4 = vadd.f32 %v3439_v5, %v3427_v19 }
 0x722   : > { %v3478_v21 = vpop.f32.mrf.mxu3 }
 0x724   : > { %v3415_v23 = vpop.f32.mrf.mxu0 }
 0x725   : > { %v3452_v20 = vpop.f32.mrf.mxu2 }
 0x726   : > { %v3453_v22 = vadd.f32 %v3452_v20, %v3440_v4 }
 0x72a   : > { %v3480_v50 = vpop.f32.mrf.mxu3 }
 0x72d   : > { %v3491_v25 = vpop.f32.mrf.mxu1  ;;  %v3454_v27 = vpop.f32.mrf.mxu2 }
 0x72e   : > { %v3492_v26 = vadd.f32 %v3491_v25, %v2291_v24 }
 0x735   : > { %v3493_v28 = vpop.f32.mrf.mxu1 }
 0x73a   : > { %v3517_v8 = vpop.f32.mrf.mxu3 }
 0x73d   : > { %v3465_v10 = vpop.f32.mrf.mxu0 }
 0x73e   : > { %v3466_v29 = vadd.f32 %v3465_v10, %v3453_v22 }
 0x740   : > { %v3479_v30 = vadd.f32 %v3478_v21, %v3466_v29 }
 0x742   : > { %v3519_v31 = vpop.f32.mrf.mxu3  ;;  %v3668_v32 = vrot.slane %v3479_v30, 6 }
 0x744   : > { %v3671_v33 = vsel %vm762_vm0, %v3388_v3, %v3668_v32 }
 0x745   : > { %v3467_v9 = vpop.f32.mrf.mxu0 }
 0x746   : > { %v3504_v34 = vpop.f32.mrf.mxu2 }
 0x747   : > { %v3505_v35 = vadd.f32 %v3504_v34, %v3492_v26 }
 0x749   : > { %v3518_v36 = vadd.f32 %v3517_v8, %v3505_v35 }
 0x74a   : > { %v3569_v37 = vpop.f32.mrf.mxu3 }
 0x74d   : > { %v3543_v38 = vpop.f32.mrf.mxu1 }
 0x74e   : > { %v3506_v39 = vpop.f32.mrf.mxu2 }
 0x752   : > { %v3571_v40 = vpop.f32.mrf.mxu3 }
 0x755   : > { %v3545_v41 = vpop.f32.mrf.mxu1 }
 0x75d   : > { %v3530_v42 = vpop.f32.mrf.mxu0 }
 0x75e   : > { %v3531_v1 = vadd.f32 %v3530_v42, %v3518_v36 }
 0x760   : > { %v3544_v48 = vadd.f32 %v3543_v38, %v3531_v1 }
 0x762   : > { %v3595_v43 = vpop.f32.mrf.mxu3 }
 0x765   : > { %v3532_v45 = vpop.f32.mrf.mxu0 }
 0x766   : > { %v3556_v44 = vpop.f32.mrf.mxu2 }
 0x767   : > { %v3557_v52 = vadd.f32 %v3556_v44, %v3544_v48 }
 0x769   : > { %v3570_v49 = vadd.f32 %v3569_v37, %v3557_v52 }
 0x76a   : > { %v3597_v46 = vpop.f32.mrf.mxu3 }
 0x76b   : > { %v3669_v14 = vrot.slane %v3570_v49, 4 }
 0x76d   : > { %v3608_v51 = vpop.f32.mrf.mxu1 }
 0x76e   : > { %v3558_v7 = vpop.f32.mrf.mxu2 }
 0x775   : > { %v3610_v53 = vpop.f32.mrf.mxu1 }
 0x77d   : > { %v3582_v54 = vpop.f32.mrf.mxu0  ;;  %v3660_v56 = vpop.f32.mrf.mxu1 }
 0x77e   : > { %v3583_v63 = vadd.f32 %v3582_v54, %v2292_v61 }
 0x780   : > { %v3596_v0 = vadd.f32 %v3595_v43, %v3583_v63 }
 0x782   : > { %v3647_v55 = vpop.f32.mrf.mxu3  ;;  %v3609_v3 = vadd.f32 %v3608_v51, %v3596_v0 }
 0x784   : > { %v3621_v57 = vpop.f32.mrf.mxu2 }
 0x785   : > { %v3584_v58 = vpop.f32.mrf.mxu0  ;;  %v3662_v60 = vpop.f32.mrf.mxu1  ;;  %v3622_v5 = vadd.f32 %v3621_v57, %v3609_v3 }
 0x78a   : > { %v3649_v59 = vpop.f32.mrf.mxu3 }
 0x78c   : > { %v3623_v62 = vpop.f32.mrf.mxu2 }
 0x79d   : > { %v3634_v6 = vpop.f32.mrf.mxu0 }
 0x79e   : > { %v3635_v11 = vadd.f32 %v3634_v6, %v3622_v5 }
 0x7a0   : > { %v3648_v12 = vadd.f32 %v3647_v55, %v3635_v11 }
 0x7a2   : > { %v3661_v13 = vadd.f32 %v3660_v56, %v3648_v12 }
 0x7a4   : > { %v3670_v15 = vrot.slane %v3661_v13, 2 }
 0x7a5   : > { %v3636_v17 = vpop.f32.mrf.mxu0 }
 0x7a6   : > { %v3673_v47 = vsel %vm3672_vm3, %v3669_v14, %v3670_v15 }
 0x7a7   : > { %v3674_v16 = vsel %vm1626_vm6, %v3671_v33, %v3673_v47 }
 0x7a8   : > { %3681 = vst.msk [vmem:[%s689_s23] sm:$0xff] %vm3680_vm8, %v3674_v16 }
 0x7a9 PF: > { %s24_s29 = sadd.s32 1, %s5664_s29  }
 0x7aa   : > { %p21_p4 = scmp.ge.s32.totalorder %s24_s29, 5  }
 0x7ac   :  { %23 = sbr.rel (!%p21_p4) target bundleno = 2 (0x2), region = 150 }

</bundles_post_ra>
